<compile_context>
chip_gen: v7x
topology: tpu7x:2x2x1
jax: 0.10.0
libtpu: 0.0.40
codegen_flags: <defaults>
</compile_context>

<pallas_src>
import jax
import jax.numpy as jnp
from jax import lax
from jax.experimental import pallas as pl
from jax.experimental.pallas import tpu as pltpu


# ----------------------------------------------------------------------------
# Shared epilogue: +bias, optional pre-ReLU tap, ReLU, optional 2x2 max-pool,
# halo'd write of the next layer's pre-padded activation.
# ----------------------------------------------------------------------------
def _finish(acc, b_ref, out_refs, *, H, W, TC, tap, pool, need_act):
    acc = acc + b_ref[...]                           # (HW, TC) + (1, TC)

    refs = list(out_refs)
    act_ref = refs.pop(0) if need_act else None
    if tap:                                          # pre-ReLU feature tap
        tap_ref = refs.pop(0)
        tap_ref[...] = acc.reshape(1, H, W, TC)

    if not need_act:
        return

    y = jnp.maximum(acc, 0.0)                        # fused ReLU
    if pool:                                         # fused 2x2 / stride-2 max pool
        y = y.reshape(H // 2, 2, W, TC)
        y = jnp.maximum(y[:, 0], y[:, 1])            # (H/2, W, TC)
        y = y.reshape(H // 2, W // 2, 2, TC)
        y = jnp.maximum(y[:, :, 0], y[:, :, 1])      # (H/2, W/2, TC)
        ho, wo = H // 2, W // 2
    else:
        y = y.reshape(H, W, TC)
        ho, wo = H, W

    # Next layer's pre-padded activation: zero halo + interior.
    act_ref[...] = jnp.zeros_like(act_ref)
    act_ref[0, 1:ho + 1, 1:wo + 1, :] = y.astype(act_ref.dtype)


# ----------------------------------------------------------------------------
# Generic fused conv3x3 kernel (Cin >= 64 layers): 9 shifted MXU matmuls.
# ----------------------------------------------------------------------------
def _make_conv_kernel(H, W, Cin, TC, tap, pool, need_act):
    """x_ref : (1, H+2, W+2, Cin) bf16 pre-padded input tile (one batch elem)
       w_ref : (9, Cin, TC)       bf16 weight taps (k = ky*3 + kx)
       b_ref : (1, TC)            f32 bias slice
       out_refs: [act?, tap?] per _finish()."""
    HW = H * W

    def kernel(x_ref, w_ref, b_ref, *out_refs):
        acc = jnp.zeros((HW, TC), jnp.float32)
        for dy in range(3):
            for dx in range(3):
                patch = x_ref[0, dy:dy + H, dx:dx + W, :].reshape(HW, Cin)
                acc = acc + jnp.dot(patch, w_ref[dy * 3 + dx],
                                    preferred_element_type=jnp.float32)
        _finish(acc, b_ref, out_refs, H=H, W=W, TC=TC,
                tap=tap, pool=pool, need_act=need_act)

    return kernel


# ----------------------------------------------------------------------------
# K-packed (im2col) fused conv3x3 kernel for the low-channel stem (Cin = 3):
# one (HW, 9*Cin) x (9*Cin, TC) MXU matmul.
# ----------------------------------------------------------------------------
def _make_im2col_kernel(H, W, K, TC, tap, pool, need_act):
    HW = H * W

    def kernel(x_ref, w_ref, b_ref, *out_refs):
        patches = x_ref[...].reshape(HW, K)          # (HW, 9*Cin) bf16
        acc = jnp.dot(patches, w_ref[...], preferred_element_type=jnp.float32)
        _finish(acc, b_ref, out_refs, H=H, W=W, TC=TC,
                tap=tap, pool=pool, need_act=need_act)

    return kernel


# ----------------------------------------------------------------------------
# Output shapes / BlockSpecs shared by both conv wrappers.
# ----------------------------------------------------------------------------
def _out_layout(N, H, W, Ho, Wo, Cout, TC, tap, need_act):
    shapes, specs = [], []
    if need_act:
        shapes.append(jax.ShapeDtypeStruct((N, Ho + 2, Wo + 2, Cout), jnp.bfloat16))
        specs.append(pl.BlockSpec((1, Ho + 2, Wo + 2, TC), lambda n, j: (n, 0, 0, j)))
    if tap:
        shapes.append(jax.ShapeDtypeStruct((N, H, W, Cout), jnp.float32))
        specs.append(pl.BlockSpec((1, H, W, TC), lambda n, j: (n, 0, 0, j)))
    if len(shapes) == 1:
        return shapes[0], specs[0]
    return tuple(shapes), tuple(specs)


_COMPILER_PARAMS = pltpu.CompilerParams(
    dimension_semantics=("parallel", "parallel"),
    vmem_limit_bytes=32 * 1024 * 1024)


# ----------------------------------------------------------------------------
# Wrappers
# ----------------------------------------------------------------------------
def conv3x3_fused(xp, w, b, *, tap, pool, need_act=True):
    """xp: (N, H+2, W+2, Cin) bf16 pre-padded activations.
       w : (3, 3, Cin, Cout) f32 HWIO weights, b: (Cout,) f32 bias.
       Returns [padded bf16 activation (N, Ho+2, Wo+2, Cout) if need_act]
       and [pre-ReLU f32 conv output (N, H, W, Cout) if tap]."""
    N, Hp, Wp, Cin = xp.shape
    H, W = Hp - 2, Wp - 2
    Cout = w.shape[-1]
    if pool:
        assert H % 2 == 0 and W % 2 == 0
    Ho, Wo = (H // 2, W // 2) if pool else (H, W)

    TC = min(Cout, 256)                 # Cout tile (MXU-width friendly)
    assert Cout % TC == 0
    nj = Cout // TC

    w9 = w.reshape(9, Cin, Cout).astype(jnp.bfloat16)
    b2 = b.reshape(1, Cout).astype(jnp.float32)

    kernel = _make_conv_kernel(H, W, Cin, TC, tap, pool, need_act)
    out_shape, out_specs = _out_layout(N, H, W, Ho, Wo, Cout, TC, tap, need_act)

    return pl.pallas_call(
        kernel,
        out_shape=out_shape,
        grid=(N, nj),
        in_specs=[
            # activation tile: constant block index across the inner j axis
            pl.BlockSpec((1, Hp, Wp, Cin), lambda n, j: (n, 0, 0, 0)),
            pl.BlockSpec((9, Cin, TC), lambda n, j: (0, 0, j)),
            pl.BlockSpec((1, TC), lambda n, j: (0, j)),
        ],
        out_specs=out_specs,
        compiler_params=_COMPILER_PARAMS,
    )(xp, w9, b2)


def conv3x3_first_fused(x, w, b, *, tap, pool, need_act=True):
    """Stem conv for low-channel input.  x: (N, H, W, Cin) bf16 UNpadded.
       Wrapper-side im2col packs the 9 taps into K = 9*Cin for one matmul."""
    N, H, W, Cin = x.shape
    Cout = w.shape[-1]
    K = 9 * Cin
    if pool:
        assert H % 2 == 0 and W % 2 == 0
    Ho, Wo = (H // 2, W // 2) if pool else (H, W)

    TC = min(Cout, 256)
    assert Cout % TC == 0
    nj = Cout // TC

    # Tiny (3-channel) input: do the im2col in plain XLA, once.
    xpad = jnp.pad(x, ((0, 0), (1, 1), (1, 1), (0, 0)))
    cols = [xpad[:, dy:dy + H, dx:dx + W, :] for dy in range(3) for dx in range(3)]
    xcol = jnp.concatenate(cols, axis=-1).astype(jnp.bfloat16)     # (N, H, W, 9*Cin)

    wK = w.reshape(K, Cout).astype(jnp.bfloat16)   # (dy,dx,c) order matches cols
    b2 = b.reshape(1, Cout).astype(jnp.float32)

    kernel = _make_im2col_kernel(H, W, K, TC, tap, pool, need_act)
    out_shape, out_specs = _out_layout(N, H, W, Ho, Wo, Cout, TC, tap, need_act)

    return pl.pallas_call(
        kernel,
        out_shape=out_shape,
        grid=(N, nj),
        in_specs=[
            pl.BlockSpec((1, H, W, K), lambda n, j: (n, 0, 0, 0)),
            pl.BlockSpec((K, TC), lambda n, j: (0, j)),
            pl.BlockSpec((1, TC), lambda n, j: (0, j)),
        ],
        out_specs=out_specs,
        compiler_params=_COMPILER_PARAMS,
    )(xcol, wK, b2)


# ----------------------------------------------------------------------------
# VGG19 "features" module (torchvision cfg 'E'), deterministic synthetic weights
# ----------------------------------------------------------------------------
VGG19_CFG = [64, 64, "M", 128, 128, "M", 256, 256, 256, 256, "M",
             512, 512, 512, 512, "M", 512, 512, 512, 512, "M"]

FEATURE_TAPS = (0, 5, 10, 19, 28)     # same indices as the PyTorch module


def build_vgg19_layers(key, in_channels=3):
    """Sequential layer list [(kind, w, b), ...] matching torchvision
    vgg19.features indexing (conv, relu, ..., pool).  Weights f32 HWIO."""
    layers = []
    cin = in_channels
    for v in VGG19_CFG:
        if v == "M":
            layers.append(("pool", None, None))
        else:
            key, kw, kb = jax.random.split(key, 3)
            fan_in = 9 * cin
            w = jax.random.normal(kw, (3, 3, cin, v), jnp.float32) * jnp.sqrt(
                jnp.float32(2.0 / fan_in))
            b = 0.01 * jax.random.normal(kb, (v,), jnp.float32)
            layers.append(("conv", w, b))
            layers.append(("relu", None, None))
            cin = v
    return layers


def vgg19_forward(x_nchw, layers, taps=FEATURE_TAPS):
    """Pallas forward.  Returns list of NCHW f32 feature maps (conv outputs
    at tap indices, pre-ReLU — matching the PyTorch module)."""
    x = jnp.transpose(x_nchw, (0, 2, 3, 1)).astype(jnp.bfloat16)   # NCHW -> NHWC
    feats = []
    last_tap = max(taps)
    idx = 0
    xp = None
    while idx < len(layers):
        kind, w, b = layers[idx]
        assert kind == "conv", f"unexpected layer kind at {idx}: {kind}"
        tap = idx in taps
        need_act = idx != last_tap
        pool = need_act and (idx + 2 < len(layers)) and layers[idx + 2][0] == "pool"

        if idx == 0:
            out = conv3x3_first_fused(x, w, b, tap=tap, pool=pool, need_act=need_act)
        else:
            out = conv3x3_fused(xp, w, b, tap=tap, pool=pool, need_act=need_act)

        outs = list(out) if isinstance(out, (tuple, list)) else [out]
        if need_act:
            xp = outs.pop(0)
        if tap:
            feats.append(jnp.transpose(outs.pop(0), (0, 3, 1, 2)))  # back to NCHW

        if idx == last_tap:
            # TODO(synk): the reference loop also runs layers 29-36 whose
            # outputs are discarded; skipped since they cannot affect results.
            break
        idx += 3 if pool else 2                                     # skip relu(/pool)
    return feats


def vgg19_forward_ref(x_nchw, layers, taps=FEATURE_TAPS):
    """Pure-JAX reference with the same bf16-weights/activations + f32
    accumulation numerics as the Pallas path."""
    x = jnp.transpose(x_nchw, (0, 2, 3, 1)).astype(jnp.bfloat16)    # NHWC bf16
    feats = []
    for idx, (kind, w, b) in enumerate(layers):
        if kind == "conv":
            y = lax.conv_general_dilated(
                x, w.astype(jnp.bfloat16), window_strides=(1, 1),
                padding=((1, 1), (1, 1)),
                dimension_numbers=("NHWC", "HWIO", "NHWC"),
                preferred_element_type=jnp.float32)
            y = y + b[None, None, None, :]
            if idx in taps:
                feats.append(jnp.transpose(y, (0, 3, 1, 2)))
            x = y
        elif kind == "relu":
            x = jnp.maximum(x, 0.0).astype(jnp.bfloat16)
        else:  # 2x2 max-pool, stride 2
            N, H, W, C = x.shape
            x = x.reshape(N, H // 2, 2, W // 2, 2, C).max(axis=(2, 4))
        if idx == max(taps):
            break
    return feats


# ----------------------------------------------------------------------------
if __name__ == "__main__":
    key = jax.random.PRNGKey(0)
    key, kx = jax.random.split(key)

    # Small input consistent with the module: NCHW, 3 RGB channels.
    x = jax.random.normal(kx, (2, 3, 32, 32), jnp.float32)

    layers = build_vgg19_layers(key, in_channels=3)

    feats = vgg19_forward(x, layers)
    feats = [jax.block_until_ready(f) for f in feats]

    # Check against a numerics-matched pure-JAX reference.
    ref_feats = vgg19_forward_ref(x, layers)
    expected_channels = (64, 128, 256, 512, 512)
    assert len(feats) == len(expected_channels)
    for i, (f, r, c) in enumerate(zip(feats, ref_feats, expected_channels)):
        assert f.shape == r.shape, (i, f.shape, r.shape)
        assert f.shape[1] == c, (i, f.shape)
        max_err = float(jnp.max(jnp.abs(f - r)))
        assert jnp.allclose(f, r, rtol=3e-2, atol=3e-2), (
            f"feature {i} mismatch, max abs err {max_err}")

    print("KERNEL_OK")
</pallas_src>

<mosaic_0001>
module attributes {stable_mosaic.version = 11 : i64} {
  func.func @kernel(%arg0: i32, %arg1: i32, %arg2: memref<1x32x32x27xbf16, #tpu.memory_space<vmem>>, %arg3: memref<27x64xbf16, #tpu.memory_space<vmem>>, %arg4: memref<1x64xf32, #tpu.memory_space<vmem>>, %arg5: memref<1x34x34x64xbf16, #tpu.memory_space<vmem>>, %arg6: memref<1x32x32x64xf32, #tpu.memory_space<vmem>>) attributes {dimension_semantics = [#tpu.dimension_semantics<parallel>, #tpu.dimension_semantics<parallel>], iteration_bounds = array<i64: 2, 1>, scalar_prefetch = 0 : i64, scratch_operands = 0 : i64, tpu.core_type = #tpu.core_type<tc>, window_params = [{transform_indices = @transform_0, window_bounds = array<i64: 1, 32, 32, 27>}, {transform_indices = @transform_1, window_bounds = array<i64: 27, 64>}, {transform_indices = @transform_2, window_bounds = array<i64: 1, 64>}, {transform_indices = @transform_3, window_bounds = array<i64: 1, 34, 34, 64>}, {transform_indices = @transform_4, window_bounds = array<i64: 1, 32, 32, 64>}]} {
    %c0 = arith.constant 0 : index
    %c0_0 = arith.constant 0 : index
    %c0_1 = arith.constant 0 : index
    %c0_2 = arith.constant 0 : index
    %0 = vector.load %arg2[%c0, %c0_0, %c0_1, %c0_2] : memref<1x32x32x27xbf16, #tpu.memory_space<vmem>>, vector<1x32x32x27xbf16>
    %1 = vector.shape_cast %0 : vector<1x32x32x27xbf16> to vector<1024x27xbf16>
    %c0_3 = arith.constant 0 : index
    %c0_4 = arith.constant 0 : index
    %2 = vector.load %arg3[%c0_3, %c0_4] : memref<27x64xbf16, #tpu.memory_space<vmem>>, vector<27x64xbf16>
    %cst = arith.constant dense<0.000000e+00> : vector<1024x64xf32>
    %3 = tpu.matmul %1, %2, %cst {dimension_numbers = #tpu.dot_dimension_numbers<[1], [0], [0], [1], [0, 0, 1, 1], [], []>} : vector<1024x27xbf16>, vector<27x64xbf16>, vector<1024x64xf32> -> vector<1024x64xf32>
    %c0_5 = arith.constant 0 : index
    %c0_6 = arith.constant 0 : index
    %4 = vector.load %arg4[%c0_5, %c0_6] : memref<1x64xf32, #tpu.memory_space<vmem>>, vector<1x64xf32>
    %5 = vector.broadcast %4 : vector<1x64xf32> to vector<1024x64xf32>
    %6 = arith.addf %3, %5 : vector<1024x64xf32>
    %7 = vector.shape_cast %6 : vector<1024x64xf32> to vector<1x32x32x64xf32>
    %c0_7 = arith.constant 0 : index
    %c0_8 = arith.constant 0 : index
    %c0_9 = arith.constant 0 : index
    %c0_10 = arith.constant 0 : index
    %8 = vector.load %arg6[%c0_7, %c0_8, %c0_9, %c0_10] : memref<1x32x32x64xf32, #tpu.memory_space<vmem>>, vector<1x32x32x64xf32>
    tpu.vector_store %arg6[%c0_7, %c0_8, %c0_9, %c0_10], %7 {strides = array<i32>} : memref<1x32x32x64xf32, #tpu.memory_space<vmem>>, vector<1x32x32x64xf32>,
    %cst_11 = arith.constant 0.000000e+00 : f32
    %9 = vector.broadcast %cst_11 : f32 to vector<1024x64xf32>
    %10 = arith.maximumf %6, %9 : vector<1024x64xf32>
    %11 = vector.shape_cast %10 : vector<1024x64xf32> to vector<32x32x64xf32>
    %cst_12 = arith.constant 0.000000e+00 : bf16
    %12 = vector.broadcast %cst_12 : bf16 to vector<1x34x34x64xbf16>
    %c0_13 = arith.constant 0 : index
    %c0_14 = arith.constant 0 : index
    %c0_15 = arith.constant 0 : index
    %c0_16 = arith.constant 0 : index
    %13 = vector.load %arg5[%c0_13, %c0_14, %c0_15, %c0_16] : memref<1x34x34x64xbf16, #tpu.memory_space<vmem>>, vector<1x34x34x64xbf16>
    tpu.vector_store %arg5[%c0_13, %c0_14, %c0_15, %c0_16], %12 {strides = array<i32>} : memref<1x34x34x64xbf16, #tpu.memory_space<vmem>>, vector<1x34x34x64xbf16>,
    %14 = arith.truncf %11 : vector<32x32x64xf32> to vector<32x32x64xbf16>
    %c0_17 = arith.constant 0 : index
    %c1 = arith.constant 1 : index
    %c1_18 = arith.constant 1 : index
    %c0_19 = arith.constant 0 : index
    %15 = vector.load %arg5[%c0_17, %c1, %c1_18, %c0_19] : memref<1x34x34x64xbf16, #tpu.memory_space<vmem>>, vector<1x32x32x64xbf16>
    %16 = vector.shape_cast %15 : vector<1x32x32x64xbf16> to vector<32x32x64xbf16>
    %17 = vector.shape_cast %14 : vector<32x32x64xbf16> to vector<1x32x32x64xbf16>
    tpu.vector_store %arg5[%c0_17, %c1, %c1_18, %c0_19], %17 {strides = array<i32>} : memref<1x34x34x64xbf16, #tpu.memory_space<vmem>>, vector<1x32x32x64xbf16>,
    return
  }
  func.func @transform_0(%arg0: i32, %arg1: i32) -> (i32, i32, i32, i32) {
    %c0_i32 = arith.constant 0 : i32
    %c0_i32_0 = arith.constant 0 : i32
    %c0_i32_1 = arith.constant 0 : i32
    %c0_i32_2 = arith.constant 0 : i32
    return %arg0, %c0_i32, %c0_i32_0, %c0_i32_1 : i32, i32, i32, i32
  }
  func.func @transform_1(%arg0: i32, %arg1: i32) -> (i32, i32) {
    %c0_i32 = arith.constant 0 : i32
    %c0_i32_0 = arith.constant 0 : i32
    return %c0_i32, %arg1 : i32, i32
  }
  func.func @transform_2(%arg0: i32, %arg1: i32) -> (i32, i32) {
    %c0_i32 = arith.constant 0 : i32
    %c0_i32_0 = arith.constant 0 : i32
    return %c0_i32, %arg1 : i32, i32
  }
  func.func @transform_3(%arg0: i32, %arg1: i32) -> (i32, i32, i32, i32) {
    %c0_i32 = arith.constant 0 : i32
    %c0_i32_0 = arith.constant 0 : i32
    %c0_i32_1 = arith.constant 0 : i32
    return %arg0, %c0_i32, %c0_i32_0, %arg1 : i32, i32, i32, i32
  }
  func.func @transform_4(%arg0: i32, %arg1: i32) -> (i32, i32, i32, i32) {
    %c0_i32 = arith.constant 0 : i32
    %c0_i32_0 = arith.constant 0 : i32
    %c0_i32_1 = arith.constant 0 : i32
    return %arg0, %c0_i32, %c0_i32_0, %arg1 : i32, i32, i32, i32
  }
}

</mosaic_0001>

<bundles_post_ra>
// kernel: tpu_custom_call.1
= control target key start
LH: loop header
LB: loop body
LE: loop exit
PB: predicated region body
PF: predicated region fallthrough
CT: control target
= control target key end

     0   :  { %10 = vsyncpa [#allocation3], 0  ;;  %s7576_s0 = inlined_call_operand.vmem [shape: bf16[2,32,32,27], index: 0, kind: input, shape index: {}]   ;;  %s7577_s1 = inlined_call_operand.vmem [shape: bf16[27,64], index: 1, kind: input, shape index: {}]   ;;  %s7578_s2 = inlined_call_operand.vmem [shape: f32[1,64], index: 2, kind: input, shape index: {}]   ;;  %s7579_s3 = inlined_call_operand.vmem [shape: bf16[2,34,34,64], index: 3, kind: output, shape index: {0}]   ;;  %s7580_s4 = inlined_call_operand.hbm [shape: f32[2,32,32,64], index: 4, kind: output, shape index: {1}]  }
   0x1   :  { %12 = vsyncpa [#allocation3 + $0x1], 0  ;;  %s5099_s15 = smov 0   ;;  %s5101_s16 = smov 0  }
   0x2   :  { %s5103_s17 = smov 0   ;;  %s5105_s18 = smov 0  }
   0x3   :  { %s5107_s19 = smov 0   ;;  %s5109_s20 = smov 0  }
   0x4 LB: > { %s4029_s21 = sadd.s32 4294967295, %s5067_s20   ;;  %s4030_s22 = sadd.s32 4294967294, %s5067_s20   ;;  %s5067_s20 = sphi %s5109_s20, %s18_s20   ;;  %s5063_s19 = sphi %s5107_s19, %s7671_s19   ;;  %s5059_s18 = sphi %s5105_s18, %s7670_s18   ;;  %s5055_s17 = sphi %s5103_s17, %s7669_s17   ;;  %s5051_s16 = sphi %s5101_s16, %s7668_s16   ;;  %s5047_s15 = sphi %s5099_s15, %s7667_s15  }
   0x5   : > { %s30_s23 = sadd.s32 1, %s5063_s19  ;;  %s145_s24 = sadd.s32 1, %s5055_s17 }
   0x6   : > { %p32_p0 = scmp.ge.s32.totalorder %s30_s23, 2  ;;  %p155_p1 = scmp.ne.s32.totalorder %s5055_s17, %s5051_s16 }
   0x7   : > { %p156_p2 = scmp.eq.s32.totalorder %s4029_s21, 1  ;;  %p161_p3 = scmp.ne.s32.totalorder %s5051_s16, %s5047_s15 }
   0x8   : > { %s7673_s23 = smov (%p32_p0, %s30_s23), 0  ;;  %p162_p5 = scmp.eq.s32.totalorder %s4030_s22, 1 }
   0x9   : > { %p5139_p4 = por %p156_p2, %p155_p1  ;;  %s140_s26 = ssub.s32 %s5063_s19, %s7673_s23 }
   0xa   : > { %p4035_p6 = scmp.ge.s32.totalorder %s5067_s20, 1  ;;  %p143_p7 = scmp.eq.s32.totalorder %s140_s26, 0 }
   0xb   : > { %p5146_p8 = por %p162_p5, %p161_p3  ;;  %p201_p9 = scmp.lt.s32.totalorder %s5067_s20, 3 }
   0xc   : > { %s5152_s28 = scalar_select %p143_p7, %s5055_s17, %s145_s24  }
   0xd   : > { %p202_p10 = pnand %p4035_p6, %p201_p9 }
   0xf   : > { %205 = sbr.rel (%p202_p10) target bundleno = 562 (0x232), region = 32 }
  0x16   : > { %v4920_v0 = vld [vmem:[%s7577_s1] sm:$0xff]   ;;  %vm926_vm0 = vcmask 1044480   ;;  %v4921_v1 = vld [vmem:[%s7577_s1 + $0x8] sm:$0x3f]   ;;  %vm927_vm1 = vcmask 1045504   ;;  %p242_p11 = scmp.lt.s32.totalorder %s5059_s18, 1 }
  0x17   : > { %4724 = vmatprep.subr.bf16.mxu0 %v4920_v0  ;;  %4856 = vmatprep.subr.bf16.mxu1 %v4920_v0  ;;  %v5069_v2 = vmov 65535   ;;  %vm733_vm2 = vcmask 220160   ;;  %vm1735_vm3 = vcmask 519168   ;;  %v5070_v56 = vmov 0   ;;  %s239_s22 = sand.u32 1, %s5051_s16   ;;  %s5071_s29 = smov [#allocation2]  }
  0x18   : > { %4725 = vmatpush3.bf16.msra.mxu0 %v4920_v0  ;;  %4858 = vmatpush3.bf16.msra.mxu1 %v4920_v0  ;;  %v928_v3 = vsel %vm926_vm0, 4294967295, %v5069_v2  ;;  %s5162_s7 = scalar_select %p242_p11, %s5059_s18, 1  ;;  %vm1740_vm4 = vcmask 516096   ;;  %vm1478_vm5 = vcmask 523264   ;;  %vm3576_vm6 = vsmask.f32 7938 }
  0x19   : > { %v929_v4 = vsel %vm927_vm1, %v928_v3, 0  ;;  %s4036_s24 = sshll.u32 %s239_s22, 10  ;;  %vm2291_vm7 = vsmask.f32 256  ;;  %vm2292_vm8 = vsmask.f32 4368  ;;  %vm5858_vm9 = vmand %vm1735_vm3, %vm3576_vm6 }
  0x1a   : > { %v931_v5 = vand.u32 %v4921_v1, %v929_v4  ;;  %s4528_s8 = sshll.u32 %s5162_s7, 9  ;;  %s4860_s12 = smul.u32 680, %s5162_s7  ;;  %vm5871_vm10 = vmand %vm1740_vm4, %vm2291_vm7 }
  0x1b   : > { %s5168_s11 = scalar_lea.vmem %s7576_s0, %s4528_s8  ;;  %s5825_s30 = scalar_lea.vmem [#allocation2], %s4036_s24  ;;  %vm5887_vm11 = vmor %vm2291_vm7, %vm2292_vm8 }
  0x1c   : > { %4726 = vmatprep.subr.bf16.mxu0 %v931_v5  ;;  %4857 = vmatprep.subr.bf16.mxu1 %v931_v5  ;;  %v4922_v6 = vld [vmem:[%s5168_s11] sm:$0xff]   ;;  %v4924_v8 = vld [vmem:[%s5168_s11 + $0x8] sm:$0xff]   ;;  %v4926_v10 = vld [vmem:[%s5168_s11 + $0x10] sm:$0xff]   ;;  %s5270_s21 = scalar_lea.vmem %s7579_s3, %s4860_s12  ;;  %s3894_s12 = sshll.u32 %s5825_s30, 4  ;;  %s7460_s12 = int_to_ptr.vmem [resolvable:$true] %s3894_s12 }
  0x1d   : > { %4727 = vmatpush3.bf16.msra.mxu0 %v931_v5  ;;  %4859 = vmatpush3.bf16.msra.mxu1 %v931_v5  ;;  %v4923_v7 = vld [vmem:[%s5168_s11 + $0x100] sm:$0xff]   ;;  %v4925_v9 = vld [vmem:[%s5168_s11 + $0x108] sm:$0xff]   ;;  %v4927_v11 = vld [vmem:[%s5168_s11 + $0x110] sm:$0xff]   ;;  %1742 = vst.msk [vmem:[%s5270_s21 + $0x14] sm:$0xf] %vm1735_vm3, %v5070_v56  ;;  %s7485_s24 = scalar_lea.sflag [#allocation3], %s239_s22 }
  0x1e   : > { %4728 = vmatprep.mubr.msk.bf16.mxu0 %vm733_vm2, %v4922_v6  ;;  %4792 = vmatprep.mubr.msk.bf16.mxu1 %vm733_vm2, %v4923_v7  ;;  %v4928_v12 = vld [vmem:[%s5168_s11 + $0x18] sm:$0xff]   ;;  %v4930_v14 = vld [vmem:[%s5168_s11 + $0x20] sm:$0xff]   ;;  %v4932_v16 = vld [vmem:[%s5168_s11 + $0x28] sm:$0xff]   ;;  %1736 = vst.msk [vmem:[%s5270_s21] sm:$0xf] %vm1735_vm3, %v5070_v56  ;;  %s4989_s26 = scalar_lea.vmem %s7460_s12, 16384 }
  0x1f   : > { %v4929_v13 = vld [vmem:[%s5168_s11 + $0x118] sm:$0xff]   ;;  %v4931_v15 = vld [vmem:[%s5168_s11 + $0x120] sm:$0xff]   ;;  %v4933_v17 = vld [vmem:[%s5168_s11 + $0x128] sm:$0xff]   ;;  %1737 = vst.msk [vmem:[%s5270_s21 + $0x4] sm:$0xf] %vm1735_vm3, %v5070_v56  ;;  %p4990_p12 = scmp.ne.s32.totalorder %s7460_s12, %s4989_s26  ;;  %s4993_s5 = sshll.u32 %s5071_s29, 4  ;;  %s4994_s5 = int_to_ptr.vmem [resolvable:$false] %s4993_s5 }
  0x20   : > { %4729 = vmatmul.mubr.msk.bf16.vlgmr.msra.gmra.mrb[0].mxu0 %vm733_vm2, %v4924_v8  ;;  %4793 = vmatmul.mubr.msk.bf16.vlgmr.msra.gmra.mrb[0].mxu1 %vm733_vm2, %v4925_v9  ;;  %v4934_v18 = vld [vmem:[%s5168_s11 + $0x30] sm:$0xff]   ;;  %v4936_v20 = vld [vmem:[%s5168_s11 + $0x38] sm:$0xff]   ;;  %v4938_v22 = vld [vmem:[%s5168_s11 + $0x40] sm:$0xff]   ;;  %1738 = vst.msk [vmem:[%s5270_s21 + $0x8] sm:$0xf] %vm1735_vm3, %v5070_v56  ;;  %s4995_s6 = scalar_lea.vmem %s4994_s5, 32768  ;;  %p4996_p1 = scmp.lt.s32.totalorder %s7460_s12, %s4994_s5 }
  0x21   : > { %4732 = vmatprep.mubr.msk.bf16.mxu0 %vm733_vm2, %v4926_v10  ;;  %4796 = vmatprep.mubr.msk.bf16.mxu1 %vm733_vm2, %v4927_v11  ;;  %v4935_v19 = vld [vmem:[%s5168_s11 + $0x130] sm:$0xff]   ;;  %v4937_v21 = vld [vmem:[%s5168_s11 + $0x138] sm:$0xff]   ;;  %v4939_v23 = vld [vmem:[%s5168_s11 + $0x140] sm:$0xff]   ;;  %1739 = vst.msk [vmem:[%s5270_s21 + $0xc] sm:$0xf] %vm1735_vm3, %v5070_v56  ;;  %p4991_p13 = pnand %p4990_p12, %p5139_p4  ;;  %p4997_p2 = scmp.lt.s32.totalorder %s4995_s6, %s4989_s26 }
  0x22   : > { %v4940_v24 = vld [vmem:[%s5168_s11 + $0x48] sm:$0xff]   ;;  %v4942_v26 = vld [vmem:[%s5168_s11 + $0x50] sm:$0xff]   ;;  %v4944_v28 = vld [vmem:[%s5168_s11 + $0x58] sm:$0xff]   ;;  %1743 = vst.msk [vmem:[%s5270_s21 + $0x18] sm:$0xf] %vm1735_vm3, %v5070_v56 }
  0x23   : > { %v4941_v25 = vld [vmem:[%s5168_s11 + $0x148] sm:$0xff]   ;;  %v4943_v27 = vld [vmem:[%s5168_s11 + $0x150] sm:$0xff]   ;;  %v4945_v29 = vld [vmem:[%s5168_s11 + $0x158] sm:$0xff]   ;;  %1744 = vst.msk [vmem:[%s5270_s21 + $0x1c] sm:$0xf] %vm1735_vm3, %v5070_v56  ;;  %p4992_p0 = pneg %p4991_p13  ;;  %p4998_p3 = por %p4997_p2, %p4996_p1 }
  0x24   : > { %v4946_v30 = vld [vmem:[%s5168_s11 + $0x60] sm:$0xff]   ;;  %v4948_v32 = vld [vmem:[%s5168_s11 + $0x68] sm:$0xff]   ;;  %v4950_v34 = vld [vmem:[%s5168_s11 + $0x70] sm:$0xff]   ;;  %1745 = vst.msk [vmem:[%s5270_s21 + $0x20] sm:$0xf] %vm1735_vm3, %v5070_v56 }
  0x25   : > { %v4947_v31 = vld [vmem:[%s5168_s11 + $0x160] sm:$0xff]   ;;  %v4949_v33 = vld [vmem:[%s5168_s11 + $0x168] sm:$0xff]   ;;  %v4951_v35 = vld [vmem:[%s5168_s11 + $0x170] sm:$0xff]   ;;  %1747 = vst.msk [vmem:[%s5270_s21 + $0x28] sm:$0xf] %vm1735_vm3, %v5070_v56  ;;  %p4999_p5 = pnand %p4998_p3, %p4992_p0 }
  0x26   : > { %v4952_v36 = vld [vmem:[%s5168_s11 + $0x78] sm:$0xff]   ;;  %v4954_v38 = vld [vmem:[%s5168_s11 + $0x80] sm:$0xff]   ;;  %v4956_v40 = vld [vmem:[%s5168_s11 + $0x88] sm:$0xff]   ;;  %1748 = vst.msk [vmem:[%s5270_s21 + $0x2c] sm:$0xf] %vm1735_vm3, %v5070_v56 }
  0x27   : > { %v4953_v37 = vld [vmem:[%s5168_s11 + $0x178] sm:$0xff]   ;;  %v4955_v39 = vld [vmem:[%s5168_s11 + $0x180] sm:$0xff]   ;;  %v4957_v41 = vld [vmem:[%s5168_s11 + $0x188] sm:$0xff]   ;;  %1749 = vst.msk [vmem:[%s5270_s21 + $0x30] sm:$0xf] %vm1735_vm3, %v5070_v56 }
  0x28   : > { %4733 = vmatmul.mubr.msk.bf16.gmra.mrb[4].mxu0 %vm733_vm2, %v4928_v12  ;;  %4797 = vmatmul.mubr.msk.bf16.gmra.mrb[4].mxu1 %vm733_vm2, %v4929_v13  ;;  %v4958_v42 = vld [vmem:[%s5168_s11 + $0x90] sm:$0xff]   ;;  %v4960_v44 = vld [vmem:[%s5168_s11 + $0x98] sm:$0xff]   ;;  %v4962_v46 = vld [vmem:[%s5168_s11 + $0xa0] sm:$0xff]   ;;  %1750 = vst.msk [vmem:[%s5270_s21 + $0x34] sm:$0xf] %vm1735_vm3, %v5070_v56 }
  0x29   : > { %4736 = vmatprep.mubr.msk.bf16.mxu0 %vm733_vm2, %v4930_v14  ;;  %4800 = vmatprep.mubr.msk.bf16.mxu1 %vm733_vm2, %v4931_v15  ;;  %v4959_v43 = vld [vmem:[%s5168_s11 + $0x190] sm:$0xff]   ;;  %v4961_v45 = vld [vmem:[%s5168_s11 + $0x198] sm:$0xff]   ;;  %v4963_v47 = vld [vmem:[%s5168_s11 + $0x1a0] sm:$0xff]   ;;  %1752 = vst.msk [vmem:[%s5270_s21 + $0x3c] sm:$0xf] %vm1735_vm3, %v5070_v56 }
  0x2a   : > { %v4964_v48 = vld [vmem:[%s5168_s11 + $0xa8] sm:$0xff]   ;;  %v4966_v50 = vld [vmem:[%s5168_s11 + $0xb0] sm:$0xff]   ;;  %v4968_v52 = vld [vmem:[%s5168_s11 + $0xb8] sm:$0xff]   ;;  %1753 = vst.msk [vmem:[%s5270_s21 + $0x40] sm:$0xf] %vm1735_vm3, %v5070_v56 }
  0x2b   : > { %v4965_v49 = vld [vmem:[%s5168_s11 + $0x1a8] sm:$0xff]   ;;  %v4967_v51 = vld [vmem:[%s5168_s11 + $0x1b0] sm:$0xff]   ;;  %v4969_v53 = vld [vmem:[%s5168_s11 + $0x1b8] sm:$0xff]   ;;  %1754 = vst.msk [vmem:[%s5270_s21 + $0x44] sm:$0xf] %vm1735_vm3, %v5070_v56 }
  0x2c   : > { %v4970_v54 = vld [vmem:[%s5168_s11 + $0xc0] sm:$0xff]   ;;  %1755 = vst.msk [vmem:[%s5270_s21 + $0x48] sm:$0xf] %vm1735_vm3, %v5070_v56  ;;  %1757 = vst.msk [vmem:[%s5270_s21 + $0x50] sm:$0xf] %vm1735_vm3, %v5070_v56  ;;  %v4972_v57 = vld [vmem:[%s5168_s11 + $0xc8] sm:$0xff]  }
  0x2d   : > { %v4971_v55 = vld [vmem:[%s5168_s11 + $0x1c0] sm:$0xff]   ;;  %1758 = vst.msk [vmem:[%s5270_s21 + $0x54] sm:$0xf] %vm1735_vm3, %v5070_v56  ;;  %1759 = vst.msk [vmem:[%s5270_s21 + $0x58] sm:$0xf] %vm1735_vm3, %v5070_v56  ;;  %v4973_v58 = vld [vmem:[%s5168_s11 + $0x1c8] sm:$0xff]  }
  0x2e   : > { %1760 = vst.msk [vmem:[%s5270_s21 + $0x5c] sm:$0xf] %vm1735_vm3, %v5070_v56  ;;  %1762 = vst.msk [vmem:[%s5270_s21 + $0x64] sm:$0xf] %vm1735_vm3, %v5070_v56  ;;  %v4974_v59 = vld [vmem:[%s5168_s11 + $0xd0] sm:$0xff]   ;;  %v4976_v61 = vld [vmem:[%s5168_s11 + $0xd8] sm:$0xff]  }
  0x2f   : > { %1763 = vst.msk [vmem:[%s5270_s21 + $0x68] sm:$0xf] %vm1735_vm3, %v5070_v56  ;;  %1764 = vst.msk [vmem:[%s5270_s21 + $0x6c] sm:$0xf] %vm1735_vm3, %v5070_v56  ;;  %v4975_v60 = vld [vmem:[%s5168_s11 + $0x1d0] sm:$0xff]   ;;  %v4977_v62 = vld [vmem:[%s5168_s11 + $0x1d8] sm:$0xff]  }
  0x30   : > { %4737 = vmatmul.mubr.msk.bf16.gmra.mrb[8].mxu0 %vm733_vm2, %v4932_v16  ;;  %4801 = vmatmul.mubr.msk.bf16.gmra.mrb[8].mxu1 %vm733_vm2, %v4933_v17  ;;  %1765 = vst.msk [vmem:[%s5270_s21 + $0x70] sm:$0xf] %vm1735_vm3, %v5070_v56  ;;  %1767 = vst.msk [vmem:[%s5270_s21 + $0x78] sm:$0xf] %vm1735_vm3, %v5070_v56  ;;  %v4978_v63 = vld [vmem:[%s5168_s11 + $0xe0] sm:$0xff]   ;;  %v4980_v1 = vld [vmem:[%s5168_s11 + $0xe8] sm:$0xff]  }
  0x31   : > { %4740 = vmatprep.mubr.msk.bf16.mxu0 %vm733_vm2, %v4934_v18  ;;  %4804 = vmatprep.mubr.msk.bf16.mxu1 %vm733_vm2, %v4935_v19  ;;  %1768 = vst.msk [vmem:[%s5270_s21 + $0x7c] sm:$0xf] %vm1735_vm3, %v5070_v56  ;;  %1769 = vst.msk [vmem:[%s5270_s21 + $0x80] sm:$0xf] %vm1735_vm3, %v5070_v56  ;;  %v4979_v0 = vld [vmem:[%s5168_s11 + $0x1e0] sm:$0xff]   ;;  %v4981_v2 = vld [vmem:[%s5168_s11 + $0x1e8] sm:$0xff]  }
  0x32   : > { %1770 = vst.msk [vmem:[%s5270_s21 + $0x84] sm:$0xf] %vm1735_vm3, %v5070_v56  ;;  %1772 = vst.msk [vmem:[%s5270_s21 + $0x8c] sm:$0xf] %vm1735_vm3, %v5070_v56  ;;  %v4982_v3 = vld [vmem:[%s5168_s11 + $0xf0] sm:$0xff]   ;;  %v4984_v5 = vld [vmem:[%s5168_s11 + $0xf8] sm:$0xff]  }
  0x33   : > { %1773 = vst.msk [vmem:[%s5270_s21 + $0x90] sm:$0xf] %vm1735_vm3, %v5070_v56  ;;  %1774 = vst.msk [vmem:[%s5270_s21 + $0x94] sm:$0xf] %vm1735_vm3, %v5070_v56  ;;  %v4983_v4 = vld [vmem:[%s5168_s11 + $0x1f0] sm:$0xff]   ;;  %v4985_v6 = vld [vmem:[%s5168_s11 + $0x1f8] sm:$0xff]  }
  0x34   : > { %1775 = vst.msk [vmem:[%s5270_s21 + $0x98] sm:$0xf] %vm1735_vm3, %v5070_v56  ;;  %1777 = vst.msk [vmem:[%s5270_s21 + $0xa0] sm:$0xf] %vm1735_vm3, %v5070_v56  ;;  %v5820_v7 = vld [vmem:[%s7578_s2] ss:$0 sm:$0xff] }
  0x35   : > { %1778 = vst.msk [vmem:[%s5270_s21 + $0xa4] sm:$0xf] %vm1735_vm3, %v5070_v56  ;;  %1779 = vst.msk [vmem:[%s5270_s21 + $0xa8] sm:$0xf] %vm1735_vm3, %v5070_v56  ;;  %s4657_s11 = sshll.u32 %s5059_s18, 14 }
  0x36   : > { %1780 = vst.msk [vmem:[%s5270_s21 + $0xac] sm:$0xf] %vm1735_vm3, %v5070_v56  ;;  %1782 = vst.msk [vmem:[%s5270_s21 + $0xb4] sm:$0xf] %vm1735_vm3, %v5070_v56  ;;  %s7458_s14 = scalar_lea.hbm %s7580_s4, %s4657_s11 }
  0x37   : > { %1783 = vst.msk [vmem:[%s5270_s21 + $0xb8] sm:$0xf] %vm1735_vm3, %v5070_v56  ;;  %1784 = vst.msk [vmem:[%s5270_s21 + $0xbc] sm:$0xf] %vm1735_vm3, %v5070_v56 }
  0x38   : > { %4741 = vmatmul.mubr.msk.bf16.gmra.mrb[12].mxu0 %vm733_vm2, %v4936_v20  ;;  %4805 = vmatmul.mubr.msk.bf16.gmra.mrb[12].mxu1 %vm733_vm2, %v4937_v21  ;;  %1785 = vst.msk [vmem:[%s5270_s21 + $0xc0] sm:$0xf] %vm1735_vm3, %v5070_v56  ;;  %1787 = vst.msk [vmem:[%s5270_s21 + $0xc8] sm:$0xf] %vm1735_vm3, %v5070_v56 }
  0x39   : > { %4744 = vmatprep.mubr.msk.bf16.mxu0 %vm733_vm2, %v4938_v22  ;;  %4808 = vmatprep.mubr.msk.bf16.mxu1 %vm733_vm2, %v4939_v23  ;;  %1788 = vst.msk [vmem:[%s5270_s21 + $0xcc] sm:$0xf] %vm1735_vm3, %v5070_v56  ;;  %1789 = vst.msk [vmem:[%s5270_s21 + $0xd0] sm:$0xf] %vm1735_vm3, %v5070_v56 }
  0x3a   : > { %1790 = vst.msk [vmem:[%s5270_s21 + $0xd4] sm:$0xf] %vm1735_vm3, %v5070_v56  ;;  %1792 = vst.msk [vmem:[%s5270_s21 + $0xdc] sm:$0xf] %vm1735_vm3, %v5070_v56 }
  0x3b   : > { %1793 = vst.msk [vmem:[%s5270_s21 + $0xe0] sm:$0xf] %vm1735_vm3, %v5070_v56  ;;  %1794 = vst.msk [vmem:[%s5270_s21 + $0xe4] sm:$0xf] %vm1735_vm3, %v5070_v56 }
  0x3c   : > { %1795 = vst.msk [vmem:[%s5270_s21 + $0xe8] sm:$0xf] %vm1735_vm3, %v5070_v56  ;;  %1797 = vst.msk [vmem:[%s5270_s21 + $0xf0] sm:$0xf] %vm1735_vm3, %v5070_v56 }
  0x3d   : > { %1798 = vst.msk [vmem:[%s5270_s21 + $0xf4] sm:$0xf] %vm1735_vm3, %v5070_v56  ;;  %1799 = vst.msk [vmem:[%s5270_s21 + $0xf8] sm:$0xf] %vm1735_vm3, %v5070_v56 }
  0x3e   : > { %1800 = vst.msk [vmem:[%s5270_s21 + $0xfc] sm:$0xf] %vm1735_vm3, %v5070_v56  ;;  %1802 = vst.msk [vmem:[%s5270_s21 + $0x104] sm:$0xf] %vm1735_vm3, %v5070_v56 }
  0x3f   : > { %1803 = vst.msk [vmem:[%s5270_s21 + $0x108] sm:$0xf] %vm1735_vm3, %v5070_v56  ;;  %1804 = vst.msk [vmem:[%s5270_s21 + $0x10c] sm:$0xf] %vm1735_vm3, %v5070_v56 }
  0x40   : > { %4745 = vmatmul.mubr.msk.bf16.gmra.mrb[16].mxu0 %vm733_vm2, %v4940_v24  ;;  %4809 = vmatmul.mubr.msk.bf16.gmra.mrb[16].mxu1 %vm733_vm2, %v4941_v25  ;;  %1805 = vst.msk [vmem:[%s5270_s21 + $0x110] sm:$0xf] %vm1735_vm3, %v5070_v56  ;;  %1807 = vst.msk [vmem:[%s5270_s21 + $0x118] sm:$0xf] %vm1735_vm3, %v5070_v56 }
  0x41   : > { %4748 = vmatprep.mubr.msk.bf16.mxu0 %vm733_vm2, %v4942_v26  ;;  %4812 = vmatprep.mubr.msk.bf16.mxu1 %vm733_vm2, %v4943_v27  ;;  %1808 = vst.msk [vmem:[%s5270_s21 + $0x11c] sm:$0xf] %vm1735_vm3, %v5070_v56  ;;  %1809 = vst.msk [vmem:[%s5270_s21 + $0x120] sm:$0xf] %vm1735_vm3, %v5070_v56 }
  0x42   : > { %1810 = vst.msk [vmem:[%s5270_s21 + $0x124] sm:$0xf] %vm1735_vm3, %v5070_v56  ;;  %1812 = vst.msk [vmem:[%s5270_s21 + $0x12c] sm:$0xf] %vm1735_vm3, %v5070_v56 }
  0x43   : > { %1813 = vst.msk [vmem:[%s5270_s21 + $0x130] sm:$0xf] %vm1735_vm3, %v5070_v56  ;;  %1814 = vst.msk [vmem:[%s5270_s21 + $0x134] sm:$0xf] %vm1735_vm3, %v5070_v56 }
  0x44   : > { %1815 = vst.msk [vmem:[%s5270_s21 + $0x138] sm:$0xf] %vm1735_vm3, %v5070_v56  ;;  %1817 = vst.msk [vmem:[%s5270_s21 + $0x140] sm:$0xf] %vm1735_vm3, %v5070_v56 }
  0x45   : > { %1818 = vst.msk [vmem:[%s5270_s21 + $0x144] sm:$0xf] %vm1735_vm3, %v5070_v56  ;;  %1819 = vst.msk [vmem:[%s5270_s21 + $0x148] sm:$0xf] %vm1735_vm3, %v5070_v56 }
  0x46   : > { %1820 = vst.msk [vmem:[%s5270_s21 + $0x14c] sm:$0xf] %vm1735_vm3, %v5070_v56  ;;  %1822 = vst.msk [vmem:[%s5270_s21 + $0x154] sm:$0xf] %vm1735_vm3, %v5070_v56 }
  0x47   : > { %1823 = vst.msk [vmem:[%s5270_s21 + $0x158] sm:$0xf] %vm1735_vm3, %v5070_v56  ;;  %1824 = vst.msk [vmem:[%s5270_s21 + $0x15c] sm:$0xf] %vm1735_vm3, %v5070_v56 }
  0x48   : > { %4749 = vmatmul.mubr.msk.bf16.gmra.mrb[20].mxu0 %vm733_vm2, %v4944_v28  ;;  %4813 = vmatmul.mubr.msk.bf16.gmra.mrb[20].mxu1 %vm733_vm2, %v4945_v29  ;;  %1825 = vst.msk [vmem:[%s5270_s21 + $0x160] sm:$0xf] %vm1735_vm3, %v5070_v56  ;;  %1827 = vst.msk [vmem:[%s5270_s21 + $0x168] sm:$0xf] %vm1735_vm3, %v5070_v56 }
  0x49   : > { %4752 = vmatprep.mubr.msk.bf16.mxu0 %vm733_vm2, %v4946_v30  ;;  %4816 = vmatprep.mubr.msk.bf16.mxu1 %vm733_vm2, %v4947_v31  ;;  %1828 = vst.msk [vmem:[%s5270_s21 + $0x16c] sm:$0xf] %vm1735_vm3, %v5070_v56  ;;  %1829 = vst.msk [vmem:[%s5270_s21 + $0x170] sm:$0xf] %vm1735_vm3, %v5070_v56 }
  0x4a   : > { %1830 = vst.msk [vmem:[%s5270_s21 + $0x174] sm:$0xf] %vm1735_vm3, %v5070_v56  ;;  %1832 = vst.msk [vmem:[%s5270_s21 + $0x17c] sm:$0xf] %vm1735_vm3, %v5070_v56 }
  0x4b   : > { %1833 = vst.msk [vmem:[%s5270_s21 + $0x180] sm:$0xf] %vm1735_vm3, %v5070_v56  ;;  %1834 = vst.msk [vmem:[%s5270_s21 + $0x184] sm:$0xf] %vm1735_vm3, %v5070_v56 }
  0x4c   : > { %1835 = vst.msk [vmem:[%s5270_s21 + $0x188] sm:$0xf] %vm1735_vm3, %v5070_v56  ;;  %1837 = vst.msk [vmem:[%s5270_s21 + $0x190] sm:$0xf] %vm1735_vm3, %v5070_v56 }
  0x4d   : > { %1838 = vst.msk [vmem:[%s5270_s21 + $0x194] sm:$0xf] %vm1735_vm3, %v5070_v56  ;;  %1839 = vst.msk [vmem:[%s5270_s21 + $0x198] sm:$0xf] %vm1735_vm3, %v5070_v56 }
  0x4e   : > { %1840 = vst.msk [vmem:[%s5270_s21 + $0x19c] sm:$0xf] %vm1735_vm3, %v5070_v56  ;;  %1842 = vst.msk [vmem:[%s5270_s21 + $0x1a4] sm:$0xf] %vm1735_vm3, %v5070_v56 }
  0x4f   : > { %1843 = vst.msk [vmem:[%s5270_s21 + $0x1a8] sm:$0xf] %vm1735_vm3, %v5070_v56  ;;  %1844 = vst.msk [vmem:[%s5270_s21 + $0x1ac] sm:$0xf] %vm1735_vm3, %v5070_v56 }
  0x50   : > { %4753 = vmatmul.mubr.msk.bf16.gmra.mrb[24].mxu0 %vm733_vm2, %v4948_v32  ;;  %4817 = vmatmul.mubr.msk.bf16.gmra.mrb[24].mxu1 %vm733_vm2, %v4949_v33  ;;  %1845 = vst.msk [vmem:[%s5270_s21 + $0x1b0] sm:$0xf] %vm1735_vm3, %v5070_v56  ;;  %1847 = vst.msk [vmem:[%s5270_s21 + $0x1b8] sm:$0xf] %vm1735_vm3, %v5070_v56 }
  0x51   : > { %4756 = vmatprep.mubr.msk.bf16.mxu0 %vm733_vm2, %v4950_v34  ;;  %4820 = vmatprep.mubr.msk.bf16.mxu1 %vm733_vm2, %v4951_v35  ;;  %1848 = vst.msk [vmem:[%s5270_s21 + $0x1bc] sm:$0xf] %vm1735_vm3, %v5070_v56  ;;  %1849 = vst.msk [vmem:[%s5270_s21 + $0x1c0] sm:$0xf] %vm1735_vm3, %v5070_v56 }
  0x52   : > { %1850 = vst.msk [vmem:[%s5270_s21 + $0x1c4] sm:$0xf] %vm1735_vm3, %v5070_v56  ;;  %1852 = vst.msk [vmem:[%s5270_s21 + $0x1cc] sm:$0xf] %vm1735_vm3, %v5070_v56 }
  0x53   : > { %1853 = vst.msk [vmem:[%s5270_s21 + $0x1d0] sm:$0xf] %vm1735_vm3, %v5070_v56  ;;  %1854 = vst.msk [vmem:[%s5270_s21 + $0x1d4] sm:$0xf] %vm1735_vm3, %v5070_v56 }
  0x54   : > { %1855 = vst.msk [vmem:[%s5270_s21 + $0x1d8] sm:$0xf] %vm1735_vm3, %v5070_v56  ;;  %1857 = vst.msk [vmem:[%s5270_s21 + $0x1e0] sm:$0xf] %vm1735_vm3, %v5070_v56 }
  0x55   : > { %1858 = vst.msk [vmem:[%s5270_s21 + $0x1e4] sm:$0xf] %vm1735_vm3, %v5070_v56  ;;  %1859 = vst.msk [vmem:[%s5270_s21 + $0x1e8] sm:$0xf] %vm1735_vm3, %v5070_v56 }
  0x56   : > { %1860 = vst.msk [vmem:[%s5270_s21 + $0x1ec] sm:$0xf] %vm1735_vm3, %v5070_v56  ;;  %1862 = vst.msk [vmem:[%s5270_s21 + $0x1f4] sm:$0xf] %vm1735_vm3, %v5070_v56 }
  0x57   : > { %1863 = vst.msk [vmem:[%s5270_s21 + $0x1f8] sm:$0xf] %vm1735_vm3, %v5070_v56  ;;  %1864 = vst.msk [vmem:[%s5270_s21 + $0x1fc] sm:$0xf] %vm1735_vm3, %v5070_v56 }
  0x58   : > { %4757 = vmatmul.mubr.msk.bf16.gmra.mrb[28].mxu0 %vm733_vm2, %v4952_v36  ;;  %4821 = vmatmul.mubr.msk.bf16.gmra.mrb[28].mxu1 %vm733_vm2, %v4953_v37  ;;  %1865 = vst.msk [vmem:[%s5270_s21 + $0x200] sm:$0xf] %vm1735_vm3, %v5070_v56  ;;  %1867 = vst.msk [vmem:[%s5270_s21 + $0x208] sm:$0xf] %vm1735_vm3, %v5070_v56 }
  0x59   : > { %4760 = vmatprep.mubr.msk.bf16.mxu0 %vm733_vm2, %v4954_v38  ;;  %4824 = vmatprep.mubr.msk.bf16.mxu1 %vm733_vm2, %v4955_v39  ;;  %1868 = vst.msk [vmem:[%s5270_s21 + $0x20c] sm:$0xf] %vm1735_vm3, %v5070_v56  ;;  %1869 = vst.msk [vmem:[%s5270_s21 + $0x210] sm:$0xf] %vm1735_vm3, %v5070_v56 }
  0x5a   : > { %1870 = vst.msk [vmem:[%s5270_s21 + $0x214] sm:$0xf] %vm1735_vm3, %v5070_v56  ;;  %1872 = vst.msk [vmem:[%s5270_s21 + $0x21c] sm:$0xf] %vm1735_vm3, %v5070_v56 }
  0x5b   : > { %1873 = vst.msk [vmem:[%s5270_s21 + $0x220] sm:$0xf] %vm1735_vm3, %v5070_v56  ;;  %1874 = vst.msk [vmem:[%s5270_s21 + $0x224] sm:$0xf] %vm1735_vm3, %v5070_v56 }
  0x5c   : > { %1875 = vst.msk [vmem:[%s5270_s21 + $0x228] sm:$0xf] %vm1735_vm3, %v5070_v56  ;;  %1877 = vst.msk [vmem:[%s5270_s21 + $0x230] sm:$0xf] %vm1735_vm3, %v5070_v56 }
  0x5d   : > { %1878 = vst.msk [vmem:[%s5270_s21 + $0x234] sm:$0xf] %vm1735_vm3, %v5070_v56  ;;  %1879 = vst.msk [vmem:[%s5270_s21 + $0x238] sm:$0xf] %vm1735_vm3, %v5070_v56 }
  0x5e   : > { %1880 = vst.msk [vmem:[%s5270_s21 + $0x23c] sm:$0xf] %vm1735_vm3, %v5070_v56  ;;  %1882 = vst.msk [vmem:[%s5270_s21 + $0x244] sm:$0xf] %vm1735_vm3, %v5070_v56 }
  0x5f   : > { %1883 = vst.msk [vmem:[%s5270_s21 + $0x248] sm:$0xf] %vm1735_vm3, %v5070_v56  ;;  %1884 = vst.msk [vmem:[%s5270_s21 + $0x24c] sm:$0xf] %vm1735_vm3, %v5070_v56 }
  0x60   : > { %4761 = vmatmul.mubr.msk.bf16.gmra.mrb[32].mxu0 %vm733_vm2, %v4956_v40  ;;  %4825 = vmatmul.mubr.msk.bf16.gmra.mrb[32].mxu1 %vm733_vm2, %v4957_v41  ;;  %1885 = vst.msk [vmem:[%s5270_s21 + $0x250] sm:$0xf] %vm1735_vm3, %v5070_v56  ;;  %1887 = vst.msk [vmem:[%s5270_s21 + $0x258] sm:$0xf] %vm1735_vm3, %v5070_v56 }
  0x61   : > { %4764 = vmatprep.mubr.msk.bf16.mxu0 %vm733_vm2, %v4958_v42  ;;  %4828 = vmatprep.mubr.msk.bf16.mxu1 %vm733_vm2, %v4959_v43  ;;  %1888 = vst.msk [vmem:[%s5270_s21 + $0x25c] sm:$0xf] %vm1735_vm3, %v5070_v56  ;;  %1889 = vst.msk [vmem:[%s5270_s21 + $0x260] sm:$0xf] %vm1735_vm3, %v5070_v56 }
  0x62   : > { %1890 = vst.msk [vmem:[%s5270_s21 + $0x264] sm:$0xf] %vm1735_vm3, %v5070_v56  ;;  %1892 = vst.msk [vmem:[%s5270_s21 + $0x26c] sm:$0xf] %vm1735_vm3, %v5070_v56 }
  0x63   : > { %1893 = vst.msk [vmem:[%s5270_s21 + $0x270] sm:$0xf] %vm1735_vm3, %v5070_v56  ;;  %1894 = vst.msk [vmem:[%s5270_s21 + $0x274] sm:$0xf] %vm1735_vm3, %v5070_v56 }
  0x64   : > { %1895 = vst.msk [vmem:[%s5270_s21 + $0x278] sm:$0xf] %vm1735_vm3, %v5070_v56  ;;  %1897 = vst.msk [vmem:[%s5270_s21 + $0x280] sm:$0xf] %vm1735_vm3, %v5070_v56 }
  0x65   : > { %1898 = vst.msk [vmem:[%s5270_s21 + $0x284] sm:$0xf] %vm1735_vm3, %v5070_v56  ;;  %1899 = vst.msk [vmem:[%s5270_s21 + $0x288] sm:$0xf] %vm1735_vm3, %v5070_v56 }
  0x66   : > { %1900 = vst.msk [vmem:[%s5270_s21 + $0x28c] sm:$0xf] %vm1735_vm3, %v5070_v56  ;;  %1902 = vst.msk [vmem:[%s5270_s21 + $0x294] sm:$0xf] %vm1735_vm3, %v5070_v56 }
  0x67   : > { %1903 = vst.msk [vmem:[%s5270_s21 + $0x298] sm:$0xf] %vm1735_vm3, %v5070_v56  ;;  %1904 = vst.msk [vmem:[%s5270_s21 + $0x29c] sm:$0xf] %vm1735_vm3, %v5070_v56 }
  0x68   : > { %4765 = vmatmul.mubr.msk.bf16.gmra.mrb[36].mxu0 %vm733_vm2, %v4960_v44  ;;  %4829 = vmatmul.mubr.msk.bf16.gmra.mrb[36].mxu1 %vm733_vm2, %v4961_v45  ;;  %1905 = vst.msk [vmem:[%s5270_s21 + $0x2a0] sm:$0xf] %vm1735_vm3, %v5070_v56  ;;  %v4299_v44 = vld [vmem:[%s5270_s21 + $0x14] sm:$0xf] }
  0x69   : > { %4768 = vmatprep.mubr.msk.bf16.mxu0 %vm733_vm2, %v4962_v46  ;;  %4832 = vmatprep.mubr.msk.bf16.mxu1 %vm733_vm2, %v4963_v47  ;;  %1746 = vst.msk [vmem:[%s5270_s21 + $0x24] sm:$0x1] %vm1740_vm4, %v5070_v56  ;;  %1741 = vst.msk [vmem:[%s5270_s21 + $0x10] sm:$0x1] %vm1740_vm4, %v5070_v56 }
  0x6a   : > { %1751 = vst.msk [vmem:[%s5270_s21 + $0x38] sm:$0x1] %vm1740_vm4, %v5070_v56  ;;  %1756 = vst.msk [vmem:[%s5270_s21 + $0x4c] sm:$0x1] %vm1740_vm4, %v5070_v56 }
  0x6b   : > { %1761 = vst.msk [vmem:[%s5270_s21 + $0x60] sm:$0x1] %vm1740_vm4, %v5070_v56  ;;  %1766 = vst.msk [vmem:[%s5270_s21 + $0x74] sm:$0x1] %vm1740_vm4, %v5070_v56 }
  0x6c   : > { %1771 = vst.msk [vmem:[%s5270_s21 + $0x88] sm:$0x1] %vm1740_vm4, %v5070_v56  ;;  %1776 = vst.msk [vmem:[%s5270_s21 + $0x9c] sm:$0x1] %vm1740_vm4, %v5070_v56 }
  0x6d   : > { %1781 = vst.msk [vmem:[%s5270_s21 + $0xb0] sm:$0x1] %vm1740_vm4, %v5070_v56  ;;  %1786 = vst.msk [vmem:[%s5270_s21 + $0xc4] sm:$0x1] %vm1740_vm4, %v5070_v56 }
  0x6e   : > { %1791 = vst.msk [vmem:[%s5270_s21 + $0xd8] sm:$0x1] %vm1740_vm4, %v5070_v56  ;;  %1796 = vst.msk [vmem:[%s5270_s21 + $0xec] sm:$0x1] %vm1740_vm4, %v5070_v56 }
  0x6f   : > { %1801 = vst.msk [vmem:[%s5270_s21 + $0x100] sm:$0x1] %vm1740_vm4, %v5070_v56  ;;  %1806 = vst.msk [vmem:[%s5270_s21 + $0x114] sm:$0x1] %vm1740_vm4, %v5070_v56 }
  0x70   : > { %4769 = vmatmul.mubr.msk.bf16.gmra.mrb[40].mxu0 %vm733_vm2, %v4964_v48  ;;  %4833 = vmatmul.mubr.msk.bf16.gmra.mrb[40].mxu1 %vm733_vm2, %v4965_v49  ;;  %1811 = vst.msk [vmem:[%s5270_s21 + $0x128] sm:$0x1] %vm1740_vm4, %v5070_v56  ;;  %1816 = vst.msk [vmem:[%s5270_s21 + $0x13c] sm:$0x1] %vm1740_vm4, %v5070_v56 }
  0x71   : > { %4772 = vmatprep.mubr.msk.bf16.mxu0 %vm733_vm2, %v4966_v50  ;;  %4836 = vmatprep.mubr.msk.bf16.mxu1 %vm733_vm2, %v4967_v51  ;;  %1821 = vst.msk [vmem:[%s5270_s21 + $0x150] sm:$0x1] %vm1740_vm4, %v5070_v56  ;;  %1826 = vst.msk [vmem:[%s5270_s21 + $0x164] sm:$0x1] %vm1740_vm4, %v5070_v56 }
  0x72   : > { %1831 = vst.msk [vmem:[%s5270_s21 + $0x178] sm:$0x1] %vm1740_vm4, %v5070_v56  ;;  %1836 = vst.msk [vmem:[%s5270_s21 + $0x18c] sm:$0x1] %vm1740_vm4, %v5070_v56 }
  0x73   : > { %1841 = vst.msk [vmem:[%s5270_s21 + $0x1a0] sm:$0x1] %vm1740_vm4, %v5070_v56  ;;  %1846 = vst.msk [vmem:[%s5270_s21 + $0x1b4] sm:$0x1] %vm1740_vm4, %v5070_v56 }
  0x74   : > { %1851 = vst.msk [vmem:[%s5270_s21 + $0x1c8] sm:$0x1] %vm1740_vm4, %v5070_v56  ;;  %1856 = vst.msk [vmem:[%s5270_s21 + $0x1dc] sm:$0x1] %vm1740_vm4, %v5070_v56 }
  0x75   : > { %1861 = vst.msk [vmem:[%s5270_s21 + $0x1f0] sm:$0x1] %vm1740_vm4, %v5070_v56  ;;  %1866 = vst.msk [vmem:[%s5270_s21 + $0x204] sm:$0x1] %vm1740_vm4, %v5070_v56 }
  0x76   : > { %1871 = vst.msk [vmem:[%s5270_s21 + $0x218] sm:$0x1] %vm1740_vm4, %v5070_v56  ;;  %1876 = vst.msk [vmem:[%s5270_s21 + $0x22c] sm:$0x1] %vm1740_vm4, %v5070_v56 }
  0x77   : > { %1881 = vst.msk [vmem:[%s5270_s21 + $0x240] sm:$0x1] %vm1740_vm4, %v5070_v56  ;;  %1886 = vst.msk [vmem:[%s5270_s21 + $0x254] sm:$0x1] %vm1740_vm4, %v5070_v56 }
  0x78   : > { %4773 = vmatmul.mubr.msk.bf16.gmra.mrb[44].mxu0 %vm733_vm2, %v4968_v52  ;;  %4837 = vmatmul.mubr.msk.bf16.gmra.mrb[44].mxu1 %vm733_vm2, %v4969_v53  ;;  %1891 = vst.msk [vmem:[%s5270_s21 + $0x268] sm:$0x1] %vm1740_vm4, %v5070_v56  ;;  %1896 = vst.msk [vmem:[%s5270_s21 + $0x27c] sm:$0x1] %vm1740_vm4, %v5070_v56  ;;  %v4411_v53 = vld [vmem:[%s5270_s21 + $0x154] sm:$0xf] }
  0x79   : > { %4776 = vmatprep.mubr.msk.bf16.mxu0 %vm733_vm2, %v4970_v54  ;;  %4840 = vmatprep.mubr.msk.bf16.mxu1 %vm733_vm2, %v4971_v55  ;;  %1901 = vst.msk [vmem:[%s5270_s21 + $0x290] sm:$0x1] %vm1740_vm4, %v5070_v56  ;;  %1906 = vst.msk [vmem:[%s5270_s21 + $0x2a4] sm:$0x1] %vm1740_vm4, %v5070_v56 }
  0x80   : > { %4777 = vmatmul.mubr.msk.bf16.gmra.mrb[48].mxu0 %vm733_vm2, %v4972_v57  ;;  %4841 = vmatmul.mubr.msk.bf16.gmra.mrb[48].mxu1 %vm733_vm2, %v4973_v58 }
  0x81   : > { %4780 = vmatprep.mubr.msk.bf16.mxu0 %vm733_vm2, %v4974_v59  ;;  %4844 = vmatprep.mubr.msk.bf16.mxu1 %vm733_vm2, %v4975_v60 }
  0x88   : > { %4781 = vmatmul.mubr.msk.bf16.gmra.mrb[52].mxu0 %vm733_vm2, %v4976_v61  ;;  %4845 = vmatmul.mubr.msk.bf16.gmra.mrb[52].mxu1 %vm733_vm2, %v4977_v62 }
  0x89   : > { %4784 = vmatprep.mubr.msk.bf16.mxu0 %vm733_vm2, %v4978_v63  ;;  %4848 = vmatprep.mubr.msk.bf16.mxu1 %vm733_vm2, %v4979_v0 }
  0x90   : > { %4785 = vmatmul.mubr.msk.bf16.gmra.mrb[56].mxu0 %vm733_vm2, %v4980_v1  ;;  %4849 = vmatmul.mubr.msk.bf16.gmra.mrb[56].mxu1 %vm733_vm2, %v4981_v2 }
  0x91   : > { %4788 = vmatprep.mubr.msk.bf16.mxu0 %vm733_vm2, %v4982_v3  ;;  %4852 = vmatprep.mubr.msk.bf16.mxu1 %vm733_vm2, %v4983_v4 }
  0x98   : > { %4789 = vmatmul.mubr.msk.bf16.gmra.mrb[60].mxu0 %vm733_vm2, %v4984_v5  ;;  %4853 = vmatmul.mubr.msk.bf16.gmra.mrb[60].mxu1 %vm733_vm2, %v4985_v6  ;;  %v4304_v6 = vld [vmem:[%s5270_s21 + $0x24] sm:$0x1] }
  0xf3   : > { %v4730_v8 = vpop.f32.mrb[0].mxu0  ;;  %v4794_v10 = vpop.f32.mrb[0].mxu1 }
  0xf4   : > { %v976_v9 = vadd.f32 %v4730_v8, %v5820_v7  ;;  %v967_v11 = vpop.f32.mrb[1].mxu0  ;;  %v1232_v12 = vadd.f32 %v4794_v10, %v5820_v7  ;;  %v1223_v14 = vpop.f32.mrb[1].mxu1 }
  0xf5   : > { %v968_v13 = vadd.f32 %v5820_v7, %v967_v11  ;;  %v4731_v15 = vpop.f32.mrb[2].mxu0  ;;  %v1224_v17 = vadd.f32 %v5820_v7, %v1223_v14  ;;  %v4795_v19 = vpop.f32.mrb[2].mxu1 }
  0xf6   : > { %1481 = vst.msk [vmem:[%s5825_s30 + $0x10] sm:$0xff] %vm1478_vm5, %v976_v9  ;;  %v1609_v16 = vmax.f32 %v976_v9, 0.0  ;;  %v979_v18 = vadd.f32 %v4731_v15, %v5820_v7  ;;  %v970_v20 = vpop.f32.mrb[3].mxu0  ;;  %1545 = vst.msk [vmem:[%s5825_s30 + $0x210] sm:$0xff] %vm1478_vm5, %v1232_v12  ;;  %v1673_v21 = vmax.f32 %v1232_v12, 0.0  ;;  %v1235_v23 = vadd.f32 %v4795_v19, %v5820_v7  ;;  %v1226_v25 = vpop.f32.mrb[3].mxu1 }
  0xf7   : > { %1479 = vst.msk [vmem:[%s5825_s30] sm:$0xff] %vm1478_vm5, %v968_v13  ;;  %v1607_v22 = vmax.f32 %v968_v13, 0.0  ;;  %v971_v24 = vadd.f32 %v5820_v7, %v970_v20  ;;  %1543 = vst.msk [vmem:[%s5825_s30 + $0x200] sm:$0xff] %vm1478_vm5, %v1224_v17  ;;  %v1671_v27 = vmax.f32 %v1224_v17, 0.0  ;;  %v5842_v29 = vadd.f32 %v5820_v7, %v1226_v25 }
  0xf8   : > { %v4531_v26 = vpack.c.bf16 %v1609_v16, %v1609_v16  ;;  %1482 = vst.msk [vmem:[%s5825_s30 + $0x18] sm:$0xff] %vm1478_vm5, %v979_v18  ;;  %v1610_v28 = vmax.f32 %v979_v18, 0.0  ;;  %v4595_v30 = vpack.c.bf16 %v1673_v21, %v1673_v21  ;;  %1546 = vst.msk [vmem:[%s5825_s30 + $0x218] sm:$0xff] %vm1478_vm5, %v1235_v23  ;;  %v1674_v32 = vmax.f32 %v1235_v23, 0.0 }
  0xf9   : > { %v4529_v31 = vpack.c.bf16 %v1607_v22, %v1607_v22  ;;  %1480 = vst.msk [vmem:[%s5825_s30 + $0x8] sm:$0xff] %vm1478_vm5, %v971_v24  ;;  %v1608_v33 = vmax.f32 %v971_v24, 0.0  ;;  %v4593_v36 = vpack.c.bf16 %v1671_v27, %v1671_v27  ;;  %1544 = vst.msk [vmem:[%s5825_s30 + $0x208] sm:$0xff] %vm1478_vm5, %v5842_v29  ;;  %v1672_v20 = vmax.f32 %v5842_v29, 0.0 }
  0xfa   : > { %v2312_v34 = vshrl.u32 %v4531_v26, 16  ;;  %v2315_v35 = vshll.u32 %v4531_v26, 16  ;;  %v4532_v37 = vpack.c.bf16 %v1610_v28, %v1610_v28  ;;  %v2872_v38 = vshrl.u32 %v4595_v30, 16  ;;  %v4416_v26 = vld [vmem:[%s5270_s21 + $0x164] sm:$0x1] }
  0xfb   : > { %v2875_v39 = vshll.u32 %v4595_v30, 16  ;;  %v2295_v40 = vshrl.u32 %v4529_v31, 16  ;;  %v2298_v41 = vshll.u32 %v4529_v31, 16  ;;  %v4734_v42 = vpop.f32.mrb[4].mxu0  ;;  %v2855_v45 = vshrl.u32 %v4593_v36, 16  ;;  %v4798_v48 = vpop.f32.mrb[4].mxu1 }
  0xfc   : > { %v2314_v43 = vrot.slane %v2312_v34, 7  ;;  %v2858_v46 = vshll.u32 %v4593_v36, 16  ;;  %v2321_v47 = vshrl.u32 %v4532_v37, 16  ;;  %v983_v49 = vpop.f32.mrb[5].mxu0  ;;  %v5852_v50 = vrot.slane %v2872_v38, 7  ;;  %v1239_v56 = vpop.f32.mrb[5].mxu1 }
  0xfd   : > { %v5854_v51 = vrot.slane %v2295_v40, 7  ;;  %v2324_v54 = vshll.u32 %v4532_v37, 16  ;;  %v4596_v55 = vpack.c.bf16 %v1674_v32, %v1674_v32  ;;  %v5863_v57 = vpop.f32.mrb[6].mxu0  ;;  %v5867_v60 = vrot.slane %v2855_v45, 7  ;;  %v5875_v63 = vpop.f32.mrb[6].mxu1 }
  0xfe   : > { %v5865_v58 = vor.u32 %v2315_v35, %v2314_v43  ;;  %v2319_v59 = vrot.slane %v2314_v43, 4  ;;  %v2323_v61 = vrot.slane %v2321_v47, 7  ;;  %v5877_v0 = vpop.f32.mrb[7].mxu0  ;;  %v5880_v1 = vor.u32 %v2875_v39, %v5852_v50  ;;  %v5892_v8 = vpop.f32.mrb[7].mxu1 }
  0xff   : > { %v2879_v2 = vrot.slane %v5852_v50, 4  ;;  %v2300_v3 = vor.u32 %v2298_v41, %v5854_v51  ;;  %v2301_v4 = vrot.slane %v5854_v51, 4  ;;  %v2860_v9 = vor.u32 %v2858_v46, %v5867_v60 }
 0x100   : > { %v2861_v10 = vrot.slane %v5867_v60, 4  ;;  %v2326_v11 = vor.u32 %v2324_v54, %v2323_v61  ;;  %v2328_v12 = vrot.slane %v2323_v61, 4  ;;  %v2881_v14 = vshrl.u32 %v4596_v55, 16 }
 0x101   : > { %v3579_v13 = vsel %vm5858_vm9, %v2300_v3, %v4299_v44  ;;  %v2884_v15 = vshll.u32 %v4596_v55, 16  ;;  %v4530_v16 = vpack.c.bf16 %v1608_v33, %v1608_v33  ;;  %v3725_v17 = vsel %vm5858_vm9, %v2860_v9, %v4411_v53 }
 0x102   : > { %4300 = vst [vmem:[%s5270_s21 + $0x14] sm:$0xf] %v3579_v13  ;;  %v2327_v18 = vsel %vm5887_vm11, %v2319_v59, %v2326_v11  ;;  %v3587_v19 = vsel %vm5871_vm10, %v2328_v12, %v4304_v6  ;;  %4412 = vst [vmem:[%s5270_s21 + $0x154] sm:$0xf] %v3725_v17  ;;  %v2883_v21 = vrot.slane %v2881_v14, 7  ;;  %v992_v24 = vadd.f32 %v4734_v42, %v5820_v7 }
 0x103   : > { %4303 = vst.msk [vmem:[%s5270_s21 + $0x20] sm:$0xf] %vm1735_vm3, %v2327_v18  ;;  %4305 = vst [vmem:[%s5270_s21 + $0x24] sm:$0x1] %v3587_v19  ;;  %v2303_v22 = vshrl.u32 %v4530_v16, 16  ;;  %v2306_v23 = vshll.u32 %v4530_v16, 16  ;;  %v4594_v27 = vpack.c.bf16 %v1672_v20, %v1672_v20  ;;  %v1248_v28 = vadd.f32 %v4798_v48, %v5820_v7 }
 0x104   : > { %v5911_v25 = vpop.f32.mrb[8].mxu0  ;;  %v984_v29 = vadd.f32 %v5820_v7, %v983_v49  ;;  %v1240_v30 = vadd.f32 %v5820_v7, %v1239_v56  ;;  %v5917_v31 = vpop.f32.mrb[8].mxu1  ;;  %v2886_v33 = vor.u32 %v2884_v15, %v2883_v21  ;;  %v2888_v34 = vrot.slane %v2883_v21, 4  ;;  %1485 = vst.msk [vmem:[%s5825_s30 + $0x30] sm:$0xff] %vm1478_vm5, %v992_v24  ;;  %v4306_v16 = vld [vmem:[%s5270_s21 + $0x28] sm:$0xf] }
 0x105   : > { %v5919_v32 = vpop.f32.mrb[9].mxu0  ;;  %v2305_v35 = vrot.slane %v2303_v22, 7  ;;  %v1613_v36 = vmax.f32 %v992_v24, 0.0  ;;  %v5923_v37 = vpop.f32.mrb[9].mxu1  ;;  %v2863_v39 = vshrl.u32 %v4594_v27, 16  ;;  %v2866_v40 = vshll.u32 %v4594_v27, 16 }
 0x106   : > { %v5925_v38 = vpop.f32.mrb[10].mxu0  ;;  %1549 = vst.msk [vmem:[%s5825_s30 + $0x230] sm:$0xff] %vm1478_vm5, %v1248_v28  ;;  %v1677_v41 = vmax.f32 %v1248_v28, 0.0  ;;  %1483 = vst.msk [vmem:[%s5825_s30 + $0x20] sm:$0xff] %vm1478_vm5, %v984_v29  ;;  %v1611_v42 = vmax.f32 %v984_v29, 0.0  ;;  %v5933_v43 = vpop.f32.mrb[10].mxu1  ;;  %v2887_v45 = vsel %vm5887_vm11, %v2879_v2, %v2886_v33  ;;  %v3731_v46 = vsel %vm5871_vm10, %v2888_v34, %v4416_v26 }
 0x107   : > { %1547 = vst.msk [vmem:[%s5825_s30 + $0x220] sm:$0xff] %vm1478_vm5, %v1240_v30  ;;  %v5935_v44 = vpop.f32.mrb[11].mxu0  ;;  %v2308_v47 = vor.u32 %v2306_v23, %v2305_v35  ;;  %v2310_v48 = vrot.slane %v2305_v35, 4  ;;  %v5941_v49 = vpop.f32.mrb[11].mxu1  ;;  %4417 = vst [vmem:[%s5270_s21 + $0x164] sm:$0x1] %v3731_v46  ;;  %v4535_v51 = vpack.c.bf16 %v1613_v36, %v1613_v36  ;;  %v995_v61 = vadd.f32 %v5863_v57, %v5820_v7 }
 0x108   : > { %4415 = vst.msk [vmem:[%s5270_s21 + $0x160] sm:$0xf] %vm1735_vm3, %v2887_v45  ;;  %v2865_v50 = vrot.slane %v2863_v39, 7  ;;  %v4599_v53 = vpack.c.bf16 %v1677_v41, %v1677_v41  ;;  %v4533_v54 = vpack.c.bf16 %v1611_v42, %v1611_v42  ;;  %v1675_v59 = vmax.f32 %v1240_v30, 0.0  ;;  %v4418_v45 = vld [vmem:[%s5270_s21 + $0x168] sm:$0xf] }
 0x109   : > { %v2309_v55 = vsel %vm5887_vm11, %v2301_v4, %v2308_v47  ;;  %v2318_v56 = vsel %vm5887_vm11, %v2310_v48, %v5865_v58  ;;  %v2347_v6 = vshrl.u32 %v4535_v51, 16  ;;  %v2350_v9 = vshll.u32 %v4535_v51, 16  ;;  %1486 = vst.msk [vmem:[%s5825_s30 + $0x38] sm:$0xff] %vm1478_vm5, %v995_v61 }
 0x10a   : > { %4301 = vst.msk [vmem:[%s5270_s21 + $0x18] sm:$0xf] %vm1735_vm3, %v2309_v55  ;;  %4302 = vst.msk [vmem:[%s5270_s21 + $0x1c] sm:$0xf] %vm1735_vm3, %v2318_v56  ;;  %v2868_v2 = vor.u32 %v2866_v40, %v2865_v50  ;;  %v2870_v3 = vrot.slane %v2865_v50, 4  ;;  %v2907_v4 = vshrl.u32 %v4599_v53, 16  ;;  %v4597_v17 = vpack.c.bf16 %v1675_v59, %v1675_v59 }
 0x10b   : > { %v2910_v11 = vshll.u32 %v4599_v53, 16  ;;  %v2330_v12 = vshrl.u32 %v4533_v54, 16  ;;  %v2333_v13 = vshll.u32 %v4533_v54, 16  ;;  %v5959_v58 = vpop.f32.mrb[12].mxu0  ;;  %v5968_v15 = vrot.slane %v2347_v6, 7  ;;  %v5971_v18 = vpop.f32.mrb[12].mxu1 }
 0x10c   : > { %v2869_v57 = vsel %vm5887_vm11, %v2861_v10, %v2868_v2  ;;  %v2878_v14 = vsel %vm5887_vm11, %v2870_v3, %v5880_v1  ;;  %v5973_v19 = vpop.f32.mrb[13].mxu0  ;;  %v5979_v60 = vrot.slane %v2907_v4, 7  ;;  %v1614_v20 = vmax.f32 %v995_v61, 0.0  ;;  %v5985_v21 = vpop.f32.mrb[13].mxu1 }
 0x10d   : > { %4413 = vst.msk [vmem:[%s5270_s21 + $0x158] sm:$0xf] %vm1735_vm3, %v2869_v57  ;;  %4414 = vst.msk [vmem:[%s5270_s21 + $0x15c] sm:$0xf] %vm1735_vm3, %v2878_v14  ;;  %v5981_v10 = vrot.slane %v2330_v12, 7  ;;  %v1251_v1 = vadd.f32 %v5875_v63, %v5820_v7  ;;  %v5987_v22 = vpop.f32.mrb[14].mxu0  ;;  %v5990_v23 = vor.u32 %v2350_v9, %v5968_v15  ;;  %v987_v41 = vadd.f32 %v5820_v7, %v5877_v0 }
 0x10e   : > { %v2354_v24 = vrot.slane %v5968_v15, 4  ;;  %v2890_v26 = vshrl.u32 %v4597_v17, 16  ;;  %v2893_v27 = vshll.u32 %v4597_v17, 16  ;;  %v5993_v28 = vpop.f32.mrb[14].mxu1  ;;  %v5995_v29 = vpop.f32.mrb[15].mxu0  ;;  %v5998_v30 = vor.u32 %v2910_v11, %v5979_v60 }
 0x10f   : > { %v2914_v63 = vrot.slane %v5979_v60, 4  ;;  %v2335_v33 = vor.u32 %v2333_v13, %v5981_v10  ;;  %v2336_v34 = vrot.slane %v5981_v10, 4  ;;  %1550 = vst.msk [vmem:[%s5825_s30 + $0x238] sm:$0xff] %vm1478_vm5, %v1251_v1  ;;  %v6005_v35 = vpop.f32.mrb[15].mxu1  ;;  %v4536_v39 = vpack.c.bf16 %v1614_v20, %v1614_v20  ;;  %1484 = vst.msk [vmem:[%s5825_s30 + $0x28] sm:$0xff] %vm1478_vm5, %v987_v41 }
 0x110   : > { %v6007_v36 = vrot.slane %v2890_v26, 7  ;;  %v1678_v40 = vmax.f32 %v1251_v1, 0.0  ;;  %v1243_v46 = vadd.f32 %v5820_v7, %v5892_v8  ;;  %v1008_v47 = vadd.f32 %v5911_v25, %v5820_v7  ;;  %v4311_v9 = vld [vmem:[%s5270_s21 + $0x38] sm:$0x1] }
 0x111   : > { %v3590_v42 = vsel %vm5858_vm9, %v2335_v33, %v4306_v16  ;;  %v1264_v48 = vadd.f32 %v5917_v31, %v5820_v7  ;;  %v2356_v51 = vshrl.u32 %v4536_v39, 16  ;;  %v2359_v53 = vshll.u32 %v4536_v39, 16 }
 0x112   : > { %4307 = vst [vmem:[%s5270_s21 + $0x28] sm:$0xf] %v3590_v42  ;;  %v2895_v50 = vor.u32 %v2893_v27, %v6007_v36  ;;  %v2896_v0 = vrot.slane %v6007_v36, 4  ;;  %v4600_v54 = vpack.c.bf16 %v1678_v40, %v1678_v40  ;;  %v1612_v55 = vmax.f32 %v987_v41, 0.0  ;;  %1548 = vst.msk [vmem:[%s5825_s30 + $0x228] sm:$0xff] %vm1478_vm5, %v1243_v46 }
 0x113   : > { %v1676_v8 = vmax.f32 %v1243_v46, 0.0  ;;  %1489 = vst.msk [vmem:[%s5825_s30 + $0x50] sm:$0xff] %vm1478_vm5, %v1008_v47  ;;  %v1617_v25 = vmax.f32 %v1008_v47, 0.0  ;;  %1553 = vst.msk [vmem:[%s5825_s30 + $0x250] sm:$0xff] %vm1478_vm5, %v1264_v48  ;;  %v6031_v31 = vpop.f32.mrb[16].mxu0  ;;  %v2358_v59 = vrot.slane %v2356_v51, 7  ;;  %v6037_v2 = vadd.f32 %v5820_v7, %v5919_v32 }
 0x114   : > { %v3734_v56 = vsel %vm5858_vm9, %v2895_v50, %v4418_v45  ;;  %v1681_v61 = vmax.f32 %v1264_v48, 0.0  ;;  %v6039_v3 = vpop.f32.mrb[16].mxu1  ;;  %v6041_v6 = vpop.f32.mrb[17].mxu0  ;;  %v2916_v4 = vshrl.u32 %v4600_v54, 16  ;;  %v2919_v11 = vshll.u32 %v4600_v54, 16 }
 0x115   : > { %4419 = vst [vmem:[%s5270_s21 + $0x168] sm:$0xf] %v3734_v56  ;;  %v4534_v12 = vpack.c.bf16 %v1612_v55, %v1612_v55  ;;  %v4598_v13 = vpack.c.bf16 %v1676_v8, %v1676_v8  ;;  %v6045_v57 = vpop.f32.mrb[17].mxu1  ;;  %v6047_v14 = vpop.f32.mrb[18].mxu0  ;;  %v2361_v15 = vor.u32 %v2359_v53, %v2358_v59  ;;  %v2363_v16 = vrot.slane %v2358_v59, 4  ;;  %1487 = vst.msk [vmem:[%s5825_s30 + $0x40] sm:$0xff] %vm1478_vm5, %v6037_v2 }
 0x116   : > { %v4539_v32 = vpack.c.bf16 %v1617_v25, %v1617_v25  ;;  %v4603_v17 = vpack.c.bf16 %v1681_v61, %v1681_v61  ;;  %v6052_v20 = vpop.f32.mrb[18].mxu1  ;;  %v6054_v1 = vpop.f32.mrb[19].mxu0  ;;  %v2918_v26 = vrot.slane %v2916_v4, 7  ;;  %v4423_v45 = vld [vmem:[%s5270_s21 + $0x178] sm:$0x1] }
 0x117   : > { %v2338_v27 = vshrl.u32 %v4534_v12, 16  ;;  %v2341_v33 = vshll.u32 %v4534_v12, 16  ;;  %v2898_v39 = vshrl.u32 %v4598_v13, 16  ;;  %v6056_v40 = vpop.f32.mrb[19].mxu1  ;;  %v2362_v41 = vsel %vm5887_vm11, %v2354_v24, %v2361_v15 }
 0x118   : > { %v3596_v42 = vsel %vm5871_vm10, %v2363_v16, %v4311_v9  ;;  %v2901_v46 = vshll.u32 %v4598_v13, 16  ;;  %v2382_v47 = vshrl.u32 %v4539_v32, 16  ;;  %4310 = vst.msk [vmem:[%s5270_s21 + $0x34] sm:$0xf] %vm1735_vm3, %v2362_v41  ;;  %v2921_v48 = vor.u32 %v2919_v11, %v2918_v26 }
 0x119   : > { %4312 = vst [vmem:[%s5270_s21 + $0x38] sm:$0x1] %v3596_v42  ;;  %v2923_v50 = vrot.slane %v2918_v26, 4  ;;  %v2340_v51 = vrot.slane %v2338_v27, 7  ;;  %v2900_v53 = vrot.slane %v2898_v39, 7  ;;  %v2385_v55 = vshll.u32 %v4539_v32, 16 }
 0x11a   : > { %v6066_v54 = vrot.slane %v2382_v47, 7  ;;  %v2942_v8 = vshrl.u32 %v4603_v17, 16  ;;  %v2945_v24 = vshll.u32 %v4603_v17, 16  ;;  %v2922_v25 = vsel %vm5887_vm11, %v2914_v63, %v2921_v48 }
 0x11b   : > { %v3740_v56 = vsel %vm5871_vm10, %v2923_v50, %v4423_v45  ;;  %v2343_v59 = vor.u32 %v2341_v33, %v2340_v51  ;;  %v2345_v61 = vrot.slane %v2340_v51, 4  ;;  %v6074_v9 = vpop.f32.mrb[20].mxu0  ;;  %4422 = vst.msk [vmem:[%s5270_s21 + $0x174] sm:$0xf] %vm1735_vm3, %v2922_v25  ;;  %v2903_v4 = vor.u32 %v2901_v46, %v2900_v53  ;;  %v6083_v63 = vpop.f32.mrb[20].mxu1 }
 0x11c   : > { %4424 = vst [vmem:[%s5270_s21 + $0x178] sm:$0x1] %v3740_v56  ;;  %v2905_v11 = vrot.slane %v2900_v53, 4  ;;  %v6080_v12 = vor.u32 %v2385_v55, %v6066_v54  ;;  %v2389_v60 = vrot.slane %v6066_v54, 4  ;;  %v6085_v13 = vpop.f32.mrb[21].mxu0  ;;  %v6094_v32 = vrot.slane %v2942_v8, 7 }
 0x11d   : > { %v2344_v15 = vsel %vm5887_vm11, %v2336_v34, %v2343_v59  ;;  %v2353_v16 = vsel %vm5887_vm11, %v2345_v61, %v5990_v23  ;;  %v1615_v17 = vmax.f32 %v6037_v2, 0.0  ;;  %v6097_v26 = vpop.f32.mrb[21].mxu1  ;;  %v6099_v27 = vpop.f32.mrb[22].mxu0  ;;  %v2904_v10 = vsel %vm5887_vm11, %v2896_v0, %v2903_v4 }
 0x11e   : > { %4308 = vst.msk [vmem:[%s5270_s21 + $0x2c] sm:$0xf] %vm1735_vm3, %v2344_v15  ;;  %4309 = vst.msk [vmem:[%s5270_s21 + $0x30] sm:$0xf] %vm1735_vm3, %v2353_v16  ;;  %v2913_v23 = vsel %vm5887_vm11, %v2905_v11, %v5998_v30  ;;  %v1256_v34 = vadd.f32 %v5820_v7, %v5923_v37  ;;  %v1011_v2 = vadd.f32 %v5925_v38, %v5820_v7  ;;  %v6116_v33 = vpop.f32.mrb[22].mxu1  ;;  %v6118_v39 = vpop.f32.mrb[23].mxu0 }
 0x11f   : > { %4420 = vst.msk [vmem:[%s5270_s21 + $0x16c] sm:$0xf] %vm1735_vm3, %v2904_v10  ;;  %4421 = vst.msk [vmem:[%s5270_s21 + $0x170] sm:$0xf] %vm1735_vm3, %v2913_v23  ;;  %v6125_v36 = vor.u32 %v2945_v24, %v6094_v32  ;;  %v4537_v0 = vpack.c.bf16 %v1615_v17, %v1615_v17  ;;  %v1267_v37 = vadd.f32 %v5933_v43, %v5820_v7  ;;  %v6130_v38 = vpop.f32.mrb[23].mxu1 }
 0x120   : > { %1551 = vst.msk [vmem:[%s5825_s30 + $0x240] sm:$0xff] %vm1478_vm5, %v1256_v34  ;;  %v1679_v41 = vmax.f32 %v1256_v34, 0.0  ;;  %1490 = vst.msk [vmem:[%s5825_s30 + $0x58] sm:$0xff] %vm1478_vm5, %v1011_v2  ;;  %v1618_v42 = vmax.f32 %v1011_v2, 0.0  ;;  %v1003_v45 = vadd.f32 %v5820_v7, %v5935_v44  ;;  %v1259_v46 = vadd.f32 %v5820_v7, %v5941_v49  ;;  %v4313_v24 = vld [vmem:[%s5270_s21 + $0x3c] sm:$0xf] }
 0x121   : > { %v2365_v47 = vshrl.u32 %v4537_v0, 16  ;;  %v2368_v48 = vshll.u32 %v4537_v0, 16  ;;  %1554 = vst.msk [vmem:[%s5825_s30 + $0x258] sm:$0xff] %vm1478_vm5, %v1267_v37  ;;  %v1682_v43 = vmax.f32 %v1267_v37, 0.0  ;;  %v1024_v50 = vadd.f32 %v5959_v58, %v5820_v7  ;;  %v4425_v37 = vld [vmem:[%s5270_s21 + $0x17c] sm:$0xf] }
 0x122   : > { %v4601_v51 = vpack.c.bf16 %v1679_v41, %v1679_v41  ;;  %v4540_v53 = vpack.c.bf16 %v1618_v42, %v1618_v42  ;;  %1488 = vst.msk [vmem:[%s5825_s30 + $0x48] sm:$0xff] %vm1478_vm5, %v1003_v45  ;;  %v1616_v55 = vmax.f32 %v1003_v45, 0.0  ;;  %1552 = vst.msk [vmem:[%s5825_s30 + $0x248] sm:$0xff] %vm1478_vm5, %v1259_v46  ;;  %v1680_v44 = vmax.f32 %v1259_v46, 0.0 }
 0x123   : > { %v6148_v8 = vrot.slane %v2365_v47, 7  ;;  %v4604_v49 = vpack.c.bf16 %v1682_v43, %v1682_v43  ;;  %1493 = vst.msk [vmem:[%s5825_s30 + $0x70] sm:$0xff] %vm1478_vm5, %v1024_v50  ;;  %v1621_v25 = vmax.f32 %v1024_v50, 0.0  ;;  %v1280_v56 = vadd.f32 %v5971_v18, %v5820_v7  ;;  %v6155_v58 = vpop.f32.mrb[24].mxu0  ;;  %v6157_v15 = vpop.f32.mrb[24].mxu1 }
 0x124   : > { %v2925_v59 = vshrl.u32 %v4601_v51, 16  ;;  %v2928_v61 = vshll.u32 %v4601_v51, 16  ;;  %v2391_v4 = vshrl.u32 %v4540_v53, 16  ;;  %v2394_v11 = vshll.u32 %v4540_v53, 16  ;;  %v6159_v16 = vpop.f32.mrb[25].mxu0  ;;  %v6165_v18 = vpop.f32.mrb[25].mxu1 }
 0x125   : > { %v2370_v17 = vor.u32 %v2368_v48, %v6148_v8  ;;  %v2371_v10 = vrot.slane %v6148_v8, 4  ;;  %v2951_v23 = vshrl.u32 %v4604_v49, 16  ;;  %v2954_v34 = vshll.u32 %v4604_v49, 16  ;;  %1557 = vst.msk [vmem:[%s5825_s30 + $0x270] sm:$0xff] %vm1478_vm5, %v1280_v56  ;;  %v6167_v2 = vpop.f32.mrb[26].mxu0  ;;  %v6172_v46 = vpop.f32.mrb[26].mxu1 }
 0x126   : > { %v6169_v0 = vrot.slane %v2925_v59, 7  ;;  %v2393_v41 = vrot.slane %v2391_v4, 7  ;;  %v4538_v42 = vpack.c.bf16 %v1616_v55, %v1616_v55  ;;  %v4602_v45 = vpack.c.bf16 %v1680_v44, %v1680_v44  ;;  %v6174_v47 = vpop.f32.mrb[27].mxu0  ;;  %v4318_v43 = vld [vmem:[%s5270_s21 + $0x4c] sm:$0x1]  ;;  %v6179_v8 = vpop.f32.mrb[27].mxu1 }
 0x127   : > { %v3599_v48 = vsel %vm5858_vm9, %v2370_v17, %v4313_v24  ;;  %v2953_v50 = vrot.slane %v2951_v23, 7  ;;  %v4543_v51 = vpack.c.bf16 %v1621_v25, %v1621_v25  ;;  %v1685_v53 = vmax.f32 %v1280_v56, 0.0  ;;  %v4430_v4 = vld [vmem:[%s5270_s21 + $0x18c] sm:$0x1] }
 0x128   : > { %4314 = vst [vmem:[%s5270_s21 + $0x3c] sm:$0xf] %v3599_v48  ;;  %v2930_v55 = vor.u32 %v2928_v61, %v6169_v0  ;;  %v2931_v44 = vrot.slane %v6169_v0, 4  ;;  %v2396_v49 = vor.u32 %v2394_v11, %v2393_v41  ;;  %v2398_v59 = vrot.slane %v2393_v41, 4 }
 0x129   : > { %v2956_v30 = vor.u32 %v2954_v34, %v2953_v50  ;;  %v2958_v24 = vrot.slane %v2953_v50, 4  ;;  %v2373_v17 = vshrl.u32 %v4538_v42, 16  ;;  %v2376_v25 = vshll.u32 %v4538_v42, 16 }
 0x12a   : > { %v3743_v56 = vsel %vm5858_vm9, %v2930_v55, %v4425_v37  ;;  %v2397_v23 = vsel %vm5887_vm11, %v2389_v60, %v2396_v49  ;;  %v3605_v61 = vsel %vm5871_vm10, %v2398_v59, %v4318_v43  ;;  %v2933_v11 = vshrl.u32 %v4602_v45, 16 }
 0x12b   : > { %4426 = vst [vmem:[%s5270_s21 + $0x17c] sm:$0xf] %v3743_v56  ;;  %4317 = vst.msk [vmem:[%s5270_s21 + $0x48] sm:$0xf] %vm1735_vm3, %v2397_v23  ;;  %v7589_v34 = vrot.slane %v6094_v32, 4  ;;  %v3749_v37 = vsel %vm5871_vm10, %v2958_v24, %v4430_v4  ;;  %v2375_v54 = vrot.slane %v2373_v17, 7  ;;  %v4607_v50 = vpack.c.bf16 %v1685_v53, %v1685_v53 }
 0x12c   : > { %4319 = vst [vmem:[%s5270_s21 + $0x4c] sm:$0x1] %v3605_v61  ;;  %v2936_v41 = vshll.u32 %v4602_v45, 16  ;;  %v6203_v42 = vpop.f32.mrb[28].mxu0  ;;  %4431 = vst [vmem:[%s5270_s21 + $0x18c] sm:$0x1] %v3749_v37  ;;  %v1016_v45 = vadd.f32 %v5820_v7, %v5973_v19  ;;  %v1272_v59 = vadd.f32 %v5820_v7, %v5985_v21 }
 0x12d   : > { %v2957_v0 = vsel %vm5887_vm11, %v7589_v34, %v2956_v30  ;;  %v2935_v60 = vrot.slane %v2933_v11, 7  ;;  %v2417_v48 = vshrl.u32 %v4543_v51, 16  ;;  %v2420_v43 = vshll.u32 %v4543_v51, 16  ;;  %v6208_v55 = vpop.f32.mrb[28].mxu1  ;;  %v6210_v32 = vpop.f32.mrb[29].mxu0 }
 0x12e   : > { %4429 = vst.msk [vmem:[%s5270_s21 + $0x188] sm:$0xf] %vm1735_vm3, %v2957_v0  ;;  %v2378_v30 = vor.u32 %v2376_v25, %v2375_v54  ;;  %v2380_v49 = vrot.slane %v2375_v54, 4  ;;  %v6216_v4 = vpop.f32.mrb[29].mxu1  ;;  %v6218_v51 = vpop.f32.mrb[30].mxu0  ;;  %v2977_v56 = vshrl.u32 %v4607_v50, 16 }
 0x12f   : > { %v2938_v53 = vor.u32 %v2936_v41, %v2935_v60  ;;  %v2940_v24 = vrot.slane %v2935_v60, 4  ;;  %v6220_v17 = vrot.slane %v2417_v48, 7  ;;  %v6222_v25 = vpop.f32.mrb[30].mxu1  ;;  %v6224_v23 = vpop.f32.mrb[31].mxu0  ;;  %v2980_v61 = vshll.u32 %v4607_v50, 16  ;;  %1491 = vst.msk [vmem:[%s5825_s30 + $0x60] sm:$0xff] %vm1478_vm5, %v1016_v45 }
 0x130   : > { %7590 = vst [vmem:[#allocation5_spill] sm:$0xff] %v6222_v25  ;;  %7591 = vst [vmem:[#allocation6_spill] sm:$0xff] %v6224_v23  ;;  %v2379_v19 = vsel %vm5887_vm11, %v2371_v10, %v2378_v30  ;;  %v2388_v21 = vsel %vm5887_vm11, %v2380_v49, %v6080_v12  ;;  %v1619_v11 = vmax.f32 %v1016_v45, 0.0  ;;  %v6235_v34 = vpop.f32.mrb[31].mxu1  ;;  %v6254_v54 = vrot.slane %v2977_v56, 7 }
 0x131   : > { %1555 = vst.msk [vmem:[%s5825_s30 + $0x260] sm:$0xff] %vm1478_vm5, %v1272_v59  ;;  %7592 = vst [vmem:[#allocation7_spill] sm:$0xff] %v6235_v34  ;;  %v2939_v0 = vsel %vm5887_vm11, %v2931_v44, %v2938_v53  ;;  %v2948_v10 = vsel %vm5887_vm11, %v2940_v24, %v6125_v36  ;;  %v6247_v12 = vor.u32 %v2420_v43, %v6220_v17  ;;  %v1683_v60 = vmax.f32 %v1272_v59, 0.0  ;;  %v4437_v25 = vld [vmem:[%s5270_s21 + $0x1a0] sm:$0x1] }
 0x132   : > { %4315 = vst.msk [vmem:[%s5270_s21 + $0x40] sm:$0xf] %vm1735_vm3, %v2379_v19  ;;  %4316 = vst.msk [vmem:[%s5270_s21 + $0x44] sm:$0xf] %vm1735_vm3, %v2388_v21  ;;  %v4541_v41 = vpack.c.bf16 %v1619_v11, %v1619_v11  ;;  %v1027_v44 = vadd.f32 %v5987_v22, %v5820_v7  ;;  %v1283_v36 = vadd.f32 %v5993_v28, %v5820_v7 }
 0x133   : > { %4427 = vst.msk [vmem:[%s5270_s21 + $0x180] sm:$0xf] %vm1735_vm3, %v2939_v0  ;;  %4428 = vst.msk [vmem:[%s5270_s21 + $0x184] sm:$0xf] %vm1735_vm3, %v2948_v10  ;;  %v1019_v48 = vadd.f32 %v5820_v7, %v5995_v29  ;;  %v1275_v43 = vadd.f32 %v5820_v7, %v6005_v35  ;;  %v1040_v50 = vadd.f32 %v6031_v31, %v5820_v7  ;;  %v6272_v28 = vpop.f32.mrb[32].mxu0  ;;  %v6282_v53 = vpop.f32.mrb[32].mxu1 }
 0x134   : > { %v6267_v30 = vor.u32 %v2980_v61, %v6254_v54  ;;  %v2400_v22 = vshrl.u32 %v4541_v41, 16  ;;  %v2403_v45 = vshll.u32 %v4541_v41, 16  ;;  %1494 = vst.msk [vmem:[%s5825_s30 + $0x78] sm:$0xff] %vm1478_vm5, %v1027_v44  ;;  %7593 = vst [vmem:[#allocation8_spill] sm:$0xff] %v6272_v28  ;;  %v4605_v59 = vpack.c.bf16 %v1683_v60, %v1683_v60  ;;  %v6284_v24 = vpop.f32.mrb[33].mxu0  ;;  %v6292_v11 = vpop.f32.mrb[33].mxu1 }
 0x135   : > { %v1622_v29 = vmax.f32 %v1027_v44, 0.0  ;;  %1558 = vst.msk [vmem:[%s5825_s30 + $0x278] sm:$0xff] %vm1478_vm5, %v1283_v36  ;;  %v1686_v35 = vmax.f32 %v1283_v36, 0.0  ;;  %1492 = vst.msk [vmem:[%s5825_s30 + $0x68] sm:$0xff] %vm1478_vm5, %v1019_v48  ;;  %v1620_v31 = vmax.f32 %v1019_v48, 0.0  ;;  %v1684_v19 = vmax.f32 %v1275_v43, 0.0 }
 0x136   : > { %1556 = vst.msk [vmem:[%s5825_s30 + $0x268] sm:$0xff] %vm1478_vm5, %v1275_v43  ;;  %1497 = vst.msk [vmem:[%s5825_s30 + $0x90] sm:$0xff] %vm1478_vm5, %v1040_v50  ;;  %v6286_v56 = vrot.slane %v2400_v22, 7  ;;  %v1625_v21 = vmax.f32 %v1040_v50, 0.0  ;;  %v6290_v61 = vadd.f32 %v6039_v3, %v5820_v7  ;;  %v6294_v0 = vpop.f32.mrb[34].mxu0  ;;  %v2960_v41 = vshrl.u32 %v4605_v59, 16 }
 0x137   : > { %7594 = vst [vmem:[#allocation9_spill] sm:$0xff] %v6282_v53  ;;  %7595 = vst [vmem:[#allocation10_spill] sm:$0xff] %v6284_v24  ;;  %v4320_v10 = vld [vmem:[%s5270_s21 + $0x50] sm:$0xf]  ;;  %v2963_v60 = vshll.u32 %v4605_v59, 16  ;;  %v4544_v44 = vpack.c.bf16 %v1622_v29, %v1622_v29  ;;  %v4608_v36 = vpack.c.bf16 %v1686_v35, %v1686_v35  ;;  %v6297_v48 = vpop.f32.mrb[34].mxu1  ;;  %v4542_v50 = vpack.c.bf16 %v1620_v31, %v1620_v31 }
 0x138   : > { %7596 = vst [vmem:[#allocation11_spill] sm:$0xff] %v6292_v11  ;;  %7597 = vst [vmem:[#allocation12_spill] sm:$0xff] %v6294_v0  ;;  %v6299_v22 = vpop.f32.mrb[35].mxu0  ;;  %v2405_v43 = vor.u32 %v2403_v45, %v6286_v56  ;;  %v2406_v3 = vrot.slane %v6286_v56, 4  ;;  %v4606_v49 = vpack.c.bf16 %v1684_v19, %v1684_v19  ;;  %v6306_v37 = vpop.f32.mrb[35].mxu1  ;;  %v2962_v59 = vrot.slane %v2960_v41, 7 }
 0x139   : > { %7598 = vst [vmem:[#allocation13_spill] sm:$0xff] %v6297_v48  ;;  %7599 = vst [vmem:[#allocation14_spill] sm:$0xff] %v6299_v22  ;;  %v2426_v29 = vshrl.u32 %v4544_v44, 16  ;;  %v2429_v35 = vshll.u32 %v4544_v44, 16  ;;  %v2986_v0 = vshrl.u32 %v4608_v36, 16  ;;  %v2989_v11 = vshll.u32 %v4608_v36, 16 }
 0x13a   : > { %1561 = vst.msk [vmem:[%s5825_s30 + $0x290] sm:$0xff] %vm1478_vm5, %v6290_v61  ;;  %7600 = vst [vmem:[#allocation15_spill] sm:$0xff] %v6306_v37  ;;  %v3608_v22 = vsel %vm5858_vm9, %v2405_v43, %v4320_v10  ;;  %v4432_v48 = vld [vmem:[%s5270_s21 + $0x190] sm:$0xf]  ;;  %v2408_v45 = vshrl.u32 %v4542_v50, 16  ;;  %v2411_v24 = vshll.u32 %v4542_v50, 16  ;;  %v2965_v31 = vor.u32 %v2963_v60, %v2962_v59 }
 0x13b   : > { %4321 = vst [vmem:[%s5270_s21 + $0x50] sm:$0xf] %v3608_v22  ;;  %v2966_v56 = vrot.slane %v2962_v59, 4  ;;  %v2428_v19 = vrot.slane %v2426_v29, 7  ;;  %v2988_v53 = vrot.slane %v2986_v0, 7  ;;  %v2968_v41 = vshrl.u32 %v4606_v49, 16 }
 0x13c   : > { %v4325_v28 = vld [vmem:[%s5270_s21 + $0x60] sm:$0x1]  ;;  %v2410_v37 = vrot.slane %v2408_v45, 7  ;;  %v2971_v34 = vshll.u32 %v4606_v49, 16  ;;  %v4547_v44 = vpack.c.bf16 %v1625_v21, %v1625_v21  ;;  %v6313_v23 = vpop.f32.mrb[36].mxu0  ;;  %v3752_v10 = vsel %vm5858_vm9, %v2965_v31, %v4432_v48  ;;  %v6318_v60 = vpop.f32.mrb[36].mxu1 }
 0x13d   : > { %v2431_v36 = vor.u32 %v2429_v35, %v2428_v19  ;;  %v2433_v43 = vrot.slane %v2428_v19, 4  ;;  %v2991_v50 = vor.u32 %v2989_v11, %v2988_v53  ;;  %v6320_v22 = vpop.f32.mrb[37].mxu0  ;;  %4433 = vst [vmem:[%s5270_s21 + $0x190] sm:$0xf] %v3752_v10  ;;  %v2993_v0 = vrot.slane %v2988_v53, 4  ;;  %v6323_v29 = vpop.f32.mrb[37].mxu1 }
 0x13e   : > { %v2413_v49 = vor.u32 %v2411_v24, %v2410_v37  ;;  %v2415_v21 = vrot.slane %v2410_v37, 4  ;;  %v2970_v59 = vrot.slane %v2968_v41, 7  ;;  %v6325_v48 = vpop.f32.mrb[38].mxu0  ;;  %v7601_v11 = vrot.slane %v6220_v17, 4  ;;  %v6337_v31 = vpop.f32.mrb[38].mxu1 }
 0x13f   : > { %v3614_v45 = vsel %vm5871_vm10, %v2433_v43, %v4325_v28  ;;  %v7602_v53 = vrot.slane %v6254_v54, 4  ;;  %v2452_v24 = vshrl.u32 %v4547_v44, 16  ;;  %v6339_v19 = vpop.f32.mrb[39].mxu0  ;;  %v3758_v17 = vsel %vm5871_vm10, %v2993_v0, %v4437_v25  ;;  %v6353_v10 = vpop.f32.mrb[39].mxu1 }
 0x140   : > { %v2432_v35 = vsel %vm5887_vm11, %v7601_v11, %v2431_v36  ;;  %4326 = vst [vmem:[%s5270_s21 + $0x60] sm:$0x1] %v3614_v45  ;;  %v2414_v28 = vsel %vm5887_vm11, %v2406_v3, %v2413_v49  ;;  %v2423_v54 = vsel %vm5887_vm11, %v2415_v21, %v6247_v12  ;;  %v2973_v41 = vor.u32 %v2971_v34, %v2970_v59 }
 0x141   : > { %v2992_v37 = vsel %vm5887_vm11, %v7602_v53, %v2991_v50  ;;  %4324 = vst.msk [vmem:[%s5270_s21 + $0x5c] sm:$0xf] %vm1735_vm3, %v2432_v35  ;;  %4438 = vst [vmem:[%s5270_s21 + $0x1a0] sm:$0x1] %v3758_v17  ;;  %v2975_v36 = vrot.slane %v2970_v59, 4  ;;  %v6360_v25 = vrot.slane %v2452_v24, 7  ;;  %v1032_v12 = vadd.f32 %v5820_v7, %v6041_v6 }
 0x142   : > { %4436 = vst.msk [vmem:[%s5270_s21 + $0x19c] sm:$0xf] %vm1735_vm3, %v2992_v37  ;;  %4322 = vst.msk [vmem:[%s5270_s21 + $0x54] sm:$0xf] %vm1735_vm3, %v2414_v28  ;;  %v2455_v3 = vshll.u32 %v4547_v44, 16  ;;  %v1689_v43 = vmax.f32 %v6290_v61, 0.0  ;;  %v2974_v34 = vsel %vm5887_vm11, %v2966_v56, %v2973_v41  ;;  %v1288_v50 = vadd.f32 %v5820_v7, %v6045_v57 }
 0x143   : > { %4323 = vst.msk [vmem:[%s5270_s21 + $0x58] sm:$0xf] %vm1735_vm3, %v2423_v54  ;;  %v1043_v0 = vadd.f32 %v6047_v14, %v5820_v7  ;;  %v2983_v49 = vsel %vm5887_vm11, %v2975_v36, %v6267_v30  ;;  %4434 = vst.msk [vmem:[%s5270_s21 + $0x194] sm:$0xf] %vm1735_vm3, %v2974_v34  ;;  %v1623_v6 = vmax.f32 %v1032_v12, 0.0  ;;  %v1299_v30 = vadd.f32 %v6052_v20, %v5820_v7  ;;  %v6390_v21 = vpop.f32.mrb[40].mxu0 }
 0x144   : > { %v6377_v61 = vor.u32 %v2455_v3, %v6360_v25  ;;  %v4611_v44 = vpack.c.bf16 %v1689_v43, %v1689_v43  ;;  %4435 = vst.msk [vmem:[%s5270_s21 + $0x198] sm:$0xf] %vm1735_vm3, %v2983_v49  ;;  %v1687_v57 = vmax.f32 %v1288_v50, 0.0  ;;  %v1035_v35 = vadd.f32 %v5820_v7, %v6054_v1  ;;  %v6396_v53 = vpop.f32.mrb[40].mxu1  ;;  %v6398_v37 = vpop.f32.mrb[41].mxu0 }
 0x145   : > { %1495 = vst.msk [vmem:[%s5825_s30 + $0x80] sm:$0xff] %vm1478_vm5, %v1032_v12  ;;  %1559 = vst.msk [vmem:[%s5825_s30 + $0x280] sm:$0xff] %vm1478_vm5, %v1288_v50  ;;  %v1626_v14 = vmax.f32 %v1043_v0, 0.0  ;;  %v1291_v45 = vadd.f32 %v5820_v7, %v6056_v40  ;;  %v4545_v24 = vpack.c.bf16 %v1623_v6, %v1623_v6  ;;  %v1690_v20 = vmax.f32 %v1299_v30, 0.0  ;;  %v6402_v54 = vpop.f32.mrb[41].mxu1  ;;  %v6404_v41 = vpop.f32.mrb[42].mxu0 }
 0x146   : > { %1498 = vst.msk [vmem:[%s5825_s30 + $0x98] sm:$0xff] %vm1478_vm5, %v1043_v0  ;;  %v3012_v59 = vshrl.u32 %v4611_v44, 16  ;;  %v3015_v11 = vshll.u32 %v4611_v44, 16  ;;  %v4609_v17 = vpack.c.bf16 %v1687_v57, %v1687_v57  ;;  %1562 = vst.msk [vmem:[%s5825_s30 + $0x298] sm:$0xff] %vm1478_vm5, %v1299_v30  ;;  %v1624_v1 = vmax.f32 %v1035_v35, 0.0  ;;  %v6419_v43 = vpop.f32.mrb[42].mxu1 }
 0x147   : > { %v4548_v28 = vpack.c.bf16 %v1626_v14, %v1626_v14  ;;  %7603 = vst [vmem:[#allocation16_spill] sm:$0xff] %v6402_v54  ;;  %7604 = vst [vmem:[#allocation17_spill] sm:$0xff] %v6404_v41  ;;  %v1688_v7 = vmax.f32 %v1291_v45, 0.0  ;;  %v6415_v40 = vld [vmem:[%s7578_s2] ss:$0 sm:$0xff]  ;;  %v6421_v34 = vpop.f32.mrb[43].mxu0 }
 0x148   : > { %v6406_v36 = vrot.slane %v3012_v59, 7  ;;  %1496 = vst.msk [vmem:[%s5825_s30 + $0x88] sm:$0xff] %vm1478_vm5, %v1035_v35  ;;  %1560 = vst.msk [vmem:[%s5825_s30 + $0x288] sm:$0xff] %vm1478_vm5, %v1291_v45  ;;  %v1056_v3 = vadd.f32 %v6415_v40, %v6074_v9  ;;  %v2435_v12 = vshrl.u32 %v4545_v24, 16  ;;  %v2438_v50 = vshll.u32 %v4545_v24, 16  ;;  %v6423_v44 = vpop.f32.mrb[43].mxu1 }
 0x149   : > { %7605 = vst [vmem:[#allocation18_spill] sm:$0xff] %v6419_v43  ;;  %7606 = vst [vmem:[#allocation19_spill] sm:$0xff] %v6421_v34  ;;  %v2995_v0 = vshrl.u32 %v4609_v17, 16  ;;  %v2998_v49 = vshll.u32 %v4609_v17, 16  ;;  %v2461_v14 = vshrl.u32 %v4548_v28, 16  ;;  %v2464_v30 = vshll.u32 %v4548_v28, 16 }
 0x14a   : > { %7607 = vst [vmem:[#allocation20_spill] sm:$0xff] %v6423_v44  ;;  %v6426_v6 = vor.u32 %v3015_v11, %v6406_v36  ;;  %v3019_v57 = vrot.slane %v6406_v36, 4  ;;  %1501 = vst.msk [vmem:[%s5825_s30 + $0xb0] sm:$0xff] %vm1478_vm5, %v1056_v3  ;;  %v2437_v9 = vrot.slane %v2435_v12, 7  ;;  %v4612_v35 = vpack.c.bf16 %v1690_v20, %v1690_v20  ;;  %v4327_v24 = vld [vmem:[%s5270_s21 + $0x64] sm:$0xf] }
 0x14b   : > { %v6431_v59 = vrot.slane %v2995_v0, 7  ;;  %v4546_v45 = vpack.c.bf16 %v1624_v1, %v1624_v1  ;;  %v4439_v17 = vld [vmem:[%s5270_s21 + $0x1a4] sm:$0xf]  ;;  %v2463_v56 = vrot.slane %v2461_v14, 7  ;;  %v4610_v44 = vpack.c.bf16 %v1688_v7, %v1688_v7  ;;  %v4332_v12 = vld [vmem:[%s5270_s21 + $0x74] sm:$0x1] }
 0x14c   : > { %v1629_v34 = vmax.f32 %v1056_v3, 0.0  ;;  %v1312_v11 = vadd.f32 %v6415_v40, %v6083_v63  ;;  %v2440_v36 = vor.u32 %v2438_v50, %v2437_v9  ;;  %v2441_v43 = vrot.slane %v2437_v9, 4  ;;  %v6440_v20 = vpop.f32.mrb[44].mxu0  ;;  %v6444_v7 = vpop.f32.mrb[44].mxu1 }
 0x14d   : > { %v3000_v28 = vor.u32 %v2998_v49, %v6431_v59  ;;  %v3001_v41 = vrot.slane %v6431_v59, 4  ;;  %v2466_v1 = vor.u32 %v2464_v30, %v2463_v56  ;;  %v2468_v0 = vrot.slane %v2463_v56, 4  ;;  %7608 = vst [vmem:[#allocation21_spill] sm:$0xff] %v6444_v7  ;;  %v6446_v63 = vpop.f32.mrb[45].mxu0  ;;  %v6452_v56 = vpop.f32.mrb[45].mxu1 }
 0x14e   : > { %v3021_v54 = vshrl.u32 %v4612_v35, 16  ;;  %v3024_v14 = vshll.u32 %v4612_v35, 16  ;;  %1565 = vst.msk [vmem:[%s5825_s30 + $0x2b0] sm:$0xff] %vm1478_vm5, %v1312_v11  ;;  %7609 = vst [vmem:[#allocation22_spill] sm:$0xff] %v6446_v63  ;;  %v3617_v3 = vsel %vm5858_vm9, %v2440_v36, %v4327_v24  ;;  %v2443_v49 = vshrl.u32 %v4546_v45, 16  ;;  %v6454_v9 = vpop.f32.mrb[46].mxu0 }
 0x14f   : > { %v3761_v50 = vsel %vm5858_vm9, %v3000_v28, %v4439_v17  ;;  %v2446_v30 = vshll.u32 %v4546_v45, 16  ;;  %4328 = vst [vmem:[%s5270_s21 + $0x64] sm:$0xf] %v3617_v3  ;;  %v7610_v59 = vrot.slane %v6360_v25, 4  ;;  %v3623_v24 = vsel %vm5871_vm10, %v2468_v0, %v4332_v12  ;;  %v6464_v7 = vpop.f32.mrb[46].mxu1  ;;  %v6466_v17 = vpop.f32.mrb[47].mxu0 }
 0x150   : > { %4440 = vst [vmem:[%s5270_s21 + $0x1a4] sm:$0xf] %v3761_v50  ;;  %v3023_v36 = vrot.slane %v3021_v54, 7  ;;  %v3003_v63 = vshrl.u32 %v4610_v44, 16  ;;  %7611 = vst [vmem:[#allocation23_spill] sm:$0xff] %v6466_v17  ;;  %v2445_v28 = vrot.slane %v2443_v49, 7  ;;  %v4551_v25 = vpack.c.bf16 %v1629_v34, %v1629_v34 }
 0x151   : > { %v2467_v35 = vsel %vm5887_vm11, %v7610_v59, %v2466_v1  ;;  %4333 = vst [vmem:[%s5270_s21 + $0x74] sm:$0x1] %v3623_v24  ;;  %v4444_v45 = vld [vmem:[%s5270_s21 + $0x1b4] sm:$0x1]  ;;  %v3006_v3 = vshll.u32 %v4610_v44, 16  ;;  %v1693_v50 = vmax.f32 %v1312_v11, 0.0  ;;  %v1048_v59 = vadd.f32 %v6415_v40, %v6085_v13 }
 0x152   : > { %4331 = vst.msk [vmem:[%s5270_s21 + $0x70] sm:$0xf] %vm1735_vm3, %v2467_v35  ;;  %v6472_v1 = vpop.f32.mrb[47].mxu1  ;;  %v3026_v12 = vor.u32 %v3024_v14, %v3023_v36  ;;  %v3028_v54 = vrot.slane %v3023_v36, 4  ;;  %v3005_v0 = vrot.slane %v3003_v63, 7  ;;  %v2448_v17 = vor.u32 %v2446_v30, %v2445_v28 }
 0x153   : > { %7612 = vst [vmem:[#allocation24_spill] sm:$0xff] %v6472_v1  ;;  %v2450_v35 = vrot.slane %v2445_v28, 4  ;;  %v2487_v24 = vshrl.u32 %v4551_v25, 16  ;;  %v2490_v49 = vshll.u32 %v4551_v25, 16  ;;  %1499 = vst.msk [vmem:[%s5825_s30 + $0xa0] sm:$0xff] %vm1478_vm5, %v1048_v59  ;;  %v4615_v63 = vpack.c.bf16 %v1693_v50, %v1693_v50  ;;  %v6492_v30 = vpop.f32.mrb[48].mxu0 }
 0x154   : > { %v3027_v34 = vsel %vm5887_vm11, %v3019_v57, %v3026_v12  ;;  %v3767_v44 = vsel %vm5871_vm10, %v3028_v54, %v4444_v45  ;;  %v3008_v11 = vor.u32 %v3006_v3, %v3005_v0  ;;  %v3010_v1 = vrot.slane %v3005_v0, 4  ;;  %v6505_v45 = vpop.f32.mrb[48].mxu1  ;;  %v6507_v28 = vpop.f32.mrb[49].mxu0 }
 0x155   : > { %4443 = vst.msk [vmem:[%s5270_s21 + $0x1b0] sm:$0xf] %vm1735_vm3, %v3027_v34  ;;  %4445 = vst [vmem:[%s5270_s21 + $0x1b4] sm:$0x1] %v3767_v44  ;;  %v2449_v13 = vsel %vm5887_vm11, %v2441_v43, %v2448_v17  ;;  %v2458_v14 = vsel %vm5887_vm11, %v2450_v35, %v6377_v61  ;;  %v6490_v57 = vrot.slane %v2487_v24, 7  ;;  %v1627_v17 = vmax.f32 %v1048_v59, 0.0 }
 0x156   : > { %4329 = vst.msk [vmem:[%s5270_s21 + $0x68] sm:$0xf] %vm1735_vm3, %v2449_v13  ;;  %4330 = vst.msk [vmem:[%s5270_s21 + $0x6c] sm:$0xf] %vm1735_vm3, %v2458_v14  ;;  %v3009_v36 = vsel %vm5887_vm11, %v3001_v41, %v3008_v11  ;;  %v3018_v43 = vsel %vm5887_vm11, %v3010_v1, %v6426_v6  ;;  %v1304_v61 = vadd.f32 %v6415_v40, %v6097_v26  ;;  %v3047_v25 = vshrl.u32 %v4615_v63, 16  ;;  %v6517_v50 = vpop.f32.mrb[49].mxu1 }
 0x157   : > { %7613 = vst [vmem:[#allocation25_spill] sm:$0xff] %v6507_v28  ;;  %4441 = vst.msk [vmem:[%s5270_s21 + $0x1a8] sm:$0xf] %vm1735_vm3, %v3009_v36  ;;  %v6514_v3 = vor.u32 %v2490_v49, %v6490_v57  ;;  %v3050_v6 = vshll.u32 %v4615_v63, 16  ;;  %v6519_v26 = vpop.f32.mrb[50].mxu0  ;;  %v4549_v1 = vpack.c.bf16 %v1627_v17, %v1627_v17  ;;  %v1059_v54 = vadd.f32 %v6415_v40, %v6099_v27 }
 0x158   : > { %4442 = vst.msk [vmem:[%s5270_s21 + $0x1ac] sm:$0xf] %vm1735_vm3, %v3018_v43  ;;  %7614 = vst [vmem:[#allocation26_spill] sm:$0xff] %v6517_v50  ;;  %v1691_v12 = vmax.f32 %v1304_v61, 0.0  ;;  %v1315_v0 = vadd.f32 %v6415_v40, %v6116_v33  ;;  %v6527_v59 = vrot.slane %v3047_v25, 7  ;;  %v1051_v35 = vadd.f32 %v6415_v40, %v6118_v39  ;;  %v6539_v33 = vpop.f32.mrb[50].mxu1 }
 0x159   : > { %7615 = vst [vmem:[#allocation27_spill] sm:$0xff] %v6519_v26  ;;  %1563 = vst.msk [vmem:[%s5825_s30 + $0x2a0] sm:$0xff] %vm1478_vm5, %v1304_v61  ;;  %v1307_v24 = vadd.f32 %v6415_v40, %v6130_v38  ;;  %v1072_v49 = vadd.f32 %v6415_v40, %v6155_v58  ;;  %v2470_v34 = vshrl.u32 %v4549_v1, 16  ;;  %v2473_v44 = vshll.u32 %v4549_v1, 16  ;;  %v6551_v14 = vpop.f32.mrb[51].mxu0  ;;  %v6553_v63 = vpop.f32.mrb[51].mxu1 }
 0x15a   : > { %v4613_v27 = vpack.c.bf16 %v1691_v12, %v1691_v12  ;;  %1502 = vst.msk [vmem:[%s5825_s30 + $0xb8] sm:$0xff] %vm1478_vm5, %v1059_v54  ;;  %v1630_v11 = vmax.f32 %v1059_v54, 0.0  ;;  %1566 = vst.msk [vmem:[%s5825_s30 + $0x2b8] sm:$0xff] %vm1478_vm5, %v1315_v0  ;;  %v6542_v39 = vor.u32 %v3050_v6, %v6527_v59  ;;  %v3054_v13 = vrot.slane %v6527_v59, 4  ;;  %v4334_v25 = vld [vmem:[%s5270_s21 + $0x78] sm:$0xf] }
 0x15b   : > { %7616 = vst [vmem:[#allocation28_spill] sm:$0xff] %v6539_v33  ;;  %v1694_v38 = vmax.f32 %v1315_v0, 0.0  ;;  %1500 = vst.msk [vmem:[%s5825_s30 + $0xa8] sm:$0xff] %vm1478_vm5, %v1051_v35  ;;  %v1628_v58 = vmax.f32 %v1051_v35, 0.0  ;;  %v2472_v36 = vrot.slane %v2470_v34, 7  ;;  %v1692_v12 = vmax.f32 %v1307_v24, 0.0 }
 0x15c   : > { %1564 = vst.msk [vmem:[%s5825_s30 + $0x2a8] sm:$0xff] %vm1478_vm5, %v1307_v24  ;;  %1505 = vst.msk [vmem:[%s5825_s30 + $0xd0] sm:$0xff] %vm1478_vm5, %v1072_v49  ;;  %v3030_v43 = vshrl.u32 %v4613_v27, 16  ;;  %v3033_v17 = vshll.u32 %v4613_v27, 16  ;;  %v4552_v61 = vpack.c.bf16 %v1630_v11, %v1630_v11  ;;  %v1633_v54 = vmax.f32 %v1072_v49, 0.0  ;;  %v6570_v28 = vpop.f32.mrb[52].mxu1 }
 0x15d   : > { %7617 = vst [vmem:[#allocation29_spill] sm:$0xff] %v6551_v14  ;;  %7618 = vst [vmem:[#allocation30_spill] sm:$0xff] %v6553_v63  ;;  %v4616_v6 = vpack.c.bf16 %v1694_v38, %v1694_v38  ;;  %v4550_v1 = vpack.c.bf16 %v1628_v58, %v1628_v58  ;;  %v2475_v0 = vor.u32 %v2473_v44, %v2472_v36  ;;  %v2476_v59 = vrot.slane %v2472_v36, 4  ;;  %v4446_v33 = vld [vmem:[%s5270_s21 + $0x1b8] sm:$0xf] }
 0x15e   : > { %v6556_v35 = vrot.slane %v3030_v43, 7  ;;  %v2496_v41 = vshrl.u32 %v4552_v61, 16  ;;  %v2499_v14 = vshll.u32 %v4552_v61, 16  ;;  %v4339_v44 = vld [vmem:[%s5270_s21 + $0x88] sm:$0x1]  ;;  %v4614_v43 = vpack.c.bf16 %v1692_v12, %v1692_v12 }
 0x15f   : > { %v3056_v26 = vshrl.u32 %v4616_v6, 16  ;;  %v3059_v34 = vshll.u32 %v4616_v6, 16  ;;  %v2478_v63 = vshrl.u32 %v4550_v1, 16  ;;  %v3626_v27 = vsel %vm5858_vm9, %v2475_v0, %v4334_v25  ;;  %v4451_v25 = vld [vmem:[%s5270_s21 + $0x1c8] sm:$0x1] }
 0x160   : > { %v3035_v11 = vor.u32 %v3033_v17, %v6556_v35  ;;  %v3036_v24 = vrot.slane %v6556_v35, 4  ;;  %v2498_v49 = vrot.slane %v2496_v41, 7  ;;  %4335 = vst [vmem:[%s5270_s21 + $0x78] sm:$0xf] %v3626_v27  ;;  %v2481_v36 = vshll.u32 %v4550_v1, 16  ;;  %v6568_v17 = vpop.f32.mrb[52].mxu0 }
 0x161   : > { %v3058_v38 = vrot.slane %v3056_v26, 7  ;;  %v2480_v58 = vrot.slane %v2478_v63, 7  ;;  %v4555_v0 = vpack.c.bf16 %v1633_v54, %v1633_v54  ;;  %v3038_v54 = vshrl.u32 %v4614_v43, 16 }
 0x162   : > { %v3770_v61 = vsel %vm5858_vm9, %v3035_v11, %v4446_v33  ;;  %v2501_v6 = vor.u32 %v2499_v14, %v2498_v49  ;;  %v2503_v50 = vrot.slane %v2498_v49, 4  ;;  %v7619_v33 = vrot.slane %v6490_v57, 4  ;;  %v6591_v49 = vpop.f32.mrb[53].mxu0 }
 0x163   : > { %4447 = vst [vmem:[%s5270_s21 + $0x1b8] sm:$0xf] %v3770_v61  ;;  %v3061_v41 = vor.u32 %v3059_v34, %v3058_v38  ;;  %v3063_v26 = vrot.slane %v3058_v38, 4  ;;  %v2483_v63 = vor.u32 %v2481_v36, %v2480_v58  ;;  %v2485_v1 = vrot.slane %v2480_v58, 4 }
 0x164   : > { %v2502_v14 = vsel %vm5887_vm11, %v7619_v33, %v2501_v6  ;;  %v3632_v12 = vsel %vm5871_vm10, %v2503_v50, %v4339_v44  ;;  %v3041_v35 = vshll.u32 %v4614_v43, 16  ;;  %v3040_v50 = vrot.slane %v3038_v54, 7  ;;  %v6610_v43 = vpop.f32.mrb[53].mxu1 }
 0x165   : > { %4338 = vst.msk [vmem:[%s5270_s21 + $0x84] sm:$0xf] %vm1735_vm3, %v2502_v14  ;;  %4340 = vst [vmem:[%s5270_s21 + $0x88] sm:$0x1] %v3632_v12  ;;  %v3062_v34 = vsel %vm5887_vm11, %v3054_v13, %v3061_v41  ;;  %v3776_v27 = vsel %vm5871_vm10, %v3063_v26, %v4451_v25  ;;  %v2484_v57 = vsel %vm5887_vm11, %v2476_v59, %v2483_v63  ;;  %v2522_v13 = vshrl.u32 %v4555_v0, 16  ;;  %v6635_v33 = vpop.f32.mrb[54].mxu1 }
 0x166   : > { %v2493_v11 = vsel %vm5887_vm11, %v2485_v1, %v6514_v3  ;;  %4450 = vst.msk [vmem:[%s5270_s21 + $0x1c4] sm:$0xf] %vm1735_vm3, %v3062_v34  ;;  %4452 = vst [vmem:[%s5270_s21 + $0x1c8] sm:$0x1] %v3776_v27  ;;  %v2525_v44 = vshll.u32 %v4555_v0, 16  ;;  %v1328_v59 = vadd.f32 %v6415_v40, %v6157_v15  ;;  %v1064_v3 = vadd.f32 %v6415_v40, %v6159_v16  ;;  %v6633_v1 = vpop.f32.mrb[54].mxu0 }
 0x167   : > { %4336 = vst.msk [vmem:[%s5270_s21 + $0x7c] sm:$0xf] %vm1735_vm3, %v2484_v57  ;;  %4337 = vst.msk [vmem:[%s5270_s21 + $0x80] sm:$0xf] %vm1735_vm3, %v2493_v11  ;;  %v1320_v38 = vadd.f32 %v6415_v40, %v6165_v18  ;;  %v1075_v58 = vadd.f32 %v6415_v40, %v6167_v2  ;;  %v1331_v36 = vadd.f32 %v6415_v40, %v6172_v46  ;;  %v3045_v6 = vrot.slane %v3040_v50, 4 }
 0x168   : > { %v3043_v61 = vor.u32 %v3041_v35, %v3040_v50  ;;  %v6612_v25 = vrot.slane %v2522_v13, 7  ;;  %1569 = vst.msk [vmem:[%s5825_s30 + $0x2d0] sm:$0xff] %vm1478_vm5, %v1328_v59  ;;  %v1697_v15 = vmax.f32 %v1328_v59, 0.0  ;;  %1503 = vst.msk [vmem:[%s5825_s30 + $0xc0] sm:$0xff] %vm1478_vm5, %v1064_v3  ;;  %v1631_v16 = vmax.f32 %v1064_v3, 0.0 }
 0x169   : > { %1567 = vst.msk [vmem:[%s5825_s30 + $0x2c0] sm:$0xff] %vm1478_vm5, %v1320_v38  ;;  %v1695_v18 = vmax.f32 %v1320_v38, 0.0  ;;  %1506 = vst.msk [vmem:[%s5825_s30 + $0xd8] sm:$0xff] %vm1478_vm5, %v1075_v58  ;;  %v1634_v2 = vmax.f32 %v1075_v58, 0.0  ;;  %v1698_v46 = vmax.f32 %v1331_v36, 0.0  ;;  %v3053_v41 = vsel %vm5887_vm11, %v3045_v6, %v6542_v39 }
 0x16a   : > { %1570 = vst.msk [vmem:[%s5825_s30 + $0x2d8] sm:$0xff] %vm1478_vm5, %v1331_v36  ;;  %v3044_v0 = vsel %vm5887_vm11, %v3036_v24, %v3043_v61  ;;  %v6630_v26 = vor.u32 %v2525_v44, %v6612_v25  ;;  %v2529_v63 = vrot.slane %v6612_v25, 4  ;;  %v4619_v14 = vpack.c.bf16 %v1697_v15, %v1697_v15  ;;  %v6647_v44 = vpop.f32.mrb[55].mxu0  ;;  %v4341_v6 = vld [vmem:[%s5270_s21 + $0x8c] sm:$0xf] }
 0x16b   : > { %4448 = vst.msk [vmem:[%s5270_s21 + $0x1bc] sm:$0xf] %vm1735_vm3, %v3044_v0  ;;  %4449 = vst.msk [vmem:[%s5270_s21 + $0x1c0] sm:$0xf] %vm1735_vm3, %v3053_v41  ;;  %v4553_v12 = vpack.c.bf16 %v1631_v16, %v1631_v16  ;;  %v4617_v24 = vpack.c.bf16 %v1695_v18, %v1695_v18  ;;  %v4556_v54 = vpack.c.bf16 %v1634_v2, %v1634_v2 }
 0x16c   : > { %v4620_v39 = vpack.c.bf16 %v1698_v46, %v1698_v46  ;;  %v1067_v35 = vadd.f32 %v6415_v40, %v6174_v47  ;;  %v1323_v34 = vadd.f32 %v6415_v40, %v6179_v8  ;;  %v1088_v27 = vadd.f32 %v6415_v40, %v6203_v42  ;;  %v6655_v47 = vpop.f32.mrb[55].mxu1 }
 0x16d   : > { %v3082_v57 = vshrl.u32 %v4619_v14, 16  ;;  %v3085_v11 = vshll.u32 %v4619_v14, 16  ;;  %v2505_v50 = vshrl.u32 %v4553_v12, 16  ;;  %v2508_v13 = vshll.u32 %v4553_v12, 16  ;;  %v4453_v14 = vld [vmem:[%s5270_s21 + $0x1cc] sm:$0xf] }
 0x16e   : > { %v3065_v59 = vshrl.u32 %v4617_v24, 16  ;;  %v3068_v3 = vshll.u32 %v4617_v24, 16  ;;  %v2531_v38 = vshrl.u32 %v4556_v54, 16  ;;  %v2534_v58 = vshll.u32 %v4556_v54, 16  ;;  %1504 = vst.msk [vmem:[%s5825_s30 + $0xc8] sm:$0xff] %vm1478_vm5, %v1067_v35  ;;  %1568 = vst.msk [vmem:[%s5825_s30 + $0x2c8] sm:$0xff] %vm1478_vm5, %v1323_v34 }
 0x16f   : > { %1509 = vst.msk [vmem:[%s5825_s30 + $0xf0] sm:$0xff] %vm1478_vm5, %v1088_v27  ;;  %v3084_v8 = vrot.slane %v3082_v57, 7  ;;  %v6657_v42 = vrot.slane %v2505_v50, 7  ;;  %v3091_v36 = vshrl.u32 %v4620_v39, 16  ;;  %v3094_v61 = vshll.u32 %v4620_v39, 16 }
 0x170   : > { %v6660_v25 = vrot.slane %v3065_v59, 7  ;;  %v2533_v15 = vrot.slane %v2531_v38, 7  ;;  %v1632_v16 = vmax.f32 %v1067_v35, 0.0  ;;  %v1696_v18 = vmax.f32 %v1323_v34, 0.0  ;;  %v4346_v12 = vld [vmem:[%s5270_s21 + $0x9c] sm:$0x1] }
 0x171   : > { %v6662_v2 = vor.u32 %v3085_v11, %v3084_v8  ;;  %v3089_v46 = vrot.slane %v3084_v8, 4  ;;  %v2510_v0 = vor.u32 %v2508_v13, %v6657_v42  ;;  %v2511_v41 = vrot.slane %v6657_v42, 4  ;;  %v4458_v38 = vld [vmem:[%s5270_s21 + $0x1dc] sm:$0x1] }
 0x172   : > { %v3070_v24 = vor.u32 %v3068_v3, %v6660_v25  ;;  %v3071_v54 = vrot.slane %v6660_v25, 4  ;;  %v2536_v39 = vor.u32 %v2534_v58, %v2533_v15  ;;  %v2538_v35 = vrot.slane %v2533_v15, 4 }
 0x173   : > { %v3635_v34 = vsel %vm5858_vm9, %v2510_v0, %v4341_v6  ;;  %v3093_v57 = vrot.slane %v3091_v36, 7  ;;  %v4554_v11 = vpack.c.bf16 %v1632_v16, %v1632_v16  ;;  %v4618_v50 = vpack.c.bf16 %v1696_v18, %v1696_v18 }
 0x174   : > { %4342 = vst [vmem:[%s5270_s21 + $0x8c] sm:$0xf] %v3635_v34  ;;  %v3779_v13 = vsel %vm5858_vm9, %v3070_v24, %v4453_v14  ;;  %v2537_v59 = vsel %vm5887_vm11, %v2529_v63, %v2536_v39  ;;  %v3641_v3 = vsel %vm5871_vm10, %v2538_v35, %v4346_v12  ;;  %v1637_v8 = vmax.f32 %v1088_v27, 0.0  ;;  %v6701_v34 = vpop.f32.mrb[56].mxu0 }
 0x175   : > { %4454 = vst [vmem:[%s5270_s21 + $0x1cc] sm:$0xf] %v3779_v13  ;;  %4345 = vst.msk [vmem:[%s5270_s21 + $0x98] sm:$0xf] %vm1735_vm3, %v2537_v59  ;;  %v3096_v58 = vor.u32 %v3094_v61, %v3093_v57  ;;  %v3098_v42 = vrot.slane %v3093_v57, 4  ;;  %v2513_v36 = vshrl.u32 %v4554_v11, 16  ;;  %v1344_v16 = vadd.f32 %v6415_v40, %v6208_v55 }
 0x176   : > { %4347 = vst [vmem:[%s5270_s21 + $0x9c] sm:$0x1] %v3641_v3  ;;  %v2516_v6 = vshll.u32 %v4554_v11, 16  ;;  %v3073_v25 = vshrl.u32 %v4618_v50, 16  ;;  %v3076_v15 = vshll.u32 %v4618_v50, 16  ;;  %v4559_v63 = vpack.c.bf16 %v1637_v8, %v1637_v8  ;;  %v6703_v57 = vpop.f32.mrb[56].mxu1 }
 0x177   : > { %v3097_v27 = vsel %vm5887_vm11, %v3089_v46, %v3096_v58  ;;  %v3785_v18 = vsel %vm5871_vm10, %v3098_v42, %v4458_v38  ;;  %v2515_v0 = vrot.slane %v2513_v36, 7  ;;  %v1080_v61 = vadd.f32 %v6415_v40, %v6210_v32  ;;  %1573 = vst.msk [vmem:[%s5825_s30 + $0x2f0] sm:$0xff] %vm1478_vm5, %v1344_v16  ;;  %v6707_v3 = vpop.f32.mrb[57].mxu0  ;;  %v6709_v38 = vpop.f32.mrb[57].mxu1 }
 0x178   : > { %4457 = vst.msk [vmem:[%s5270_s21 + $0x1d8] sm:$0xf] %vm1735_vm3, %v3097_v27  ;;  %4459 = vst [vmem:[%s5270_s21 + $0x1dc] sm:$0x1] %v3785_v18  ;;  %v3075_v14 = vrot.slane %v3073_v25, 7  ;;  %v2557_v12 = vshrl.u32 %v4559_v63, 16  ;;  %v1336_v32 = vadd.f32 %v6415_v40, %v6216_v4  ;;  %v1091_v18 = vadd.f32 %v6415_v40, %v6218_v51 }
 0x179   : > { %v2560_v24 = vshll.u32 %v4559_v63, 16  ;;  %v1701_v39 = vmax.f32 %v1344_v16, 0.0  ;;  %v2518_v55 = vor.u32 %v2516_v6, %v2515_v0  ;;  %v2520_v35 = vrot.slane %v2515_v0, 4  ;;  %1507 = vst.msk [vmem:[%s5825_s30 + $0xe0] sm:$0xff] %vm1478_vm5, %v1080_v61  ;;  %7620 = vst [vmem:[#allocation31_spill] sm:$0xff] %v6709_v38  ;;  %v6731_v25 = vpop.f32.mrb[58].mxu0 }
 0x17a   : > { %v1635_v46 = vmax.f32 %v1080_v61, 0.0  ;;  %v3078_v11 = vor.u32 %v3076_v15, %v3075_v14  ;;  %v3080_v50 = vrot.slane %v3075_v14, 4  ;;  %v6705_v13 = vrot.slane %v2557_v12, 7  ;;  %1571 = vst.msk [vmem:[%s5825_s30 + $0x2e0] sm:$0xff] %vm1478_vm5, %v1336_v32  ;;  %7621 = vst [vmem:[#allocation32_spill] sm:$0xff] %v6731_v25  ;;  %v6733_v15 = vpop.f32.mrb[58].mxu1 }
 0x17b   : > { %v4623_v59 = vpack.c.bf16 %v1701_v39, %v1701_v39  ;;  %v2519_v8 = vsel %vm5887_vm11, %v2511_v41, %v2518_v55  ;;  %v2528_v4 = vsel %vm5887_vm11, %v2520_v35, %v6630_v26  ;;  %v1699_v42 = vmax.f32 %v1336_v32, 0.0  ;;  %7622 = vst [vmem:[#allocation33_spill] sm:$0xff] %v6733_v15  ;;  %v7623_v0 = vld [vmem:[#allocation5_spill] sm:$0xff]  ;;  %v7624_v14 = vld [vmem:[#allocation6_spill] sm:$0xff]  ;;  %v7625_v55 = vld [vmem:[#allocation7_spill] sm:$0xff] }
 0x17c   : > { %v4557_v58 = vpack.c.bf16 %v1635_v46, %v1635_v46  ;;  %4343 = vst.msk [vmem:[%s5270_s21 + $0x90] sm:$0xf] %vm1735_vm3, %v2519_v8  ;;  %4344 = vst.msk [vmem:[%s5270_s21 + $0x94] sm:$0xf] %vm1735_vm3, %v2528_v4  ;;  %v3079_v36 = vsel %vm5887_vm11, %v3071_v54, %v3078_v11  ;;  %v3088_v6 = vsel %vm5887_vm11, %v3080_v50, %v6662_v2  ;;  %v7626_v46 = vld [vmem:[#allocation8_spill] sm:$0xff] }
 0x17d   : > { %v6728_v41 = vor.u32 %v2560_v24, %v6705_v13  ;;  %4455 = vst.msk [vmem:[%s5270_s21 + $0x1d0] sm:$0xf] %vm1735_vm3, %v3079_v36  ;;  %4456 = vst.msk [vmem:[%s5270_s21 + $0x1d4] sm:$0xf] %vm1735_vm3, %v3088_v6  ;;  %v3117_v54 = vshrl.u32 %v4623_v59, 16  ;;  %v3120_v63 = vshll.u32 %v4623_v59, 16  ;;  %v4621_v27 = vpack.c.bf16 %v1699_v42, %v1699_v42 }
 0x17e   : > { %v2540_v16 = vshrl.u32 %v4557_v58, 16  ;;  %v2543_v2 = vshll.u32 %v4557_v58, 16  ;;  %v1347_v61 = vadd.f32 %v6415_v40, %v7623_v0  ;;  %v1083_v12 = vadd.f32 %v6415_v40, %v7624_v14  ;;  %v4348_v11 = vld [vmem:[%s5270_s21 + $0xa0] sm:$0xf]  ;;  %1510 = vst.msk [vmem:[%s5825_s30 + $0xf8] sm:$0xff] %vm1478_vm5, %v1091_v18  ;;  %v6770_v6 = vpop.f32.mrb[59].mxu0 }
 0x17f   : > { %v6745_v24 = vrot.slane %v3117_v54, 7  ;;  %v1339_v35 = vadd.f32 %v6415_v40, %v7625_v55  ;;  %v1104_v32 = vadd.f32 %v6415_v40, %v7626_v46  ;;  %v3100_v51 = vshrl.u32 %v4621_v27, 16  ;;  %7627 = vst [vmem:[#allocation5_spill] sm:$0xff] %v6770_v6  ;;  %v6772_v54 = vpop.f32.mrb[59].mxu1 }
 0x180   : > { %v6747_v39 = vrot.slane %v2540_v16, 7  ;;  %v3103_v50 = vshll.u32 %v4621_v27, 16  ;;  %v1638_v59 = vmax.f32 %v1091_v18, 0.0  ;;  %1574 = vst.msk [vmem:[%s5825_s30 + $0x2f8] sm:$0xff] %vm1478_vm5, %v1347_v61  ;;  %v1702_v8 = vmax.f32 %v1347_v61, 0.0  ;;  %1508 = vst.msk [vmem:[%s5825_s30 + $0xe8] sm:$0xff] %vm1478_vm5, %v1083_v12 }
 0x181   : > { %v6761_v4 = vor.u32 %v3120_v63, %v6745_v24  ;;  %v3124_v58 = vrot.slane %v6745_v24, 4  ;;  %1572 = vst.msk [vmem:[%s5825_s30 + $0x2e8] sm:$0xff] %vm1478_vm5, %v1339_v35  ;;  %1513 = vst.msk [vmem:[%s5825_s30 + $0x110] sm:$0xff] %vm1478_vm5, %v1104_v32  ;;  %v6774_v16 = vrot.slane %v3100_v51, 7  ;;  %v1636_v18 = vmax.f32 %v1083_v12, 0.0  ;;  %v7629_v24 = vld [vmem:[#allocation9_spill] sm:$0xff] }
 0x182   : > { %v2545_v42 = vor.u32 %v2543_v2, %v6747_v39  ;;  %7628 = vst [vmem:[#allocation6_spill] sm:$0xff] %v6772_v54  ;;  %v4560_v27 = vpack.c.bf16 %v1638_v59, %v1638_v59  ;;  %v4624_v63 = vpack.c.bf16 %v1702_v8, %v1702_v8  ;;  %v4460_v2 = vld [vmem:[%s5270_s21 + $0x1e0] sm:$0xf]  ;;  %v1700_v61 = vmax.f32 %v1339_v35, 0.0 }
 0x183   : > { %v1641_v14 = vmax.f32 %v1104_v32, 0.0  ;;  %v1360_v55 = vadd.f32 %v6415_v40, %v7629_v24  ;;  %v3105_v46 = vor.u32 %v3103_v50, %v6774_v16  ;;  %v3106_v51 = vrot.slane %v6774_v16, 4 }
 0x184   : > { %v3644_v0 = vsel %vm5858_vm9, %v2545_v42, %v4348_v11  ;;  %v2566_v59 = vshrl.u32 %v4560_v27, 16  ;;  %v2569_v8 = vshll.u32 %v4560_v27, 16  ;;  %v3126_v36 = vshrl.u32 %v4624_v63, 16 }
 0x185   : > { %4349 = vst [vmem:[%s5270_s21 + $0xa0] sm:$0xf] %v3644_v0  ;;  %v3129_v12 = vshll.u32 %v4624_v63, 16  ;;  %v4558_v26 = vpack.c.bf16 %v1636_v18, %v1636_v18  ;;  %v4622_v11 = vpack.c.bf16 %v1700_v61, %v1700_v61  ;;  %1577 = vst.msk [vmem:[%s5825_s30 + $0x310] sm:$0xff] %vm1478_vm5, %v1360_v55  ;;  %v3788_v35 = vsel %vm5858_vm9, %v3105_v46, %v4460_v2  ;;  %v4353_v0 = vld [vmem:[%s5270_s21 + $0xb0] sm:$0x1] }
 0x186   : > { %v2568_v32 = vrot.slane %v2566_v59, 7  ;;  %v4563_v42 = vpack.c.bf16 %v1641_v14, %v1641_v14  ;;  %v1705_v24 = vmax.f32 %v1360_v55, 0.0  ;;  %4461 = vst [vmem:[%s5270_s21 + $0x1e0] sm:$0xf] %v3788_v35  ;;  %v3128_v50 = vrot.slane %v3126_v36, 7 }
 0x187   : > { %v2548_v54 = vshrl.u32 %v4558_v26, 16  ;;  %v2551_v16 = vshll.u32 %v4558_v26, 16  ;;  %v3108_v6 = vshrl.u32 %v4622_v11, 16  ;;  %v4465_v18 = vld [vmem:[%s5270_s21 + $0x1f0] sm:$0x1]  ;;  %v3111_v61 = vshll.u32 %v4622_v11, 16 }
 0x188   : > { %v2571_v27 = vor.u32 %v2569_v8, %v2568_v32  ;;  %v2573_v63 = vrot.slane %v2568_v32, 4  ;;  %v2592_v15 = vshrl.u32 %v4563_v42, 16  ;;  %v3131_v25 = vor.u32 %v3129_v12, %v3128_v50  ;;  %v6799_v8 = vpop.f32.mrb[60].mxu0  ;;  %v6801_v11 = vpop.f32.mrb[60].mxu1 }
 0x189   : > { %v3133_v38 = vrot.slane %v3128_v50, 4  ;;  %v2550_v2 = vrot.slane %v2548_v54, 7  ;;  %v3110_v14 = vrot.slane %v3108_v6, 7  ;;  %v7630_v55 = vrot.slane %v6705_v13, 4 }
 0x18a   : > { %v3650_v26 = vsel %vm5871_vm10, %v2573_v63, %v4353_v0  ;;  %v6797_v46 = vrot.slane %v2592_v15, 7  ;;  %v2595_v59 = vshll.u32 %v4563_v42, 16  ;;  %v3132_v6 = vsel %vm5887_vm11, %v3124_v58, %v3131_v25  ;;  %v6810_v15 = vpop.f32.mrb[61].mxu0  ;;  %v6819_v58 = vpop.f32.mrb[61].mxu1 }
 0x18b   : > { %v2572_v36 = vsel %vm5887_vm11, %v7630_v55, %v2571_v27  ;;  %4354 = vst [vmem:[%s5270_s21 + $0xb0] sm:$0x1] %v3650_v26  ;;  %v3794_v13 = vsel %vm5871_vm10, %v3133_v38, %v4465_v18  ;;  %v2553_v54 = vor.u32 %v2551_v16, %v2550_v2  ;;  %v2555_v12 = vrot.slane %v2550_v2, 4  ;;  %4464 = vst.msk [vmem:[%s5270_s21 + $0x1ec] sm:$0xf] %vm1735_vm3, %v3132_v6  ;;  %v7632_v27 = vld [vmem:[#allocation10_spill] sm:$0xff] }
 0x18c   : > { %4352 = vst.msk [vmem:[%s5270_s21 + $0xac] sm:$0xf] %vm1735_vm3, %v2572_v36  ;;  %4466 = vst [vmem:[%s5270_s21 + $0x1f0] sm:$0x1] %v3794_v13  ;;  %v3113_v35 = vor.u32 %v3111_v61, %v3110_v14  ;;  %v3115_v32 = vrot.slane %v3110_v14, 4  ;;  %v6816_v42 = vor.u32 %v2595_v59, %v6797_v46  ;;  %v7631_v38 = vrot.slane %v6747_v39, 4 }
 0x18d   : > { %v2563_v50 = vsel %vm5887_vm11, %v2555_v12, %v6728_v41  ;;  %v4627_v16 = vpack.c.bf16 %v1705_v24, %v1705_v24  ;;  %v1096_v63 = vadd.f32 %v6415_v40, %v7632_v27  ;;  %v7633_v61 = vld [vmem:[#allocation11_spill] sm:$0xff]  ;;  %v7634_v24 = vld [vmem:[#allocation12_spill] sm:$0xff]  ;;  %v6843_v14 = vpop.f32.mrb[62].mxu0  ;;  %v6845_v55 = vpop.f32.mrb[62].mxu1  ;;  %v7637_v26 = vld [vmem:[#allocation13_spill] sm:$0xff] }
 0x18e   : > { %v2554_v0 = vsel %vm5887_vm11, %v7631_v38, %v2553_v54  ;;  %4351 = vst.msk [vmem:[%s5270_s21 + $0xa8] sm:$0xf] %vm1735_vm3, %v2563_v50  ;;  %v3114_v39 = vsel %vm5887_vm11, %v3106_v51, %v3113_v35  ;;  %v3123_v18 = vsel %vm5887_vm11, %v3115_v32, %v6761_v4  ;;  %v1352_v41 = vadd.f32 %v6415_v40, %v7633_v61  ;;  %v7638_v54 = vld [vmem:[#allocation14_spill] sm:$0xff]  ;;  %v7639_v35 = vld [vmem:[#allocation15_spill] sm:$0xff] }
 0x18f   : > { %4350 = vst.msk [vmem:[%s5270_s21 + $0xa4] sm:$0xf] %vm1735_vm3, %v2554_v0  ;;  %v1107_v2 = vadd.f32 %v6415_v40, %v7634_v24  ;;  %7635 = vst [vmem:[#allocation7_spill] sm:$0xff] %v6843_v14  ;;  %v3152_v51 = vshrl.u32 %v4627_v16, 16  ;;  %v3155_v36 = vshll.u32 %v4627_v16, 16  ;;  %v1639_v4 = vmax.f32 %v1096_v63, 0.0 }
 0x190   : > { %7636 = vst [vmem:[#allocation8_spill] sm:$0xff] %v6845_v55  ;;  %4462 = vst.msk [vmem:[%s5270_s21 + $0x1e4] sm:$0xf] %vm1735_vm3, %v3114_v39  ;;  %v1363_v59 = vadd.f32 %v6415_v40, %v7637_v26  ;;  %v1703_v6 = vmax.f32 %v1352_v41, 0.0  ;;  %v1099_v12 = vadd.f32 %v6415_v40, %v7638_v54  ;;  %v1355_v32 = vadd.f32 %v6415_v40, %v7639_v35  ;;  %v4355_v54 = vld [vmem:[%s5270_s21 + $0xb4] sm:$0xf] }
 0x191   : > { %4463 = vst.msk [vmem:[%s5270_s21 + $0x1e8] sm:$0xf] %vm1735_vm3, %v3123_v18  ;;  %v1642_v13 = vmax.f32 %v1107_v2, 0.0  ;;  %v6863_v38 = vrot.slane %v3152_v51, 7  ;;  %v4561_v0 = vpack.c.bf16 %v1639_v4, %v1639_v4  ;;  %v1120_v16 = vadd.f32 %v6415_v40, %v6313_v23  ;;  %v6879_v23 = vpop.f32.mrb[63].mxu0 }
 0x192   : > { %1511 = vst.msk [vmem:[%s5825_s30 + $0x100] sm:$0xff] %vm1478_vm5, %v1096_v63  ;;  %1575 = vst.msk [vmem:[%s5825_s30 + $0x300] sm:$0xff] %vm1478_vm5, %v1352_v41  ;;  %v1706_v50 = vmax.f32 %v1363_v59, 0.0  ;;  %v4625_v27 = vpack.c.bf16 %v1703_v6, %v1703_v6  ;;  %v1640_v39 = vmax.f32 %v1099_v12, 0.0  ;;  %v1704_v18 = vmax.f32 %v1355_v32, 0.0  ;;  %v6881_v6 = vpop.f32.mrb[63].mxu1 }
 0x193   : > { %1514 = vst.msk [vmem:[%s5825_s30 + $0x118] sm:$0xff] %vm1478_vm5, %v1107_v2  ;;  %1578 = vst.msk [vmem:[%s5825_s30 + $0x318] sm:$0xff] %vm1478_vm5, %v1363_v59  ;;  %v4564_v63 = vpack.c.bf16 %v1642_v13, %v1642_v13  ;;  %v6874_v61 = vor.u32 %v3155_v36, %v6863_v38  ;;  %v3159_v41 = vrot.slane %v6863_v38, 4  ;;  %v2575_v24 = vshrl.u32 %v4561_v0, 16  ;;  %v4467_v38 = vld [vmem:[%s5270_s21 + $0x1f4] sm:$0xf] }
 0x194   : > { %1512 = vst.msk [vmem:[%s5825_s30 + $0x108] sm:$0xff] %vm1478_vm5, %v1099_v12  ;;  %1576 = vst.msk [vmem:[%s5825_s30 + $0x308] sm:$0xff] %vm1478_vm5, %v1355_v32  ;;  %v2578_v2 = vshll.u32 %v4561_v0, 16  ;;  %v3135_v51 = vshrl.u32 %v4625_v27, 16  ;;  %v3138_v4 = vshll.u32 %v4625_v27, 16  ;;  %v4628_v36 = vpack.c.bf16 %v1706_v50, %v1706_v50 }
 0x195   : > { %1517 = vst.msk [vmem:[%s5825_s30 + $0x130] sm:$0xff] %vm1478_vm5, %v1120_v16  ;;  %7640 = vst [vmem:[#allocation9_spill] sm:$0xff] %v6879_v23  ;;  %v2601_v26 = vshrl.u32 %v4564_v63, 16  ;;  %v2604_v59 = vshll.u32 %v4564_v63, 16  ;;  %v2577_v13 = vrot.slane %v2575_v24, 7  ;;  %v4562_v12 = vpack.c.bf16 %v1640_v39, %v1640_v39 }
 0x196   : > { %7641 = vst [vmem:[#allocation10_spill] sm:$0xff] %v6881_v6  ;;  %v4626_v35 = vpack.c.bf16 %v1704_v18, %v1704_v18  ;;  %v3137_v32 = vrot.slane %v3135_v51, 7  ;;  %v1645_v25 = vmax.f32 %v1120_v16, 0.0  ;;  %v1376_v23 = vadd.f32 %v6415_v40, %v6318_v60  ;;  %v4360_v14 = vld [vmem:[%s5270_s21 + $0xc4] sm:$0x1] }
 0x197   : > { %v2603_v0 = vrot.slane %v2601_v26, 7  ;;  %v2580_v27 = vor.u32 %v2578_v2, %v2577_v13  ;;  %v2581_v55 = vrot.slane %v2577_v13, 4  ;;  %v3161_v63 = vshrl.u32 %v4628_v36, 16 }
 0x198   : > { %v3164_v6 = vshll.u32 %v4628_v36, 16  ;;  %v3140_v24 = vor.u32 %v3138_v4, %v3137_v32  ;;  %v3141_v50 = vrot.slane %v3137_v32, 4  ;;  %1581 = vst.msk [vmem:[%s5825_s30 + $0x330] sm:$0xff] %vm1478_vm5, %v1376_v23  ;;  %v2583_v60 = vshrl.u32 %v4562_v12, 16  ;;  %v4472_v36 = vld [vmem:[%s5270_s21 + $0x204] sm:$0x1] }
 0x199   : > { %v2606_v39 = vor.u32 %v2604_v59, %v2603_v0  ;;  %v2608_v18 = vrot.slane %v2603_v0, 4  ;;  %v3653_v16 = vsel %vm5858_vm9, %v2580_v27, %v4355_v54  ;;  %v3163_v51 = vrot.slane %v3161_v63, 7 }
 0x19a   : > { %v2586_v2 = vshll.u32 %v4562_v12, 16  ;;  %4356 = vst [vmem:[%s5270_s21 + $0xb4] sm:$0xf] %v3653_v16  ;;  %v3797_v26 = vsel %vm5858_vm9, %v3140_v24, %v4467_v38  ;;  %v7642_v13 = vrot.slane %v6797_v46, 4  ;;  %v3143_v32 = vshrl.u32 %v4626_v35, 16 }
 0x19b   : > { %v3659_v59 = vsel %vm5871_vm10, %v2608_v18, %v4360_v14  ;;  %4468 = vst [vmem:[%s5270_s21 + $0x1f4] sm:$0xf] %v3797_v26  ;;  %v3166_v54 = vor.u32 %v3164_v6, %v3163_v51  ;;  %v3168_v12 = vrot.slane %v3163_v51, 4  ;;  %v2585_v0 = vrot.slane %v2583_v60, 7 }
 0x19c   : > { %v2607_v4 = vsel %vm5887_vm11, %v7642_v13, %v2606_v39  ;;  %4361 = vst [vmem:[%s5270_s21 + $0xc4] sm:$0x1] %v3659_v59  ;;  %v3146_v38 = vshll.u32 %v4626_v35, 16  ;;  %v3145_v46 = vrot.slane %v3143_v32, 7  ;;  %v4567_v27 = vpack.c.bf16 %v1645_v25, %v1645_v25 }
 0x19d   : > { %4359 = vst.msk [vmem:[%s5270_s21 + $0xc0] sm:$0xf] %vm1735_vm3, %v2607_v4  ;;  %v1709_v63 = vmax.f32 %v1376_v23, 0.0  ;;  %v1112_v24 = vadd.f32 %v6415_v40, %v6320_v22  ;;  %v3167_v14 = vsel %vm5887_vm11, %v3159_v41, %v3166_v54  ;;  %v3803_v39 = vsel %vm5871_vm10, %v3168_v12, %v4472_v36 }
 0x19e   : > { %v2588_v18 = vor.u32 %v2586_v2, %v2585_v0  ;;  %v2590_v6 = vrot.slane %v2585_v0, 4  ;;  %4471 = vst.msk [vmem:[%s5270_s21 + $0x200] sm:$0xf] %vm1735_vm3, %v3167_v14  ;;  %4473 = vst [vmem:[%s5270_s21 + $0x204] sm:$0x1] %v3803_v39  ;;  %v3148_v35 = vor.u32 %v3146_v38, %v3145_v46  ;;  %v3150_v25 = vrot.slane %v3145_v46, 4 }
 0x19f   : > { %v2627_v23 = vshrl.u32 %v4567_v27, 16  ;;  %v2630_v16 = vshll.u32 %v4567_v27, 16  ;;  %1515 = vst.msk [vmem:[%s5825_s30 + $0x120] sm:$0xff] %vm1478_vm5, %v1112_v24  ;;  %v4631_v51 = vpack.c.bf16 %v1709_v63, %v1709_v63  ;;  %v1643_v60 = vmax.f32 %v1112_v24, 0.0  ;;  %v6956_v27 = vld [vmem:[%s7578_s2] ss:$0 sm:$0xff] }
 0x1a0   : > { %v2589_v22 = vsel %vm5887_vm11, %v2581_v55, %v2588_v18  ;;  %v2598_v41 = vsel %vm5887_vm11, %v2590_v6, %v6816_v42  ;;  %v3149_v2 = vsel %vm5887_vm11, %v3141_v50, %v3148_v35  ;;  %v3158_v26 = vsel %vm5887_vm11, %v3150_v25, %v6874_v61  ;;  %v4362_v18 = vld [vmem:[%s5270_s21 + $0xc8] sm:$0xf] }
 0x1a1   : > { %4357 = vst.msk [vmem:[%s5270_s21 + $0xb8] sm:$0xf] %vm1735_vm3, %v2589_v22  ;;  %4358 = vst.msk [vmem:[%s5270_s21 + $0xbc] sm:$0xf] %vm1735_vm3, %v2598_v41  ;;  %v6931_v13 = vrot.slane %v2627_v23, 7  ;;  %v1368_v42 = vadd.f32 %v6415_v40, %v6323_v29  ;;  %v3187_v55 = vshrl.u32 %v4631_v51, 16  ;;  %v4565_v59 = vpack.c.bf16 %v1643_v60, %v1643_v60 }
 0x1a2   : > { %4469 = vst.msk [vmem:[%s5270_s21 + $0x1f8] sm:$0xf] %vm1735_vm3, %v3149_v2  ;;  %4470 = vst.msk [vmem:[%s5270_s21 + $0x1fc] sm:$0xf] %vm1735_vm3, %v3158_v26  ;;  %v3190_v4 = vshll.u32 %v4631_v51, 16  ;;  %v1123_v50 = vadd.f32 %v6415_v40, %v6325_v48  ;;  %v1379_v29 = vadd.f32 %v6415_v40, %v6337_v31  ;;  %v1115_v31 = vadd.f32 %v6956_v27, %v6339_v19 }
 0x1a3   : > { %v6942_v36 = vor.u32 %v2630_v16, %v6931_v13  ;;  %v2634_v61 = vrot.slane %v6931_v13, 4  ;;  %1579 = vst.msk [vmem:[%s5825_s30 + $0x320] sm:$0xff] %vm1478_vm5, %v1368_v42  ;;  %v1707_v32 = vmax.f32 %v1368_v42, 0.0  ;;  %v3189_v54 = vrot.slane %v3187_v55, 7  ;;  %v4474_v13 = vld [vmem:[%s5270_s21 + $0x208] sm:$0xf] }
 0x1a4   : > { %v2610_v12 = vshrl.u32 %v4565_v59, 16  ;;  %v2613_v0 = vshll.u32 %v4565_v59, 16  ;;  %1518 = vst.msk [vmem:[%s5825_s30 + $0x138] sm:$0xff] %vm1478_vm5, %v1123_v50  ;;  %v1646_v38 = vmax.f32 %v1123_v50, 0.0  ;;  %1582 = vst.msk [vmem:[%s5825_s30 + $0x338] sm:$0xff] %vm1478_vm5, %v1379_v29  ;;  %v1710_v46 = vmax.f32 %v1379_v29, 0.0 }
 0x1a5   : > { %v4629_v48 = vpack.c.bf16 %v1707_v32, %v1707_v32  ;;  %v1371_v40 = vadd.f32 %v6956_v27, %v6353_v10  ;;  %v6962_v63 = vor.u32 %v3190_v4, %v3189_v54  ;;  %v3194_v24 = vrot.slane %v3189_v54, 4  ;;  %1516 = vst.msk [vmem:[%s5825_s30 + $0x128] sm:$0xff] %vm1478_vm5, %v1115_v31  ;;  %v4367_v32 = vld [vmem:[%s5270_s21 + $0xd8] sm:$0x1] }
 0x1a6   : > { %v2612_v14 = vrot.slane %v2610_v12, 7  ;;  %v4568_v39 = vpack.c.bf16 %v1646_v38, %v1646_v38  ;;  %v4632_v25 = vpack.c.bf16 %v1710_v46, %v1710_v46  ;;  %v1644_v23 = vmax.f32 %v1115_v31, 0.0  ;;  %v4479_v38 = vld [vmem:[%s5270_s21 + $0x218] sm:$0x1] }
 0x1a7   : > { %v3170_v6 = vshrl.u32 %v4629_v48, 16  ;;  %v3173_v35 = vshll.u32 %v4629_v48, 16  ;;  %1580 = vst.msk [vmem:[%s5825_s30 + $0x328] sm:$0xff] %vm1478_vm5, %v1371_v40  ;;  %v1708_v55 = vmax.f32 %v1371_v40, 0.0  ;;  %v1136_v4 = vadd.f32 %v6956_v27, %v6390_v21 }
 0x1a8   : > { %v2615_v19 = vor.u32 %v2613_v0, %v2612_v14  ;;  %v2616_v16 = vrot.slane %v2612_v14, 4  ;;  %v2636_v10 = vshrl.u32 %v4568_v39, 16  ;;  %v2639_v22 = vshll.u32 %v4568_v39, 16 }
 0x1a9   : > { %v3172_v41 = vrot.slane %v3170_v6, 7  ;;  %v3196_v51 = vshrl.u32 %v4632_v25, 16  ;;  %v3199_v60 = vshll.u32 %v4632_v25, 16  ;;  %v4566_v2 = vpack.c.bf16 %v1644_v23, %v1644_v23  ;;  %1521 = vst.msk [vmem:[%s5825_s30 + $0x150] sm:$0xff] %vm1478_vm5, %v1136_v4 }
 0x1aa   : > { %v3662_v26 = vsel %vm5858_vm9, %v2615_v19, %v4362_v18  ;;  %v2638_v42 = vrot.slane %v2636_v10, 7  ;;  %v4630_v46 = vpack.c.bf16 %v1708_v55, %v1708_v55 }
 0x1ab   : > { %4363 = vst [vmem:[%s5270_s21 + $0xc8] sm:$0xf] %v3662_v26  ;;  %v3175_v59 = vor.u32 %v3173_v35, %v3172_v41  ;;  %v3176_v50 = vrot.slane %v3172_v41, 4  ;;  %v3198_v29 = vrot.slane %v3196_v51, 7  ;;  %v2618_v54 = vshrl.u32 %v4566_v2, 16 }
 0x1ac   : > { %v2641_v12 = vor.u32 %v2639_v22, %v2638_v42  ;;  %v2643_v0 = vrot.slane %v2638_v42, 4  ;;  %v2621_v48 = vshll.u32 %v4566_v2, 16  ;;  %v3178_v6 = vshrl.u32 %v4630_v46, 16  ;;  %v7643_v2 = vld [vmem:[#allocation16_spill] sm:$0xff] }
 0x1ad   : > { %v3806_v21 = vsel %vm5858_vm9, %v3175_v59, %v4474_v13  ;;  %v3201_v31 = vor.u32 %v3199_v60, %v3198_v29  ;;  %v3203_v40 = vrot.slane %v3198_v29, 4  ;;  %v2620_v14 = vrot.slane %v2618_v54, 7  ;;  %v7644_v13 = vld [vmem:[#allocation17_spill] sm:$0xff] }
 0x1ae   : > { %4475 = vst [vmem:[%s5270_s21 + $0x208] sm:$0xf] %v3806_v21  ;;  %v2642_v39 = vsel %vm5887_vm11, %v2634_v61, %v2641_v12  ;;  %v3668_v18 = vsel %vm5871_vm10, %v2643_v0, %v4367_v32  ;;  %v3181_v35 = vshll.u32 %v4630_v46, 16  ;;  %v3180_v61 = vrot.slane %v3178_v6, 7  ;;  %v7645_v32 = vld [vmem:[#allocation18_spill] sm:$0xff] }
 0x1af   : > { %4366 = vst.msk [vmem:[%s5270_s21 + $0xd4] sm:$0xf] %vm1735_vm3, %v2642_v39  ;;  %4368 = vst [vmem:[%s5270_s21 + $0xd8] sm:$0x1] %v3668_v18  ;;  %v3202_v25 = vsel %vm5887_vm11, %v3194_v24, %v3201_v31  ;;  %v3812_v23 = vsel %vm5871_vm10, %v3203_v40, %v4479_v38  ;;  %v2623_v19 = vor.u32 %v2621_v48, %v2620_v14  ;;  %v2625_v10 = vrot.slane %v2620_v14, 4  ;;  %v7646_v14 = vld [vmem:[#allocation19_spill] sm:$0xff] }
 0x1b0   : > { %4478 = vst.msk [vmem:[%s5270_s21 + $0x214] sm:$0xf] %vm1735_vm3, %v3202_v25  ;;  %4480 = vst [vmem:[%s5270_s21 + $0x218] sm:$0x1] %v3812_v23  ;;  %v1649_v22 = vmax.f32 %v1136_v4, 0.0  ;;  %v1392_v41 = vadd.f32 %v6956_v27, %v6396_v53  ;;  %v1128_v51 = vadd.f32 %v6956_v27, %v6398_v37  ;;  %v1384_v26 = vadd.f32 %v6956_v27, %v7643_v2 }
 0x1b1   : > { %v2624_v24 = vsel %vm5887_vm11, %v2616_v16, %v2623_v19  ;;  %v2633_v60 = vsel %vm5887_vm11, %v2625_v10, %v6942_v36  ;;  %v1139_v42 = vadd.f32 %v6956_v27, %v7644_v13  ;;  %v3183_v53 = vor.u32 %v3181_v35, %v3180_v61  ;;  %v4369_v2 = vld [vmem:[%s5270_s21 + $0xdc] sm:$0xf] }
 0x1b2   : > { %4364 = vst.msk [vmem:[%s5270_s21 + $0xcc] sm:$0xf] %vm1735_vm3, %v2624_v24  ;;  %4365 = vst.msk [vmem:[%s5270_s21 + $0xd0] sm:$0xf] %vm1735_vm3, %v2633_v60  ;;  %v3185_v37 = vrot.slane %v3180_v61, 4  ;;  %v4571_v55 = vpack.c.bf16 %v1649_v22, %v1649_v22  ;;  %v1713_v16 = vmax.f32 %v1392_v41, 0.0  ;;  %v1395_v29 = vadd.f32 %v6956_v27, %v7645_v32 }
 0x1b3   : > { %1585 = vst.msk [vmem:[%s5825_s30 + $0x350] sm:$0xff] %vm1478_vm5, %v1392_v41  ;;  %1519 = vst.msk [vmem:[%s5825_s30 + $0x140] sm:$0xff] %vm1478_vm5, %v1128_v51  ;;  %v1647_v36 = vmax.f32 %v1128_v51, 0.0  ;;  %v1711_v4 = vmax.f32 %v1384_v26, 0.0  ;;  %v1650_v59 = vmax.f32 %v1139_v42, 0.0  ;;  %v3184_v54 = vsel %vm5887_vm11, %v3176_v50, %v3183_v53 }
 0x1b4   : > { %1583 = vst.msk [vmem:[%s5825_s30 + $0x340] sm:$0xff] %vm1478_vm5, %v1384_v26  ;;  %1522 = vst.msk [vmem:[%s5825_s30 + $0x158] sm:$0xff] %vm1478_vm5, %v1139_v42  ;;  %v3193_v12 = vsel %vm5887_vm11, %v3185_v37, %v6962_v63  ;;  %v2662_v0 = vshrl.u32 %v4571_v55, 16  ;;  %v2665_v38 = vshll.u32 %v4571_v55, 16  ;;  %v4635_v48 = vpack.c.bf16 %v1713_v16, %v1713_v16  ;;  %v7647_v63 = vld [vmem:[#allocation20_spill] sm:$0xff] }
 0x1b5   : > { %4476 = vst.msk [vmem:[%s5270_s21 + $0x20c] sm:$0xf] %vm1735_vm3, %v3184_v54  ;;  %4477 = vst.msk [vmem:[%s5270_s21 + $0x210] sm:$0xf] %vm1735_vm3, %v3193_v12  ;;  %v4569_v46 = vpack.c.bf16 %v1647_v36, %v1647_v36  ;;  %v4633_v21 = vpack.c.bf16 %v1711_v4, %v1711_v4  ;;  %v4572_v31 = vpack.c.bf16 %v1650_v59, %v1650_v59  ;;  %v1714_v50 = vmax.f32 %v1395_v29, 0.0 }
 0x1b6   : > { %1586 = vst.msk [vmem:[%s5825_s30 + $0x358] sm:$0xff] %vm1478_vm5, %v1395_v29  ;;  %v2664_v40 = vrot.slane %v2662_v0, 7  ;;  %v1131_v39 = vadd.f32 %v6956_v27, %v7646_v14  ;;  %v1387_v18 = vadd.f32 %v6956_v27, %v7647_v63  ;;  %v3222_v6 = vshrl.u32 %v4635_v48, 16  ;;  %v4481_v4 = vld [vmem:[%s5270_s21 + $0x21c] sm:$0xf] }
 0x1b7   : > { %v3225_v35 = vshll.u32 %v4635_v48, 16  ;;  %v2645_v25 = vshrl.u32 %v4569_v46, 16  ;;  %v2648_v23 = vshll.u32 %v4569_v46, 16  ;;  %v3205_v61 = vshrl.u32 %v4633_v21, 16  ;;  %v4374_v0 = vld [vmem:[%s5270_s21 + $0xec] sm:$0x1] }
 0x1b8   : > { %v7038_v19 = vor.u32 %v2665_v38, %v2664_v40  ;;  %v2669_v10 = vrot.slane %v2664_v40, 4  ;;  %v3208_v22 = vshll.u32 %v4633_v21, 16  ;;  %1520 = vst.msk [vmem:[%s5825_s30 + $0x148] sm:$0xff] %vm1478_vm5, %v1131_v39  ;;  %1584 = vst.msk [vmem:[%s5825_s30 + $0x348] sm:$0xff] %vm1478_vm5, %v1387_v18  ;;  %v3224_v41 = vrot.slane %v3222_v6, 7 }
 0x1b9   : > { %v7044_v51 = vrot.slane %v2645_v25, 7  ;;  %v2671_v24 = vshrl.u32 %v4572_v31, 16  ;;  %v2674_v60 = vshll.u32 %v4572_v31, 16  ;;  %v3207_v26 = vrot.slane %v3205_v61, 7  ;;  %v4486_v14 = vld [vmem:[%s5270_s21 + $0x22c] sm:$0x1] }
 0x1ba   : > { %v4636_v13 = vpack.c.bf16 %v1714_v50, %v1714_v50  ;;  %v1648_v42 = vmax.f32 %v1131_v39, 0.0  ;;  %v1712_v53 = vmax.f32 %v1387_v18, 0.0  ;;  %v3227_v37 = vor.u32 %v3225_v35, %v3224_v41 }
 0x1bb   : > { %v3229_v55 = vrot.slane %v3224_v41, 4  ;;  %v2650_v16 = vor.u32 %v2648_v23, %v7044_v51  ;;  %v2651_v36 = vrot.slane %v7044_v51, 4  ;;  %v3210_v59 = vor.u32 %v3208_v22, %v3207_v26 }
 0x1bc   : > { %v3211_v32 = vrot.slane %v3207_v26, 4  ;;  %v2673_v29 = vrot.slane %v2671_v24, 7  ;;  %v3231_v54 = vshrl.u32 %v4636_v13, 16  ;;  %v3234_v38 = vshll.u32 %v4636_v13, 16  ;;  %v7648_v24 = vld [vmem:[#allocation21_spill] sm:$0xff]  ;;  %v7649_v26 = vld [vmem:[#allocation22_spill] sm:$0xff] }
 0x1bd   : > { %v3671_v12 = vsel %vm5858_vm9, %v2650_v16, %v4369_v2  ;;  %v4570_v48 = vpack.c.bf16 %v1648_v42, %v1648_v42  ;;  %v4634_v46 = vpack.c.bf16 %v1712_v53, %v1712_v53  ;;  %v3815_v21 = vsel %vm5858_vm9, %v3210_v59, %v4481_v4 }
 0x1be   : > { %4370 = vst [vmem:[%s5270_s21 + $0xdc] sm:$0xf] %v3671_v12  ;;  %v2676_v31 = vor.u32 %v2674_v60, %v2673_v29  ;;  %v2678_v40 = vrot.slane %v2673_v29, 4  ;;  %v3233_v50 = vrot.slane %v3231_v54, 7  ;;  %4482 = vst [vmem:[%s5270_s21 + $0x21c] sm:$0xf] %v3815_v21  ;;  %v1152_v51 = vadd.f32 %v6956_v27, %v6440_v20 }
 0x1bf   : > { %v2653_v39 = vshrl.u32 %v4570_v48, 16  ;;  %v2656_v63 = vshll.u32 %v4570_v48, 16  ;;  %v3213_v18 = vshrl.u32 %v4634_v46, 16  ;;  %v3216_v6 = vshll.u32 %v4634_v46, 16  ;;  %v7650_v21 = vld [vmem:[#allocation23_spill] sm:$0xff] }
 0x1c0   : > { %v2677_v35 = vsel %vm5887_vm11, %v2669_v10, %v2676_v31  ;;  %v3677_v25 = vsel %vm5871_vm10, %v2678_v40, %v4374_v0  ;;  %v3236_v23 = vor.u32 %v3234_v38, %v3233_v50  ;;  %v3238_v61 = vrot.slane %v3233_v50, 4  ;;  %1525 = vst.msk [vmem:[%s5825_s30 + $0x170] sm:$0xff] %vm1478_vm5, %v1152_v51  ;;  %v7651_v40 = vld [vmem:[#allocation24_spill] sm:$0xff] }
 0x1c1   : > { %4373 = vst.msk [vmem:[%s5270_s21 + $0xe8] sm:$0xf] %vm1735_vm3, %v2677_v35  ;;  %4375 = vst [vmem:[%s5270_s21 + $0xec] sm:$0x1] %v3677_v25  ;;  %v2655_v22 = vrot.slane %v2653_v39, 7  ;;  %v3215_v41 = vrot.slane %v3213_v18, 7  ;;  %v1408_v60 = vadd.f32 %v6956_v27, %v7648_v24  ;;  %v1144_v13 = vadd.f32 %v6956_v27, %v7649_v26 }
 0x1c2   : > { %v3237_v10 = vsel %vm5887_vm11, %v3229_v55, %v3236_v23  ;;  %v3821_v2 = vsel %vm5871_vm10, %v3238_v61, %v4486_v14  ;;  %v1400_v42 = vadd.f32 %v6956_v27, %v6452_v56  ;;  %v1653_v4 = vmax.f32 %v1152_v51, 0.0 }
 0x1c3   : > { %4485 = vst.msk [vmem:[%s5270_s21 + $0x228] sm:$0xf] %vm1735_vm3, %v3237_v10  ;;  %4487 = vst [vmem:[%s5270_s21 + $0x22c] sm:$0x1] %v3821_v2  ;;  %v2658_v20 = vor.u32 %v2656_v63, %v2655_v22  ;;  %v2660_v53 = vrot.slane %v2655_v22, 4  ;;  %v3218_v16 = vor.u32 %v3216_v6, %v3215_v41  ;;  %v3220_v55 = vrot.slane %v3215_v41, 4 }
 0x1c4   : > { %1589 = vst.msk [vmem:[%s5825_s30 + $0x370] sm:$0xff] %vm1478_vm5, %v1408_v60  ;;  %v1717_v59 = vmax.f32 %v1408_v60, 0.0  ;;  %1523 = vst.msk [vmem:[%s5825_s30 + $0x160] sm:$0xff] %vm1478_vm5, %v1144_v13  ;;  %v1651_v56 = vmax.f32 %v1144_v13, 0.0  ;;  %v1715_v29 = vmax.f32 %v1400_v42, 0.0  ;;  %v4575_v48 = vpack.c.bf16 %v1653_v4, %v1653_v4 }
 0x1c5   : > { %1587 = vst.msk [vmem:[%s5825_s30 + $0x360] sm:$0xff] %vm1478_vm5, %v1400_v42  ;;  %v2659_v54 = vsel %vm5887_vm11, %v2651_v36, %v2658_v20  ;;  %v2668_v12 = vsel %vm5887_vm11, %v2660_v53, %v7038_v19  ;;  %v3219_v0 = vsel %vm5887_vm11, %v3211_v32, %v3218_v16  ;;  %v3228_v38 = vsel %vm5887_vm11, %v3220_v55, %v3227_v37  ;;  %v4376_v42 = vld [vmem:[%s5270_s21 + $0xf0] sm:$0xf] }
 0x1c6   : > { %4371 = vst.msk [vmem:[%s5270_s21 + $0xe0] sm:$0xf] %vm1735_vm3, %v2659_v54  ;;  %4372 = vst.msk [vmem:[%s5270_s21 + $0xe4] sm:$0xf] %vm1735_vm3, %v2668_v12  ;;  %v4639_v36 = vpack.c.bf16 %v1717_v59, %v1717_v59  ;;  %v4573_v46 = vpack.c.bf16 %v1651_v56, %v1651_v56  ;;  %v4637_v19 = vpack.c.bf16 %v1715_v29, %v1715_v29  ;;  %v2697_v14 = vshrl.u32 %v4575_v48, 16 }
 0x1c7   : > { %4483 = vst.msk [vmem:[%s5270_s21 + $0x220] sm:$0xf] %vm1735_vm3, %v3219_v0  ;;  %4484 = vst.msk [vmem:[%s5270_s21 + $0x224] sm:$0xf] %vm1735_vm3, %v3228_v38  ;;  %v1155_v32 = vadd.f32 %v6956_v27, %v6454_v9  ;;  %v1411_v37 = vadd.f32 %v6956_v27, %v6464_v7  ;;  %v1147_v31 = vadd.f32 %v6956_v27, %v7650_v21  ;;  %v2700_v39 = vshll.u32 %v4575_v48, 16 }
 0x1c8   : > { %v1403_v50 = vadd.f32 %v6956_v27, %v7651_v40  ;;  %v3257_v63 = vshrl.u32 %v4639_v36, 16  ;;  %v3260_v18 = vshll.u32 %v4639_v36, 16  ;;  %v2680_v6 = vshrl.u32 %v4573_v46, 16  ;;  %v4488_v20 = vld [vmem:[%s5270_s21 + $0x230] sm:$0xf] }
 0x1c9   : > { %v2683_v35 = vshll.u32 %v4573_v46, 16  ;;  %v3240_v25 = vshrl.u32 %v4637_v19, 16  ;;  %v3243_v23 = vshll.u32 %v4637_v19, 16  ;;  %1526 = vst.msk [vmem:[%s5825_s30 + $0x178] sm:$0xff] %vm1478_vm5, %v1155_v32  ;;  %1590 = vst.msk [vmem:[%s5825_s30 + $0x378] sm:$0xff] %vm1478_vm5, %v1411_v37  ;;  %v2699_v7 = vrot.slane %v2697_v14, 7 }
 0x1ca   : > { %1524 = vst.msk [vmem:[%s5825_s30 + $0x168] sm:$0xff] %vm1478_vm5, %v1147_v31  ;;  %1588 = vst.msk [vmem:[%s5825_s30 + $0x368] sm:$0xff] %vm1478_vm5, %v1403_v50  ;;  %v3259_v9 = vrot.slane %v3257_v63, 7  ;;  %v1654_v61 = vmax.f32 %v1155_v32, 0.0  ;;  %v1718_v22 = vmax.f32 %v1411_v37, 0.0  ;;  %v7121_v41 = vrot.slane %v2680_v6, 7 }
 0x1cb   : > { %v7123_v51 = vrot.slane %v3240_v25, 7  ;;  %v1652_v24 = vmax.f32 %v1147_v31, 0.0  ;;  %v1716_v60 = vmax.f32 %v1403_v50, 0.0  ;;  %v2702_v10 = vor.u32 %v2700_v39, %v2699_v7  ;;  %v4381_v39 = vld [vmem:[%s5270_s21 + $0x100] sm:$0x1] }
 0x1cc   : > { %v2704_v2 = vrot.slane %v2699_v7, 4  ;;  %v3262_v26 = vor.u32 %v3260_v18, %v3259_v9  ;;  %v3264_v13 = vrot.slane %v3259_v9, 4  ;;  %v2685_v53 = vor.u32 %v2683_v35, %v7121_v41  ;;  %v4493_v63 = vld [vmem:[%s5270_s21 + $0x240] sm:$0x1] }
 0x1cd   : > { %v2686_v16 = vrot.slane %v7121_v41, 4  ;;  %v3245_v55 = vor.u32 %v3243_v23, %v7123_v51  ;;  %v3246_v4 = vrot.slane %v7123_v51, 4  ;;  %v4576_v59 = vpack.c.bf16 %v1654_v61, %v1654_v61  ;;  %v7652_v35 = vld [vmem:[#allocation25_spill] sm:$0xff]  ;;  %v7653_v23 = vld [vmem:[#allocation26_spill] sm:$0xff] }
 0x1ce   : > { %v4640_v56 = vpack.c.bf16 %v1718_v22, %v1718_v22  ;;  %v4574_v29 = vpack.c.bf16 %v1652_v24, %v1652_v24  ;;  %v4638_v54 = vpack.c.bf16 %v1716_v60, %v1716_v60  ;;  %v3680_v12 = vsel %vm5858_vm9, %v2685_v53, %v4376_v42 }
 0x1cf   : > { %v3824_v0 = vsel %vm5858_vm9, %v3245_v55, %v4488_v20  ;;  %v1168_v38 = vadd.f32 %v6956_v27, %v6492_v30  ;;  %v1424_v48 = vadd.f32 %v6956_v27, %v6505_v45  ;;  %4377 = vst [vmem:[%s5270_s21 + $0xf0] sm:$0xf] %v3680_v12  ;;  %v2706_v36 = vshrl.u32 %v4576_v59, 16 }
 0x1d0   : > { %4489 = vst [vmem:[%s5270_s21 + $0x230] sm:$0xf] %v3824_v0  ;;  %v2709_v46 = vshll.u32 %v4576_v59, 16  ;;  %v3266_v19 = vshrl.u32 %v4640_v56, 16  ;;  %v3269_v32 = vshll.u32 %v4640_v56, 16  ;;  %v2688_v37 = vshrl.u32 %v4574_v29, 16 }
 0x1d1   : > { %v2691_v21 = vshll.u32 %v4574_v29, 16  ;;  %v3248_v31 = vshrl.u32 %v4638_v54, 16  ;;  %v3251_v40 = vshll.u32 %v4638_v54, 16  ;;  %1529 = vst.msk [vmem:[%s5825_s30 + $0x190] sm:$0xff] %vm1478_vm5, %v1168_v38  ;;  %1593 = vst.msk [vmem:[%s5825_s30 + $0x390] sm:$0xff] %vm1478_vm5, %v1424_v48  ;;  %v2708_v30 = vrot.slane %v2706_v36, 7 }
 0x1d2   : > { %v3268_v50 = vrot.slane %v3266_v19, 7  ;;  %v1657_v14 = vmax.f32 %v1168_v38, 0.0  ;;  %v1721_v45 = vmax.f32 %v1424_v48, 0.0  ;;  %v2690_v18 = vrot.slane %v2688_v37, 7  ;;  %v7654_v0 = vld [vmem:[#allocation27_spill] sm:$0xff]  ;;  %v7656_v48 = vld [vmem:[#allocation29_spill] sm:$0xff] }
 0x1d3   : > { %v3250_v6 = vrot.slane %v3248_v31, 7  ;;  %v1160_v25 = vadd.f32 %v6956_v27, %v7652_v35  ;;  %v1416_v7 = vadd.f32 %v6956_v27, %v7653_v23  ;;  %v2711_v9 = vor.u32 %v2709_v46, %v2708_v30  ;;  %v7657_v46 = vld [vmem:[#allocation30_spill] sm:$0xff] }
 0x1d4   : > { %v2713_v61 = vrot.slane %v2708_v30, 4  ;;  %v3271_v22 = vor.u32 %v3269_v32, %v3268_v50  ;;  %v3273_v41 = vrot.slane %v3268_v50, 4  ;;  %v2693_v51 = vor.u32 %v2691_v21, %v2690_v18 }
 0x1d5   : > { %v2695_v24 = vrot.slane %v2690_v18, 4  ;;  %v3253_v60 = vor.u32 %v3251_v40, %v3250_v6  ;;  %v3255_v42 = vrot.slane %v3250_v6, 4  ;;  %1527 = vst.msk [vmem:[%s5825_s30 + $0x180] sm:$0xff] %vm1478_vm5, %v1160_v25  ;;  %1591 = vst.msk [vmem:[%s5825_s30 + $0x380] sm:$0xff] %vm1478_vm5, %v1416_v7  ;;  %v2712_v20 = vsel %vm5887_vm11, %v2704_v2, %v2711_v9 }
 0x1d6   : > { %v3686_v53 = vsel %vm5871_vm10, %v2713_v61, %v4381_v39  ;;  %v3272_v55 = vsel %vm5887_vm11, %v3264_v13, %v3271_v22  ;;  %v3830_v59 = vsel %vm5871_vm10, %v3273_v41, %v4493_v63  ;;  %4380 = vst.msk [vmem:[%s5270_s21 + $0xfc] sm:$0xf] %vm1735_vm3, %v2712_v20  ;;  %v2694_v56 = vsel %vm5887_vm11, %v2686_v16, %v2693_v51  ;;  %v4495_v20 = vld [vmem:[%s5270_s21 + $0x244] sm:$0xf] }
 0x1d7   : > { %4382 = vst [vmem:[%s5270_s21 + $0x100] sm:$0x1] %v3686_v53  ;;  %4492 = vst.msk [vmem:[%s5270_s21 + $0x23c] sm:$0xf] %vm1735_vm3, %v3272_v55  ;;  %v2703_v2 = vsel %vm5887_vm11, %v2695_v24, %v2702_v10  ;;  %v3254_v29 = vsel %vm5887_vm11, %v3246_v4, %v3253_v60  ;;  %v3263_v13 = vsel %vm5887_vm11, %v3255_v42, %v3262_v26  ;;  %v1655_v12 = vmax.f32 %v1160_v25, 0.0  ;;  %v7655_v26 = vld [vmem:[#allocation28_spill] sm:$0xff] }
 0x1d8   : > { %4494 = vst [vmem:[%s5270_s21 + $0x240] sm:$0x1] %v3830_v59  ;;  %4378 = vst.msk [vmem:[%s5270_s21 + $0xf4] sm:$0xf] %vm1735_vm3, %v2694_v56  ;;  %v4579_v54 = vpack.c.bf16 %v1657_v14, %v1657_v14  ;;  %v4643_v16 = vpack.c.bf16 %v1721_v45, %v1721_v45  ;;  %v1719_v10 = vmax.f32 %v1416_v7, 0.0  ;;  %v1171_v4 = vadd.f32 %v6956_v27, %v7654_v0 }
 0x1d9   : > { %4379 = vst.msk [vmem:[%s5270_s21 + $0xf8] sm:$0xf] %vm1735_vm3, %v2703_v2  ;;  %4490 = vst.msk [vmem:[%s5270_s21 + $0x234] sm:$0xf] %vm1735_vm3, %v3254_v29  ;;  %v1427_v38 = vadd.f32 %v6956_v27, %v7655_v26  ;;  %v1163_v36 = vadd.f32 %v6956_v27, %v7656_v48  ;;  %v1419_v19 = vadd.f32 %v6956_v27, %v7657_v46  ;;  %v4383_v42 = vld [vmem:[%s5270_s21 + $0x104] sm:$0xf] }
 0x1da   : > { %4491 = vst.msk [vmem:[%s5270_s21 + $0x238] sm:$0xf] %vm1735_vm3, %v3263_v13  ;;  %v2732_v32 = vshrl.u32 %v4579_v54, 16  ;;  %v2735_v37 = vshll.u32 %v4579_v54, 16  ;;  %v3292_v21 = vshrl.u32 %v4643_v16, 16  ;;  %v3295_v31 = vshll.u32 %v4643_v16, 16 }
 0x1db   : > { %v4577_v40 = vpack.c.bf16 %v1655_v12, %v1655_v12  ;;  %v4641_v30 = vpack.c.bf16 %v1719_v10, %v1719_v10  ;;  %1530 = vst.msk [vmem:[%s5825_s30 + $0x198] sm:$0xff] %vm1478_vm5, %v1171_v4  ;;  %v1658_v50 = vmax.f32 %v1171_v4, 0.0  ;;  %1594 = vst.msk [vmem:[%s5825_s30 + $0x398] sm:$0xff] %vm1478_vm5, %v1427_v38  ;;  %v1722_v14 = vmax.f32 %v1427_v38, 0.0  ;;  %v4388_v48 = vld [vmem:[%s5270_s21 + $0x114] sm:$0x1] }
 0x1dc   : > { %1528 = vst.msk [vmem:[%s5825_s30 + $0x188] sm:$0xff] %vm1478_vm5, %v1163_v36  ;;  %1592 = vst.msk [vmem:[%s5825_s30 + $0x388] sm:$0xff] %vm1478_vm5, %v1419_v19  ;;  %v2734_v45 = vrot.slane %v2732_v32, 7  ;;  %v3294_v39 = vrot.slane %v3292_v21, 7  ;;  %v1656_v63 = vmax.f32 %v1163_v36, 0.0  ;;  %v1720_v18 = vmax.f32 %v1419_v19, 0.0 }
 0x1dd   : > { %v2715_v6 = vshrl.u32 %v4577_v40, 16  ;;  %v2718_v35 = vshll.u32 %v4577_v40, 16  ;;  %v3275_v25 = vshrl.u32 %v4641_v30, 16  ;;  %v3278_v23 = vshll.u32 %v4641_v30, 16  ;;  %v4500_v32 = vld [vmem:[%s5270_s21 + $0x254] sm:$0x1] }
 0x1de   : > { %v2737_v7 = vor.u32 %v2735_v37, %v2734_v45  ;;  %v2739_v9 = vrot.slane %v2734_v45, 4  ;;  %v7201_v61 = vor.u32 %v3295_v31, %v3294_v39  ;;  %v3299_v22 = vrot.slane %v3294_v39, 4 }
 0x1df   : > { %v2717_v41 = vrot.slane %v2715_v6, 7  ;;  %v7203_v51 = vrot.slane %v3275_v25, 7  ;;  %v4580_v24 = vpack.c.bf16 %v1658_v50, %v1658_v50  ;;  %v4644_v60 = vpack.c.bf16 %v1722_v14, %v1722_v14 }
 0x1e0   : > { %v4578_v53 = vpack.c.bf16 %v1656_v63, %v1656_v63  ;;  %v4642_v55 = vpack.c.bf16 %v1720_v18, %v1720_v18  ;;  %v1184_v59 = vadd.f32 %v6956_v27, %v6568_v17  ;;  %v1440_v56 = vadd.f32 %v6956_v27, %v6570_v28 }
 0x1e1   : > { %v2720_v2 = vor.u32 %v2718_v35, %v2717_v41  ;;  %v2721_v29 = vrot.slane %v2717_v41, 4  ;;  %v3280_v13 = vor.u32 %v3278_v23, %v7203_v51  ;;  %v3281_v54 = vrot.slane %v7203_v51, 4 }
 0x1e2   : > { %v2741_v16 = vshrl.u32 %v4580_v24, 16  ;;  %v2744_v12 = vshll.u32 %v4580_v24, 16  ;;  %v3301_v10 = vshrl.u32 %v4644_v60, 16  ;;  %v3304_v0 = vshll.u32 %v4644_v60, 16  ;;  %1533 = vst.msk [vmem:[%s5825_s30 + $0x1b0] sm:$0xff] %vm1478_vm5, %v1184_v59  ;;  %1597 = vst.msk [vmem:[%s5825_s30 + $0x3b0] sm:$0xff] %vm1478_vm5, %v1440_v56 }
 0x1e3   : > { %v3689_v28 = vsel %vm5858_vm9, %v2720_v2, %v4383_v42  ;;  %v3833_v17 = vsel %vm5858_vm9, %v3280_v13, %v4495_v20  ;;  %v2723_v4 = vshrl.u32 %v4578_v53, 16  ;;  %v2726_v26 = vshll.u32 %v4578_v53, 16 }
 0x1e4   : > { %4384 = vst [vmem:[%s5270_s21 + $0x104] sm:$0xf] %v3689_v28  ;;  %4496 = vst [vmem:[%s5270_s21 + $0x244] sm:$0xf] %v3833_v17  ;;  %v2743_v38 = vrot.slane %v2741_v16, 7  ;;  %v3303_v36 = vrot.slane %v3301_v10, 7  ;;  %v1176_v40 = vadd.f32 %v6956_v27, %v6591_v49  ;;  %v1179_v13 = vadd.f32 %v6956_v27, %v6647_v44 }
 0x1e5   : > { %v3283_v46 = vshrl.u32 %v4642_v55, 16  ;;  %v3286_v19 = vshll.u32 %v4642_v55, 16  ;;  %v2725_v37 = vrot.slane %v2723_v4, 7  ;;  %v1661_v21 = vmax.f32 %v1184_v59, 0.0 }
 0x1e6   : > { %v1725_v31 = vmax.f32 %v1440_v56, 0.0  ;;  %v2746_v30 = vor.u32 %v2744_v12, %v2743_v38  ;;  %v2748_v50 = vrot.slane %v2743_v38, 4  ;;  %v3306_v14 = vor.u32 %v3304_v0, %v3303_v36  ;;  %1531 = vst.msk [vmem:[%s5825_s30 + $0x1a0] sm:$0xff] %vm1478_vm5, %v1176_v40  ;;  %1532 = vst.msk [vmem:[%s5825_s30 + $0x1a8] sm:$0xff] %vm1478_vm5, %v1179_v13 }
 0x1e7   : > { %v3308_v45 = vrot.slane %v3303_v36, 4  ;;  %v2728_v39 = vor.u32 %v2726_v26, %v2725_v37  ;;  %v2730_v63 = vrot.slane %v2725_v37, 4  ;;  %v3285_v18 = vrot.slane %v3283_v46, 7 }
 0x1e8   : > { %v4583_v6 = vpack.c.bf16 %v1661_v21, %v1661_v21  ;;  %v2747_v35 = vsel %vm5887_vm11, %v2739_v9, %v2746_v30  ;;  %v3695_v49 = vsel %vm5871_vm10, %v2748_v50, %v4388_v48  ;;  %v3307_v25 = vsel %vm5887_vm11, %v3299_v22, %v3306_v14  ;;  %v4390_v48 = vld [vmem:[%s5270_s21 + $0x118] sm:$0xf] }
 0x1e9   : > { %v3839_v23 = vsel %vm5871_vm10, %v3308_v45, %v4500_v32  ;;  %4387 = vst.msk [vmem:[%s5270_s21 + $0x110] sm:$0xf] %vm1735_vm3, %v2747_v35  ;;  %4389 = vst [vmem:[%s5270_s21 + $0x114] sm:$0x1] %v3695_v49  ;;  %v2729_v9 = vsel %vm5887_vm11, %v2721_v29, %v2728_v39  ;;  %v2738_v41 = vsel %vm5887_vm11, %v2730_v63, %v2737_v7  ;;  %v3290_v24 = vrot.slane %v3285_v18, 4 }
 0x1ea   : > { %4499 = vst.msk [vmem:[%s5270_s21 + $0x250] sm:$0xf] %vm1735_vm3, %v3307_v25  ;;  %4501 = vst [vmem:[%s5270_s21 + $0x254] sm:$0x1] %v3839_v23  ;;  %v3288_v51 = vor.u32 %v3286_v19, %v3285_v18  ;;  %v2767_v22 = vshrl.u32 %v4583_v6, 16  ;;  %v7251_v60 = vpack.c.bf16 %v1725_v31, %v1725_v31  ;;  %v1659_v42 = vmax.f32 %v1176_v40, 0.0 }
 0x1eb   : > { %4385 = vst.msk [vmem:[%s5270_s21 + $0x108] sm:$0xf] %vm1735_vm3, %v2729_v9  ;;  %4386 = vst.msk [vmem:[%s5270_s21 + $0x10c] sm:$0xf] %vm1735_vm3, %v2738_v41  ;;  %v3298_v53 = vsel %vm5887_vm11, %v3290_v24, %v7201_v61  ;;  %v1432_v7 = vadd.f32 %v6956_v27, %v6610_v43  ;;  %v1187_v55 = vadd.f32 %v6956_v27, %v6633_v1  ;;  %v2770_v56 = vshll.u32 %v4583_v6, 16 }
 0x1ec   : > { %v3289_v20 = vsel %vm5887_vm11, %v3281_v54, %v3288_v51  ;;  %4498 = vst.msk [vmem:[%s5270_s21 + $0x24c] sm:$0xf] %vm1735_vm3, %v3298_v53  ;;  %v2769_v59 = vrot.slane %v2767_v22, 7  ;;  %v3327_v2 = vshrl.u32 %v7251_v60, 16  ;;  %v4581_v29 = vpack.c.bf16 %v1659_v42, %v1659_v42  ;;  %v4502_v30 = vld [vmem:[%s5270_s21 + $0x258] sm:$0xf] }
 0x1ed   : > { %4497 = vst.msk [vmem:[%s5270_s21 + $0x248] sm:$0xf] %vm1735_vm3, %v3289_v20  ;;  %v1723_v61 = vmax.f32 %v1432_v7, 0.0  ;;  %v1662_v43 = vmax.f32 %v1187_v55, 0.0  ;;  %v1443_v1 = vadd.f32 %v6956_v27, %v6635_v33  ;;  %v3330_v16 = vshll.u32 %v7251_v60, 16 }
 0x1ee   : > { %1595 = vst.msk [vmem:[%s5825_s30 + $0x3a0] sm:$0xff] %vm1478_vm5, %v1432_v7  ;;  %1534 = vst.msk [vmem:[%s5825_s30 + $0x1b8] sm:$0xff] %vm1478_vm5, %v1187_v55  ;;  %v7275_v54 = vrot.slane %v3327_v2, 7  ;;  %v2750_v12 = vshrl.u32 %v4581_v29, 16  ;;  %v2772_v10 = vor.u32 %v2770_v56, %v2769_v59  ;;  %v2774_v4 = vrot.slane %v2769_v59, 4 }
 0x1ef   : > { %v4645_v0 = vpack.c.bf16 %v1723_v61, %v1723_v61  ;;  %v4584_v28 = vpack.c.bf16 %v1662_v43, %v1662_v43  ;;  %1598 = vst.msk [vmem:[%s5825_s30 + $0x3b8] sm:$0xff] %vm1478_vm5, %v1443_v1  ;;  %v1726_v17 = vmax.f32 %v1443_v1, 0.0  ;;  %v2753_v26 = vshll.u32 %v4581_v29, 16  ;;  %v4395_v18 = vld [vmem:[%s5270_s21 + $0x128] sm:$0x1] }
 0x1f0   : > { %v2752_v33 = vrot.slane %v2750_v12, 7  ;;  %v1660_v38 = vmax.f32 %v1179_v13, 0.0  ;;  %v3334_v44 = vrot.slane %v7275_v54, 4  ;;  %v1435_v14 = vadd.f32 %v6956_v27, %v6655_v47  ;;  %v4507_v20 = vld [vmem:[%s5270_s21 + $0x268] sm:$0x1] }
 0x1f1   : > { %v3310_v36 = vshrl.u32 %v4645_v0, 16  ;;  %v3313_v46 = vshll.u32 %v4645_v0, 16  ;;  %v2776_v19 = vshrl.u32 %v4584_v28, 16  ;;  %v2779_v37 = vshll.u32 %v4584_v28, 16 }
 0x1f2   : > { %v2755_v32 = vor.u32 %v2753_v26, %v2752_v33  ;;  %v4648_v21 = vpack.c.bf16 %v1726_v17, %v1726_v17  ;;  %v4582_v31 = vpack.c.bf16 %v1660_v38, %v1660_v38  ;;  %v1200_v45 = vadd.f32 %v6956_v27, %v6701_v34  ;;  %1596 = vst.msk [vmem:[%s5825_s30 + $0x3a8] sm:$0xff] %vm1478_vm5, %v1435_v14  ;;  %v7660_v38 = vld [vmem:[#allocation33_spill] sm:$0xff] }
 0x1f3   : > { %v7284_v40 = vrot.slane %v3310_v36, 7  ;;  %v2778_v50 = vrot.slane %v2776_v19, 7  ;;  %v2756_v39 = vrot.slane %v2752_v33, 4  ;;  %v1724_v51 = vmax.f32 %v1435_v14, 0.0 }
 0x1f4   : > { %v3698_v63 = vsel %vm5858_vm9, %v2755_v32, %v4390_v48  ;;  %v3336_v6 = vshrl.u32 %v4648_v21, 16  ;;  %v2758_v35 = vshrl.u32 %v4582_v31, 16  ;;  %v3339_v47 = vshll.u32 %v4648_v21, 16  ;;  %1537 = vst.msk [vmem:[%s5825_s30 + $0x1d0] sm:$0xff] %vm1478_vm5, %v1200_v45  ;;  %v7661_v48 = vld [vmem:[#allocation5_spill] sm:$0xff] }
 0x1f5   : > { %4391 = vst [vmem:[%s5270_s21 + $0x118] sm:$0xf] %v3698_v63  ;;  %v3315_v49 = vor.u32 %v3313_v46, %v7284_v40  ;;  %v2781_v25 = vor.u32 %v2779_v37, %v2778_v50  ;;  %v2783_v23 = vrot.slane %v2778_v50, 4  ;;  %v2761_v41 = vshll.u32 %v4582_v31, 16 }
 0x1f6   : > { %v3338_v34 = vrot.slane %v3336_v6, 7  ;;  %v2760_v9 = vrot.slane %v2758_v35, 7  ;;  %v1665_v53 = vmax.f32 %v1200_v45, 0.0  ;;  %v4646_v2 = vpack.c.bf16 %v1724_v51, %v1724_v51 }
 0x1f7   : > { %v3842_v24 = vsel %vm5858_vm9, %v3315_v49, %v4502_v30  ;;  %v2782_v22 = vsel %vm5887_vm11, %v2774_v4, %v2781_v25  ;;  %v3704_v42 = vsel %vm5871_vm10, %v2783_v23, %v4395_v18  ;;  %v1456_v61 = vadd.f32 %v6956_v27, %v6703_v57  ;;  %v7658_v4 = vld [vmem:[#allocation31_spill] sm:$0xff] }
 0x1f8   : > { %4503 = vst [vmem:[%s5270_s21 + $0x258] sm:$0xf] %v3842_v24  ;;  %4394 = vst.msk [vmem:[%s5270_s21 + $0x124] sm:$0xf] %vm1735_vm3, %v2782_v22  ;;  %v3341_v7 = vor.u32 %v3339_v47, %v3338_v34  ;;  %v3343_v55 = vrot.slane %v3338_v34, 4  ;;  %v2763_v59 = vor.u32 %v2761_v41, %v2760_v9  ;;  %v2765_v56 = vrot.slane %v2760_v9, 4 }
 0x1f9   : > { %4396 = vst [vmem:[%s5270_s21 + $0x128] sm:$0x1] %v3704_v42  ;;  %v4587_v29 = vpack.c.bf16 %v1665_v53, %v1665_v53  ;;  %v1192_v43 = vadd.f32 %v6956_v27, %v6707_v3  ;;  %v3332_v28 = vor.u32 %v3330_v16, %v7275_v54  ;;  %v3318_v57 = vshrl.u32 %v4646_v2, 16  ;;  %1601 = vst.msk [vmem:[%s5825_s30 + $0x3d0] sm:$0xff] %vm1478_vm5, %v1456_v61  ;;  %v7659_v54 = vld [vmem:[#allocation32_spill] sm:$0xff] }
 0x1fa   : > { %v3342_v1 = vsel %vm5887_vm11, %v3334_v44, %v3341_v7  ;;  %v3848_v13 = vsel %vm5871_vm10, %v3343_v55, %v4507_v20  ;;  %v2764_v12 = vsel %vm5887_vm11, %v2756_v39, %v2763_v59  ;;  %v2773_v0 = vsel %vm5887_vm11, %v2765_v56, %v2772_v10  ;;  %v4397_v41 = vld [vmem:[%s5270_s21 + $0x12c] sm:$0xf] }
 0x1fb   : > { %4506 = vst.msk [vmem:[%s5270_s21 + $0x264] sm:$0xf] %vm1735_vm3, %v3342_v1  ;;  %4508 = vst [vmem:[%s5270_s21 + $0x268] sm:$0x1] %v3848_v13  ;;  %v2802_v3 = vshrl.u32 %v4587_v29, 16  ;;  %v1729_v10 = vmax.f32 %v1456_v61, 0.0  ;;  %v1448_v60 = vadd.f32 %v6956_v27, %v7658_v4  ;;  %v1203_v16 = vadd.f32 %v6956_v27, %v7659_v54 }
 0x1fc   : > { %4392 = vst.msk [vmem:[%s5270_s21 + $0x11c] sm:$0xf] %vm1735_vm3, %v2764_v12  ;;  %4393 = vst.msk [vmem:[%s5270_s21 + $0x120] sm:$0xf] %vm1735_vm3, %v2773_v0  ;;  %v1663_v17 = vmax.f32 %v1192_v43, 0.0  ;;  %v3320_v33 = vrot.slane %v3318_v57, 7  ;;  %v1459_v44 = vadd.f32 %v6956_v27, %v7660_v38  ;;  %v1195_v36 = vadd.f32 %v6956_v27, %v7661_v48 }
 0x1fd   : > { %1535 = vst.msk [vmem:[%s5825_s30 + $0x1c0] sm:$0xff] %vm1478_vm5, %v1192_v43  ;;  %v3321_v26 = vshll.u32 %v4646_v2, 16  ;;  %v7345_v46 = vpack.c.bf16 %v1729_v10, %v1729_v10  ;;  %1599 = vst.msk [vmem:[%s5825_s30 + $0x3c0] sm:$0xff] %vm1478_vm5, %v1448_v60  ;;  %v1727_v32 = vmax.f32 %v1448_v60, 0.0  ;;  %v1666_v37 = vmax.f32 %v1203_v16, 0.0  ;;  %v7662_v43 = vld [vmem:[#allocation6_spill] sm:$0xff] }
 0x1fe   : > { %v4585_v19 = vpack.c.bf16 %v1663_v17, %v1663_v17  ;;  %1538 = vst.msk [vmem:[%s5825_s30 + $0x1d8] sm:$0xff] %vm1478_vm5, %v1203_v16  ;;  %v3316_v21 = vrot.slane %v7284_v40, 4  ;;  %v3325_v30 = vrot.slane %v3320_v33, 4  ;;  %v2804_v50 = vrot.slane %v2802_v3, 7  ;;  %1602 = vst.msk [vmem:[%s5825_s30 + $0x3d8] sm:$0xff] %vm1478_vm5, %v1459_v44 }
 0x1ff   : > { %v3323_v31 = vor.u32 %v3321_v26, %v3320_v33  ;;  %1536 = vst.msk [vmem:[%s5825_s30 + $0x1c8] sm:$0xff] %vm1478_vm5, %v1195_v36  ;;  %v2805_v14 = vshll.u32 %v4587_v29, 16  ;;  %v3362_v45 = vshrl.u32 %v7345_v46, 16  ;;  %v4649_v40 = vpack.c.bf16 %v1727_v32, %v1727_v32  ;;  %v4509_v29 = vld [vmem:[%s5270_s21 + $0x26c] sm:$0xf] }
 0x200   : > { %v2785_v39 = vshrl.u32 %v4585_v19, 16  ;;  %v2788_v63 = vshll.u32 %v4585_v19, 16  ;;  %v3333_v6 = vsel %vm5887_vm11, %v3325_v30, %v3332_v28  ;;  %v4588_v35 = vpack.c.bf16 %v1666_v37, %v1666_v37  ;;  %v4402_v61 = vld [vmem:[%s5270_s21 + $0x13c] sm:$0x1]  ;;  %v7663_v37 = vld [vmem:[#allocation7_spill] sm:$0xff] }
 0x201   : > { %v3324_v18 = vsel %vm5887_vm11, %v3316_v21, %v3323_v31  ;;  %4505 = vst.msk [vmem:[%s5270_s21 + $0x260] sm:$0xf] %vm1735_vm3, %v3333_v6  ;;  %v7365_v49 = vrot.slane %v3362_v45, 7  ;;  %v1730_v23 = vmax.f32 %v1459_v44, 0.0  ;;  %v1664_v47 = vmax.f32 %v1195_v36, 0.0 }
 0x202   : > { %4504 = vst.msk [vmem:[%s5270_s21 + $0x25c] sm:$0xf] %vm1735_vm3, %v3324_v18  ;;  %v7367_v25 = vrot.slane %v2785_v39, 7  ;;  %v2807_v34 = vor.u32 %v2805_v14, %v2804_v50  ;;  %v2809_v9 = vrot.slane %v2804_v50, 4  ;;  %v3345_v51 = vshrl.u32 %v4649_v40, 16 }
 0x203   : > { %v2811_v24 = vshrl.u32 %v4588_v35, 16  ;;  %v3369_v22 = vrot.slane %v7365_v49, 4  ;;  %v3348_v20 = vshll.u32 %v4649_v40, 16  ;;  %v2814_v53 = vshll.u32 %v4588_v35, 16  ;;  %v4514_v44 = vld [vmem:[%s5270_s21 + $0x27c] sm:$0x1] }
 0x204   : > { %v2790_v42 = vor.u32 %v2788_v63, %v7367_v25  ;;  %v7372_v7 = vrot.slane %v3345_v51, 7  ;;  %v4652_v59 = vpack.c.bf16 %v1730_v23, %v1730_v23  ;;  %v4586_v56 = vpack.c.bf16 %v1664_v47, %v1664_v47  ;;  %v4988_v36 = vld [vmem:[%s7578_s2] ss:$0 sm:$0xff] }
 0x205   : > { %v2813_v55 = vrot.slane %v2811_v24, 7  ;;  %v1451_v1 = vadd.f32 %v6956_v27, %v7662_v43  ;;  %v1216_v13 = vadd.f32 %v6956_v27, %v6799_v8  ;;  %v1472_v12 = vadd.f32 %v6956_v27, %v6801_v11 }
 0x206   : > { %v3707_v2 = vsel %vm5858_vm9, %v2790_v42, %v4397_v41  ;;  %v2791_v0 = vrot.slane %v7367_v25, 4  ;;  %v3350_v28 = vor.u32 %v3348_v20, %v7372_v7  ;;  %v3371_v10 = vshrl.u32 %v4652_v59, 16  ;;  %v7664_v20 = vld [vmem:[#allocation8_spill] sm:$0xff] }
 0x207   : > { %4398 = vst [vmem:[%s5270_s21 + $0x12c] sm:$0xf] %v3707_v2  ;;  %v2816_v57 = vor.u32 %v2814_v53, %v2813_v55  ;;  %v2818_v3 = vrot.slane %v2813_v55, 4  ;;  %v3374_v17 = vshll.u32 %v4652_v59, 16  ;;  %v2793_v4 = vshrl.u32 %v4586_v56, 16  ;;  %1600 = vst.msk [vmem:[%s5825_s30 + $0x3c8] sm:$0xff] %vm1478_vm5, %v1451_v1 }
 0x208   : > { %v2796_v60 = vshll.u32 %v4586_v56, 16  ;;  %1541 = vst.msk [vmem:[%s5825_s30 + $0x1f0] sm:$0xff] %vm1478_vm5, %v1216_v13  ;;  %1605 = vst.msk [vmem:[%s5825_s30 + $0x3f0] sm:$0xff] %vm1478_vm5, %v1472_v12  ;;  %v3851_v8 = vsel %vm5858_vm9, %v3350_v28, %v4509_v29  ;;  %v1728_v54 = vmax.f32 %v1451_v1, 0.0  ;;  %v3373_v16 = vrot.slane %v3371_v10, 7  ;;  %v7666_v28 = vld [vmem:[#allocation10_spill] sm:$0xff] }
 0x209   : > { %v2817_v11 = vsel %vm5887_vm11, %v2809_v9, %v2816_v57  ;;  %v3713_v27 = vsel %vm5871_vm10, %v2818_v3, %v4402_v61  ;;  %4510 = vst [vmem:[%s5270_s21 + $0x26c] sm:$0xf] %v3851_v8  ;;  %v2795_v33 = vrot.slane %v2793_v4, 7  ;;  %v1669_v26 = vmax.f32 %v1216_v13, 0.0  ;;  %v4404_v3 = vld [vmem:[%s5270_s21 + $0x140] sm:$0xf] }
 0x20a   : > { %4401 = vst.msk [vmem:[%s5270_s21 + $0x138] sm:$0xf] %vm1735_vm3, %v2817_v11  ;;  %4403 = vst [vmem:[%s5270_s21 + $0x13c] sm:$0x1] %v3713_v27  ;;  %v1733_v38 = vmax.f32 %v1472_v12, 0.0  ;;  %v4650_v48 = vpack.c.bf16 %v1728_v54, %v1728_v54  ;;  %v1208_v19 = vadd.f32 %v4988_v36, %v6810_v15  ;;  %v1464_v32 = vadd.f32 %v4988_v36, %v6819_v58  ;;  %v7665_v12 = vld [vmem:[#allocation9_spill] sm:$0xff] }
 0x20b   : > { %v1219_v21 = vadd.f32 %v4988_v36, %v7663_v37  ;;  %v3376_v31 = vor.u32 %v3374_v17, %v3373_v16  ;;  %v3378_v30 = vrot.slane %v3373_v16, 4  ;;  %v2798_v50 = vor.u32 %v2796_v60, %v2795_v33  ;;  %v4516_v27 = vld [vmem:[%s5270_s21 + $0x280] sm:$0xf]  ;;  %v4409_v54 = vld [vmem:[%s5270_s21 + $0x150] sm:$0x1] }
 0x20c   : > { %v2800_v14 = vrot.slane %v2795_v33, 4  ;;  %v3365_v45 = vshll.u32 %v7345_v46, 16  ;;  %v3353_v39 = vshrl.u32 %v4650_v48, 16  ;;  %v7411_v63 = vpack.c.bf16 %v1669_v26, %v1669_v26  ;;  %1539 = vst.msk [vmem:[%s5825_s30 + $0x1e0] sm:$0xff] %vm1478_vm5, %v1208_v19  ;;  %1603 = vst.msk [vmem:[%s5825_s30 + $0x3e0] sm:$0xff] %vm1478_vm5, %v1464_v32 }
 0x20d   : > { %1542 = vst.msk [vmem:[%s5825_s30 + $0x1f8] sm:$0xff] %vm1478_vm5, %v1219_v21  ;;  %v3377_v15 = vsel %vm5887_vm11, %v3369_v22, %v3376_v31  ;;  %v3857_v58 = vsel %vm5871_vm10, %v3378_v30, %v4514_v44  ;;  %v2799_v18 = vsel %vm5887_vm11, %v2791_v0, %v2798_v50  ;;  %v3356_v35 = vshll.u32 %v4650_v48, 16 }
 0x20e   : > { %v2808_v46 = vsel %vm5887_vm11, %v2800_v14, %v2807_v34  ;;  %v3367_v6 = vor.u32 %v3365_v45, %v7365_v49  ;;  %4513 = vst.msk [vmem:[%s5270_s21 + $0x278] sm:$0xf] %vm1735_vm3, %v3377_v15  ;;  %4515 = vst [vmem:[%s5270_s21 + $0x27c] sm:$0x1] %v3857_v58  ;;  %v3355_v40 = vrot.slane %v3353_v39, 7  ;;  %v7435_v25 = vpack.c.bf16 %v1733_v38, %v1733_v38 }
 0x20f   : > { %4399 = vst.msk [vmem:[%s5270_s21 + $0x130] sm:$0xf] %vm1735_vm3, %v2799_v18  ;;  %4400 = vst.msk [vmem:[%s5270_s21 + $0x134] sm:$0xf] %vm1735_vm3, %v2808_v46  ;;  %v1667_v23 = vmax.f32 %v1208_v19, 0.0  ;;  %v1731_v47 = vmax.f32 %v1464_v32, 0.0  ;;  %v1475_v53 = vadd.f32 %v4988_v36, %v7664_v20  ;;  %v1211_v0 = vadd.f32 %v4988_v36, %v7665_v12 }
 0x210   : > { %v1670_v34 = vmax.f32 %v1219_v21, 0.0  ;;  %v3351_v49 = vrot.slane %v7372_v7, 4  ;;  %v3358_v9 = vor.u32 %v3356_v35, %v3355_v40  ;;  %v3360_v41 = vrot.slane %v3355_v40, 4 }
 0x211   : > { %v2837_v51 = vshrl.u32 %v7411_v63, 16  ;;  %v4589_v24 = vpack.c.bf16 %v1667_v23, %v1667_v23  ;;  %v4653_v22 = vpack.c.bf16 %v1731_v47, %v1731_v47  ;;  %v3397_v7 = vshrl.u32 %v7435_v25, 16  ;;  %1606 = vst.msk [vmem:[%s5825_s30 + $0x3f8] sm:$0xff] %vm1478_vm5, %v1475_v53  ;;  %1540 = vst.msk [vmem:[%s5825_s30 + $0x1e8] sm:$0xff] %vm1478_vm5, %v1211_v0 }
 0x212   : > { %v4592_v42 = vpack.c.bf16 %v1670_v34, %v1670_v34  ;;  %v3359_v55 = vsel %vm5887_vm11, %v3351_v49, %v3358_v9  ;;  %v3368_v59 = vsel %vm5887_vm11, %v3360_v41, %v3367_v6  ;;  %v1734_v13 = vmax.f32 %v1475_v53, 0.0 }
 0x213   : > { %4511 = vst.msk [vmem:[%s5270_s21 + $0x270] sm:$0xf] %vm1735_vm3, %v3359_v55  ;;  %4512 = vst.msk [vmem:[%s5270_s21 + $0x274] sm:$0xf] %vm1735_vm3, %v3368_v59  ;;  %v2820_v56 = vshrl.u32 %v4589_v24, 16  ;;  %v7453_v2 = vrot.slane %v2837_v51, 7  ;;  %v7466_v57 = vadd.f32 %v4988_v36, %v7666_v28 }
 0x214   : > { %v2823_v29 = vshll.u32 %v4589_v24, 16  ;;  %v3380_v61 = vshrl.u32 %v4653_v22, 16  ;;  %v2846_v43 = vshrl.u32 %v4592_v42, 16  ;;  %v3383_v17 = vshll.u32 %v4653_v22, 16 }
 0x215   : > { %v7462_v1 = vrot.slane %v2820_v56, 7  ;;  %v2849_v60 = vshll.u32 %v4592_v42, 16  ;;  %v7471_v8 = vrot.slane %v3397_v7, 7  ;;  %v4656_v16 = vpack.c.bf16 %v1734_v13, %v1734_v13  ;;  %1604 = vst.msk [vmem:[%s5825_s30 + $0x3e8] sm:$0xff] %vm1478_vm5, %v7466_v57 }
 0x216   : > { %v7469_v10 = vrot.slane %v3380_v61, 7  ;;  %v2848_v4 = vrot.slane %v2846_v43, 7  ;;  %v1668_v33 = vmax.f32 %v1211_v0, 0.0  ;;  %v2844_v26 = vrot.slane %v7453_v2, 4 }
 0x217   : > { %v2825_v11 = vor.u32 %v2823_v29, %v7462_v1 }
 0x218   : > { %v3385_v38 = vor.u32 %v3383_v17, %v7469_v10  ;;  %v2851_v44 = vor.u32 %v2849_v60, %v2848_v4  ;;  %v2853_v48 = vrot.slane %v2848_v4, 4 }
 0x219   : > { %5002 = shalt.err (!%p4999_p5)
}
 0x21a   : > { %s5003_s22 = scalar_lea.hbm %s7458_s14, 16384  ;;  %s5007_s8 = scalar_lea.hbm %s7580_s4, 32768 }
 0x21b   : > { %p5004_p6 = scmp.ne.s32.totalorder %s7458_s14, %s5003_s22  ;;  %p5008_p10 = scmp.lt.u32.totalorder %s7458_s14, %s7580_s4 }
 0x21c   : > { %p5009_p11 = scmp.lt.u32.totalorder %s5007_s8, %s5003_s22  ;;  %p5011_p13 = scmp.lt.u32.totalorder %s5003_s22, %s7458_s14 }
 0x21d   : > { %p5005_p7 = pnand %p5004_p6, %p5139_p4 }
 0x21e   : > { %p5010_p12 = por %p5009_p11, %p5008_p10 }
 0x21f   : > { %p5006_p9 = pneg %p5005_p7 }
 0x220   : > { %p5012_p0 = por %p5011_p13, %p5010_p12 }
 0x222   : > { %p5013_p1 = pnand %p5012_p0, %p5006_p9 }
 0x224   : > { %5016 = shalt.err (!%p5013_p1)
}
 0x225   : > { %s5072_s11 = smov 128   ;;  %s5073_s18 = smov 8   ;;  %v3716_v36 = vsel %vm5858_vm9, %v2825_v11, %v4404_v3  ;;  %v3406_v19 = vshrl.u32 %v4656_v16, 16  ;;  %v4590_v32 = vpack.c.bf16 %v1668_v33, %v1668_v33  ;;  %v3860_v37 = vsel %vm5858_vm9, %v3385_v38, %v4516_v27  ;;  %v4521_v15 = vld [vmem:[%s5270_s21 + $0x290] sm:$0x1] }
 0x226   : > { %4861 = dma.vmem_to_hbm [thread:$0]  (%p5139_p4), %s7460_s12, 16384, %s7458_s14, %s7485_s24, %s5072_s11, %s5072_s11, %s5073_s18   ;;  %v2852_v21 = vsel %vm5887_vm11, %v2844_v26, %v2851_v44  ;;  %v3722_v31 = vsel %vm5871_vm10, %v2853_v48, %v4409_v54  ;;  %v1732_v30 = vmax.f32 %v7466_v57, 0.0  ;;  %v3409_v14 = vshll.u32 %v4656_v16, 16 }
 0x227   : > { %4405 = vst [vmem:[%s5270_s21 + $0x140] sm:$0xf] %v3716_v36  ;;  %4517 = vst [vmem:[%s5270_s21 + $0x280] sm:$0xf] %v3860_v37  ;;  %v3408_v50 = vrot.slane %v3406_v19, 7  ;;  %v2828_v45 = vshrl.u32 %v4590_v32, 16 }
 0x228   : > { %4408 = vst.msk [vmem:[%s5270_s21 + $0x14c] sm:$0xf] %vm1735_vm3, %v2852_v21  ;;  %4410 = vst [vmem:[%s5270_s21 + $0x150] sm:$0x1] %v3722_v31  ;;  %v2840_v39 = vshll.u32 %v7411_v63, 16  ;;  %v3404_v52 = vrot.slane %v7471_v8, 4  ;;  %v4654_v58 = vpack.c.bf16 %v1732_v30, %v1732_v30 }
 0x229   : > { %v3411_v18 = vor.u32 %v3409_v14, %v3408_v50  ;;  %v3413_v46 = vrot.slane %v3408_v50, 4  ;;  %v2830_v6 = vrot.slane %v2828_v45, 7  ;;  %v2831_v40 = vshll.u32 %v4590_v32, 16 }
 0x22a   : > { %v2842_v35 = vor.u32 %v2840_v39, %v7453_v2  ;;  %v2826_v23 = vrot.slane %v7462_v1, 4  ;;  %v3388_v47 = vshrl.u32 %v4654_v58, 16  ;;  %v3400_v41 = vshll.u32 %v7435_v25, 16 }
 0x22b   : > { %v3412_v63 = vsel %vm5887_vm11, %v3404_v52, %v3411_v18  ;;  %v3866_v34 = vsel %vm5871_vm10, %v3413_v46, %v4521_v15  ;;  %v2833_v49 = vor.u32 %v2831_v40, %v2830_v6  ;;  %v2835_v9 = vrot.slane %v2830_v6, 4 }
 0x22c   : > { %4520 = vst.msk [vmem:[%s5270_s21 + $0x28c] sm:$0xf] %vm1735_vm3, %v3412_v63  ;;  %4522 = vst [vmem:[%s5270_s21 + $0x290] sm:$0x1] %v3866_v34  ;;  %v3390_v51 = vrot.slane %v3388_v47, 7  ;;  %v3391_v24 = vshll.u32 %v4654_v58, 16  ;;  %v3402_v62 = vor.u32 %v3400_v41, %v7471_v8 }
 0x22d   : > { %v2834_v22 = vsel %vm5887_vm11, %v2826_v23, %v2833_v49  ;;  %v2843_v42 = vsel %vm5887_vm11, %v2835_v9, %v2842_v35  ;;  %v3386_v20 = vrot.slane %v7469_v10, 4 }
 0x22e   : > { %4406 = vst.msk [vmem:[%s5270_s21 + $0x144] sm:$0xf] %vm1735_vm3, %v2834_v22  ;;  %4407 = vst.msk [vmem:[%s5270_s21 + $0x148] sm:$0xf] %vm1735_vm3, %v2843_v42  ;;  %v3393_v25 = vor.u32 %v3391_v24, %v3390_v51  ;;  %v3395_v53 = vrot.slane %v3390_v51, 4 }
 0x230   : > { %v3394_v55 = vsel %vm5887_vm11, %v3386_v20, %v3393_v25  ;;  %v3403_v59 = vsel %vm5887_vm11, %v3395_v53, %v3402_v62 }
 0x231   : > { %4518 = vst.msk [vmem:[%s5270_s21 + $0x284] sm:$0xf] %vm1735_vm3, %v3394_v55  ;;  %4519 = vst.msk [vmem:[%s5270_s21 + $0x288] sm:$0xf] %vm1735_vm3, %v3403_v59 }
 0x232 PF: > { %p4867_p4 = scmp.ge.s32.totalorder %s5067_s20, 2  ;;  %s3920_s25 = sand.u32 1, %s5047_s15  }
 0x233   : > { %s3921_s12 = scalar_lea.sflag [#allocation3], %s3920_s25 }
 0x234   : > { %p4864_p2 = pnand %p4867_p4, %p5146_p8 }
 0x236   : > { %5042 = dma.done.wait (!%p4864_p2), %s3921_s12, 16384  }
 0x237   : > { %5044 = vsyncadd (!%p4864_p2), %s3921_s12, 4294950912  ;;  %s18_s20 = sadd.s32 1, %s5067_s20   ;;  %s7667_s15 = smov %s5051_s16 }
 0x238   : > { %p15_p3 = scmp.ge.s32.totalorder %s18_s20, 4   ;;  %s7668_s16 = smov %s5055_s17 }
 0x239   : > { %s7669_s17 = smov %s5152_s28  ;;  %s7670_s18 = smov %s5063_s19 }
 0x23a   : > { %s7671_s19 = smov %s7673_s23  ;;  %17 = sbr.rel (!%p15_p3) target bundleno = 4 (0x4), region = 86 }
 0x241   :  { %3926 = vsyncpa [#allocation3], 1 }
 0x242   :  { %3928 = vsyncpa [#allocation3 + $0x1], 1 }

</bundles_post_ra>
